<compile_context>
chip_gen: v7x
topology: tpu7x:2x2x1
jax: 0.10.0
libtpu: 0.0.40
codegen_flags: <defaults>
</compile_context>

<pallas_src>
import functools

import jax
import jax.numpy as jnp
from jax import lax
from jax.experimental import pallas as pl
from jax.experimental.pallas import tpu as pltpu

_LPAD = 8  # interior W offset inside the halo scratch (8-sublane aligned)


def _res_block_kernel(x_ref, w1_ref, w2_ref, t1_ref, t2_ref, o_ref,
                      pad_ref, col_ref, *, NB, H, W, WP, C):
    """Fused residual block for NB images (NHWC, channels on the lane axis).

    x_ref  : (NB, H, W, C)     f32  input block (also the residual identity)
    w*_ref : (9*C, C)          bf16 im2col weights [(kh*3+kw)*C + c_in, c_out]
                               with the BN scale pre-folded into c_out
    t*_ref : (1, C)            f32  folded BN shift ((bias-mean)*scale+beta)
    o_ref  : (NB, H, W, C)     f32  output block
    pad_ref: (NB, H+2, WP, C)  f32  VMEM scratch: activation + zero halo;
                               interior lives at W offset _LPAD (aligned)
    col_ref: (NB*H*W, 9*C)     bf16 VMEM scratch: im2col matmul operand
    """
    M = NB * H * W
    L = _LPAD

    def build_cols():
        # 9 shifted patch copies, each paid once; stores into col_ref land on
        # 128-aligned lane offsets over all M rows (unmasked).
        for kh in range(3):
            for kw in range(3):
                tap = kh * 3 + kw
                patch = pad_ref[:, kh:kh + H, L - 1 + kw:L - 1 + kw + W, :]
                col_ref[:, tap * C:(tap + 1) * C] = (
                    patch.reshape(M, C).astype(jnp.bfloat16))

    def conv3x3(w_ref, t_ref):
        build_cols()
        # Single K = 9*C contraction; accumulation stays inside the MXU
        # result FIFO/MRB, f32 result written once.
        y = jnp.dot(col_ref[...], w_ref[...],
                    preferred_element_type=jnp.float32)
        return y + t_ref[0]                      # folded BN shift

    # Zero only the 1-px rim of the halo (every step, not gated on
    # program_id == 0: grid steps may be split across TensorCores on v7x).
    zrow = jnp.zeros((NB, 1, WP, C), jnp.float32)
    zcol = jnp.zeros((NB, H, 1, C), jnp.float32)
    pad_ref[:, 0:1, :, :] = zrow                       # top halo row
    pad_ref[:, H + 1:H + 2, :, :] = zrow               # bottom halo row
    pad_ref[:, 1:H + 1, L - 1:L, :] = zcol             # left halo column
    pad_ref[:, 1:H + 1, L + W:L + W + 1, :] = zcol     # right halo column

    # Interior <- input (aligned, unmasked full-tile stores; stays f32).
    pad_ref[:, 1:H + 1, L:L + W, :] = x_ref[...]

    # conv1 -> BN1(folded) -> ReLU1; stash result back into the halo interior
    # so its zero rim emulates conv2's zero padding.
    h = jnp.maximum(conv3x3(w1_ref, t1_ref), 0.0)
    pad_ref[:, 1:H + 1, L:L + W, :] = h.reshape(NB, H, W, C)

    # conv2 -> BN2(folded) -> +identity -> ReLU2   (all f32 elementwise)
    y = conv3x3(w2_ref, t2_ref)
    out = jnp.maximum(y + x_ref[...].reshape(M, C), 0.0)
    o_ref[...] = out.reshape(NB, H, W, C).astype(o_ref.dtype)


def _fold(w_oihw, bias, gamma, beta, mean, var, C, eps):
    """Fold conv bias + eval-mode BN into (bf16 im2col weights, f32 shift)."""
    # OIHW -> (kh, kw, c_in, c_out) -> (9*C_in, C_out): row = (kh*3+kw)*C + c_in
    w = jnp.transpose(w_oihw, (2, 3, 1, 0)).reshape(9 * C, C)
    s = gamma / jnp.sqrt(var + eps)
    w = (w * s[None, :]).astype(jnp.bfloat16)            # scale -> weights
    t = ((bias - mean) * s + beta).reshape(1, C).astype(jnp.float32)
    return w, t


def _tpu_generation():
    """Best-effort TPU generation tag ('v5' | 'v6' | 'v7' | None)."""
    try:
        kind = jax.devices()[0].device_kind.lower()
    except Exception:
        return None
    for g in ("v7", "v6", "v5"):
        if g in kind:
            return g
    return None


def _choose_block_batch(B, H, W, generation):
    """Images per grid step, generation-aware."""
    rows = max(1, H * W)

    def divisor_le(n):
        n = max(1, min(B, n))
        while B % n != 0:
            n -= 1
        return n

    if generation == "v5":
        # Single TensorCore, compute-bound: one fat step (grid=1 OK).
        return divisor_le(max(1, 2048 // rows))
    if generation == "v7":
        # 2 TensorCores: want an even number of steps, >=4 if possible.
        nb = divisor_le(max(1, 512 // rows))
        while nb > 1 and (B // nb < 4 or (B // nb) % 2 != 0):
            nb = divisor_le(nb - 1)
        return nb
    # v6e / unknown: HBM-bound-ish at small C; keep >=2 steps so BlockSpec
    # double-buffering overlaps DMA with compute.
    nb = divisor_le(max(1, 512 // rows))
    while nb > 1 and B // nb < 2:
        nb = divisor_le(nb - 1)
    return nb


def _vmem_limit_bytes(NB, H, W, WP, C):
    """Explicit per-step VMEM budget (double-buffered blocks + scratch)."""
    M = NB * H * W
    blk = M * C * 4                   # f32 in / out block
    wts = 9 * C * C * 2               # bf16 folded weights (one conv)
    halo = NB * (H + 2) * WP * C * 4  # f32 halo scratch
    cols = M * 9 * C * 2              # bf16 im2col scratch
    shift = C * 4
    need = 2 * (2 * blk) + 2 * (2 * wts) + 2 * (2 * shift) + halo + cols
    need = int(need * 1.5) + (8 << 20)    # headroom for compiler temporaries
    # Stay within the 32 MiB scoped default when possible; never ask for more
    # than fits comfortably in v7x's 64 MiB VMEM.
    return min(max(32 << 20, need), 56 << 20)


def residual_block_pallas_nhwc(x_nhwc, w1, b1, g1, be1, m1, v1,
                               w2, b2, g2, be2, m2, v2, eps=1e-5):
    """Core fused kernel. x_nhwc: (B, H, W, C) f32; w*: (C, C, 3, 3) OIHW."""
    B, H, W, C = x_nhwc.shape
    gen = _tpu_generation()
    NB = _choose_block_batch(B, H, W, gen)
    L = _LPAD
    WP = ((L + W + 1 + 7) // 8) * 8   # halo W extent, rounded to 8 sublanes

    w1_m, t1 = _fold(w1, b1, g1, be1, m1, v1, C, eps)
    w2_m, t2 = _fold(w2, b2, g2, be2, m2, v2, C, eps)

    kernel = functools.partial(_res_block_kernel, NB=NB, H=H, W=W, WP=WP, C=C)
    M = NB * H * W

    # TODO(synk): if the surrounding network is bf16, emit the output block in
    # bf16 (halves HBM writeback on HBM-bound v6e); kept f32 for PyTorch parity.
    return pl.pallas_call(
        kernel,
        out_shape=jax.ShapeDtypeStruct((B, H, W, C), jnp.float32),
        grid_spec=pltpu.PrefetchScalarGridSpec(
            num_scalar_prefetch=0,
            grid=(B // NB,),
            in_specs=[
                pl.BlockSpec((NB, H, W, C), lambda b: (b, 0, 0, 0)),
                pl.BlockSpec((9 * C, C), lambda b: (0, 0)),
                pl.BlockSpec((9 * C, C), lambda b: (0, 0)),
                pl.BlockSpec((1, C), lambda b: (0, 0)),
                pl.BlockSpec((1, C), lambda b: (0, 0)),
            ],
            out_specs=pl.BlockSpec((NB, H, W, C), lambda b: (b, 0, 0, 0)),
            scratch_shapes=[
                pltpu.VMEM((NB, H + 2, WP, C), jnp.float32),   # halo buffer
                pltpu.VMEM((M, 9 * C), jnp.bfloat16),          # im2col operand
            ]),
        compiler_params=pltpu.CompilerParams(
            dimension_semantics=("parallel",),
            vmem_limit_bytes=_vmem_limit_bytes(NB, H, W, WP, C)),
    )(x_nhwc, w1_m, w2_m, t1, t2)


def residual_block_pallas(x_nchw, *params, eps=1e-5):
    """PyTorch-layout (NCHW) wrapper.  The transposes are pure layout glue;
    an NHWC model should call residual_block_pallas_nhwc directly."""
    x = jnp.transpose(x_nchw, (0, 2, 3, 1))
    y = residual_block_pallas_nhwc(x, *params, eps=eps)
    return jnp.transpose(y, (0, 3, 1, 2))


# --------------------------- pure-JAX reference ------------------------------
def residual_block_ref(x_nchw, w1, b1, g1, be1, m1, v1,
                       w2, b2, g2, be2, m2, v2, eps=1e-5):
    def conv(x, w, b):  # NCHW, OIHW
        y = lax.conv_general_dilated(
            x, w, window_strides=(1, 1), padding=((1, 1), (1, 1)),
            dimension_numbers=("NCHW", "OIHW", "NCHW"))
        return y + b[None, :, None, None]

    def bn(x, gamma, beta, mean, var):
        s = (gamma / jnp.sqrt(var + eps))[None, :, None, None]
        return (x - mean[None, :, None, None]) * s + beta[None, :, None, None]

    h = jnp.maximum(bn(conv(x_nchw, w1, b1), g1, be1, m1, v1), 0.0)
    y = bn(conv(h, w2, b2), g2, be2, m2, v2)
    return jnp.maximum(y + x_nchw, 0.0)


if __name__ == "__main__":
    # filters=128, 8x8 board: small stand-in for the production 256-filter cfg.
    B, C, H, W = 8, 128, 8, 8
    key = jax.random.PRNGKey(0)
    ks = jax.random.split(key, 11)

    x = jax.random.normal(ks[0], (B, C, H, W), jnp.float32)

    w1 = jax.random.normal(ks[1], (C, C, 3, 3), jnp.float32) * 0.05
    b1 = jax.random.normal(ks[2], (C,), jnp.float32) * 0.1
    g1 = 1.0 + 0.1 * jax.random.normal(ks[3], (C,), jnp.float32)
    be1 = 0.1 * jax.random.normal(ks[4], (C,), jnp.float32)
    m1 = 0.1 * jax.random.normal(ks[5], (C,), jnp.float32)
    v1 = 1.0 + 0.1 * jax.random.uniform(ks[6], (C,), jnp.float32)

    w2 = jax.random.normal(ks[7], (C, C, 3, 3), jnp.float32) * 0.05
    b2 = jax.random.normal(ks[8], (C,), jnp.float32) * 0.1
    g2 = 1.0 + 0.1 * jax.random.normal(ks[9], (C,), jnp.float32)
    be2 = 0.1 * jax.random.normal(ks[10], (C,), jnp.float32)
    m2 = jnp.zeros((C,), jnp.float32)
    v2 = jnp.ones((C,), jnp.float32)

    args = (x, w1, b1, g1, be1, m1, v1, w2, b2, g2, be2, m2, v2)

    out = jax.block_until_ready(residual_block_pallas(*args))
    ref = jax.block_until_ready(residual_block_ref(*args))

    assert out.shape == (B, C, H, W)
    err = float(jnp.max(jnp.abs(out - ref)))
    # bf16 matmul operands (f32 accumulation) over K = 9*C = 1152-term sums
    # give ~1e-2-level deviation from the all-f32 reference.
    assert jnp.allclose(out, ref, atol=4e-2, rtol=4e-2), f"max abs err {err}"

    print("KERNEL_OK")
</pallas_src>

<mosaic_0001>
module attributes {stable_mosaic.version = 11 : i64} {
  func.func @_res_block_kernel(%arg0: i32, %arg1: memref<4x8x8x128xf32, #tpu.memory_space<vmem>>, %arg2: memref<1152x128xbf16, #tpu.memory_space<vmem>>, %arg3: memref<1152x128xbf16, #tpu.memory_space<vmem>>, %arg4: memref<1x128xf32, #tpu.memory_space<vmem>>, %arg5: memref<1x128xf32, #tpu.memory_space<vmem>>, %arg6: memref<4x8x8x128xf32, #tpu.memory_space<vmem>>, %arg7: memref<4x10x24x128xf32, #tpu.memory_space<vmem>>, %arg8: memref<256x1152xbf16, #tpu.memory_space<vmem>>) attributes {dimension_semantics = [#tpu.dimension_semantics<parallel>], iteration_bounds = array<i64: 2>, scalar_prefetch = 0 : i64, scratch_operands = 2 : i64, tpu.core_type = #tpu.core_type<tc>, window_params = [{transform_indices = @transform_0, window_bounds = array<i64: 4, 8, 8, 128>}, {pipeline_mode = #tpu.pipeline_mode<synchronous>, transform_indices = @transform_1, window_bounds = array<i64: 1152, 128>}, {pipeline_mode = #tpu.pipeline_mode<synchronous>, transform_indices = @transform_2, window_bounds = array<i64: 1152, 128>}, {pipeline_mode = #tpu.pipeline_mode<synchronous>, transform_indices = @transform_3, window_bounds = array<i64: 1, 128>}, {pipeline_mode = #tpu.pipeline_mode<synchronous>, transform_indices = @transform_4, window_bounds = array<i64: 1, 128>}, {transform_indices = @transform_5, window_bounds = array<i64: 4, 8, 8, 128>}]} {
    %cst = arith.constant 0.000000e+00 : f32
    %0 = vector.broadcast %cst : f32 to vector<4x1x24x128xf32>
    %cst_0 = arith.constant 0.000000e+00 : f32
    %1 = vector.broadcast %cst_0 : f32 to vector<4x8x1x128xf32>
    %c0 = arith.constant 0 : index
    %c0_1 = arith.constant 0 : index
    %c0_2 = arith.constant 0 : index
    %c0_3 = arith.constant 0 : index
    %2 = vector.load %arg7[%c0, %c0_1, %c0_2, %c0_3] : memref<4x10x24x128xf32, #tpu.memory_space<vmem>>, vector<4x1x24x128xf32>
    tpu.vector_store %arg7[%c0, %c0_1, %c0_2, %c0_3], %0 {strides = array<i32>} : memref<4x10x24x128xf32, #tpu.memory_space<vmem>>, vector<4x1x24x128xf32>,
    %c0_4 = arith.constant 0 : index
    %c9 = arith.constant 9 : index
    %c0_5 = arith.constant 0 : index
    %c0_6 = arith.constant 0 : index
    %3 = vector.load %arg7[%c0_4, %c9, %c0_5, %c0_6] : memref<4x10x24x128xf32, #tpu.memory_space<vmem>>, vector<4x1x24x128xf32>
    tpu.vector_store %arg7[%c0_4, %c9, %c0_5, %c0_6], %0 {strides = array<i32>} : memref<4x10x24x128xf32, #tpu.memory_space<vmem>>, vector<4x1x24x128xf32>,
    %c0_7 = arith.constant 0 : index
    %c1 = arith.constant 1 : index
    %c7 = arith.constant 7 : index
    %c0_8 = arith.constant 0 : index
    %4 = vector.load %arg7[%c0_7, %c1, %c7, %c0_8] : memref<4x10x24x128xf32, #tpu.memory_space<vmem>>, vector<4x8x1x128xf32>
    tpu.vector_store %arg7[%c0_7, %c1, %c7, %c0_8], %1 {strides = array<i32>} : memref<4x10x24x128xf32, #tpu.memory_space<vmem>>, vector<4x8x1x128xf32>,
    %c0_9 = arith.constant 0 : index
    %c1_10 = arith.constant 1 : index
    %c16 = arith.constant 16 : index
    %c0_11 = arith.constant 0 : index
    %5 = vector.load %arg7[%c0_9, %c1_10, %c16, %c0_11] : memref<4x10x24x128xf32, #tpu.memory_space<vmem>>, vector<4x8x1x128xf32>
    tpu.vector_store %arg7[%c0_9, %c1_10, %c16, %c0_11], %1 {strides = array<i32>} : memref<4x10x24x128xf32, #tpu.memory_space<vmem>>, vector<4x8x1x128xf32>,
    %c0_12 = arith.constant 0 : index
    %c0_13 = arith.constant 0 : index
    %c0_14 = arith.constant 0 : index
    %c0_15 = arith.constant 0 : index
    %6 = vector.load %arg1[%c0_12, %c0_13, %c0_14, %c0_15] : memref<4x8x8x128xf32, #tpu.memory_space<vmem>>, vector<4x8x8x128xf32>
    %c0_16 = arith.constant 0 : index
    %c1_17 = arith.constant 1 : index
    %c8 = arith.constant 8 : index
    %c0_18 = arith.constant 0 : index
    %7 = vector.load %arg7[%c0_16, %c1_17, %c8, %c0_18] : memref<4x10x24x128xf32, #tpu.memory_space<vmem>>, vector<4x8x8x128xf32>
    tpu.vector_store %arg7[%c0_16, %c1_17, %c8, %c0_18], %6 {strides = array<i32>} : memref<4x10x24x128xf32, #tpu.memory_space<vmem>>, vector<4x8x8x128xf32>,
    %c0_19 = arith.constant 0 : index
    %c0_20 = arith.constant 0 : index
    %c7_21 = arith.constant 7 : index
    %c0_22 = arith.constant 0 : index
    %8 = vector.load %arg7[%c0_19, %c0_20, %c7_21, %c0_22] : memref<4x10x24x128xf32, #tpu.memory_space<vmem>>, vector<4x8x8x128xf32>
    %9 = vector.shape_cast %8 : vector<4x8x8x128xf32> to vector<256x128xf32>
    %10 = arith.truncf %9 : vector<256x128xf32> to vector<256x128xbf16>
    %c0_23 = arith.constant 0 : index
    %c0_24 = arith.constant 0 : index
    %11 = vector.load %arg8[%c0_23, %c0_24] : memref<256x1152xbf16, #tpu.memory_space<vmem>>, vector<256x128xbf16>
    tpu.vector_store %arg8[%c0_23, %c0_24], %10 {strides = array<i32>} : memref<256x1152xbf16, #tpu.memory_space<vmem>>, vector<256x128xbf16>,
    %c0_25 = arith.constant 0 : index
    %c0_26 = arith.constant 0 : index
    %c8_27 = arith.constant 8 : index
    %c0_28 = arith.constant 0 : index
    %12 = vector.load %arg7[%c0_25, %c0_26, %c8_27, %c0_28] : memref<4x10x24x128xf32, #tpu.memory_space<vmem>>, vector<4x8x8x128xf32>
    %13 = vector.shape_cast %12 : vector<4x8x8x128xf32> to vector<256x128xf32>
    %14 = arith.truncf %13 : vector<256x128xf32> to vector<256x128xbf16>
    %c0_29 = arith.constant 0 : index
    %c128 = arith.constant 128 : index
    %15 = vector.load %arg8[%c0_29, %c128] : memref<256x1152xbf16, #tpu.memory_space<vmem>>, vector<256x128xbf16>
    tpu.vector_store %arg8[%c0_29, %c128], %14 {strides = array<i32>} : memref<256x1152xbf16, #tpu.memory_space<vmem>>, vector<256x128xbf16>,
    %c0_30 = arith.constant 0 : index
    %c0_31 = arith.constant 0 : index
    %c9_32 = arith.constant 9 : index
    %c0_33 = arith.constant 0 : index
    %16 = vector.load %arg7[%c0_30, %c0_31, %c9_32, %c0_33] : memref<4x10x24x128xf32, #tpu.memory_space<vmem>>, vector<4x8x8x128xf32>
    %17 = vector.shape_cast %16 : vector<4x8x8x128xf32> to vector<256x128xf32>
    %18 = arith.truncf %17 : vector<256x128xf32> to vector<256x128xbf16>
    %c0_34 = arith.constant 0 : index
    %c256 = arith.constant 256 : index
    %19 = vector.load %arg8[%c0_34, %c256] : memref<256x1152xbf16, #tpu.memory_space<vmem>>, vector<256x128xbf16>
    tpu.vector_store %arg8[%c0_34, %c256], %18 {strides = array<i32>} : memref<256x1152xbf16, #tpu.memory_space<vmem>>, vector<256x128xbf16>,
    %c0_35 = arith.constant 0 : index
    %c1_36 = arith.constant 1 : index
    %c7_37 = arith.constant 7 : index
    %c0_38 = arith.constant 0 : index
    %20 = vector.load %arg7[%c0_35, %c1_36, %c7_37, %c0_38] : memref<4x10x24x128xf32, #tpu.memory_space<vmem>>, vector<4x8x8x128xf32>
    %21 = vector.shape_cast %20 : vector<4x8x8x128xf32> to vector<256x128xf32>
    %22 = arith.truncf %21 : vector<256x128xf32> to vector<256x128xbf16>
    %c0_39 = arith.constant 0 : index
    %c384 = arith.constant 384 : index
    %23 = vector.load %arg8[%c0_39, %c384] : memref<256x1152xbf16, #tpu.memory_space<vmem>>, vector<256x128xbf16>
    tpu.vector_store %arg8[%c0_39, %c384], %22 {strides = array<i32>} : memref<256x1152xbf16, #tpu.memory_space<vmem>>, vector<256x128xbf16>,
    %c0_40 = arith.constant 0 : index
    %c1_41 = arith.constant 1 : index
    %c8_42 = arith.constant 8 : index
    %c0_43 = arith.constant 0 : index
    %24 = vector.load %arg7[%c0_40, %c1_41, %c8_42, %c0_43] : memref<4x10x24x128xf32, #tpu.memory_space<vmem>>, vector<4x8x8x128xf32>
    %25 = vector.shape_cast %24 : vector<4x8x8x128xf32> to vector<256x128xf32>
    %26 = arith.truncf %25 : vector<256x128xf32> to vector<256x128xbf16>
    %c0_44 = arith.constant 0 : index
    %c512 = arith.constant 512 : index
    %27 = vector.load %arg8[%c0_44, %c512] : memref<256x1152xbf16, #tpu.memory_space<vmem>>, vector<256x128xbf16>
    tpu.vector_store %arg8[%c0_44, %c512], %26 {strides = array<i32>} : memref<256x1152xbf16, #tpu.memory_space<vmem>>, vector<256x128xbf16>,
    %c0_45 = arith.constant 0 : index
    %c1_46 = arith.constant 1 : index
    %c9_47 = arith.constant 9 : index
    %c0_48 = arith.constant 0 : index
    %28 = vector.load %arg7[%c0_45, %c1_46, %c9_47, %c0_48] : memref<4x10x24x128xf32, #tpu.memory_space<vmem>>, vector<4x8x8x128xf32>
    %29 = vector.shape_cast %28 : vector<4x8x8x128xf32> to vector<256x128xf32>
    %30 = arith.truncf %29 : vector<256x128xf32> to vector<256x128xbf16>
    %c0_49 = arith.constant 0 : index
    %c640 = arith.constant 640 : index
    %31 = vector.load %arg8[%c0_49, %c640] : memref<256x1152xbf16, #tpu.memory_space<vmem>>, vector<256x128xbf16>
    tpu.vector_store %arg8[%c0_49, %c640], %30 {strides = array<i32>} : memref<256x1152xbf16, #tpu.memory_space<vmem>>, vector<256x128xbf16>,
    %c0_50 = arith.constant 0 : index
    %c2 = arith.constant 2 : index
    %c7_51 = arith.constant 7 : index
    %c0_52 = arith.constant 0 : index
    %32 = vector.load %arg7[%c0_50, %c2, %c7_51, %c0_52] : memref<4x10x24x128xf32, #tpu.memory_space<vmem>>, vector<4x8x8x128xf32>
    %33 = vector.shape_cast %32 : vector<4x8x8x128xf32> to vector<256x128xf32>
    %34 = arith.truncf %33 : vector<256x128xf32> to vector<256x128xbf16>
    %c0_53 = arith.constant 0 : index
    %c768 = arith.constant 768 : index
    %35 = vector.load %arg8[%c0_53, %c768] : memref<256x1152xbf16, #tpu.memory_space<vmem>>, vector<256x128xbf16>
    tpu.vector_store %arg8[%c0_53, %c768], %34 {strides = array<i32>} : memref<256x1152xbf16, #tpu.memory_space<vmem>>, vector<256x128xbf16>,
    %c0_54 = arith.constant 0 : index
    %c2_55 = arith.constant 2 : index
    %c8_56 = arith.constant 8 : index
    %c0_57 = arith.constant 0 : index
    %36 = vector.load %arg7[%c0_54, %c2_55, %c8_56, %c0_57] : memref<4x10x24x128xf32, #tpu.memory_space<vmem>>, vector<4x8x8x128xf32>
    %37 = vector.shape_cast %36 : vector<4x8x8x128xf32> to vector<256x128xf32>
    %38 = arith.truncf %37 : vector<256x128xf32> to vector<256x128xbf16>
    %c0_58 = arith.constant 0 : index
    %c896 = arith.constant 896 : index
    %39 = vector.load %arg8[%c0_58, %c896] : memref<256x1152xbf16, #tpu.memory_space<vmem>>, vector<256x128xbf16>
    tpu.vector_store %arg8[%c0_58, %c896], %38 {strides = array<i32>} : memref<256x1152xbf16, #tpu.memory_space<vmem>>, vector<256x128xbf16>,
    %c0_59 = arith.constant 0 : index
    %c2_60 = arith.constant 2 : index
    %c9_61 = arith.constant 9 : index
    %c0_62 = arith.constant 0 : index
    %40 = vector.load %arg7[%c0_59, %c2_60, %c9_61, %c0_62] : memref<4x10x24x128xf32, #tpu.memory_space<vmem>>, vector<4x8x8x128xf32>
    %41 = vector.shape_cast %40 : vector<4x8x8x128xf32> to vector<256x128xf32>
    %42 = arith.truncf %41 : vector<256x128xf32> to vector<256x128xbf16>
    %c0_63 = arith.constant 0 : index
    %c1024 = arith.constant 1024 : index
    %43 = vector.load %arg8[%c0_63, %c1024] : memref<256x1152xbf16, #tpu.memory_space<vmem>>, vector<256x128xbf16>
    tpu.vector_store %arg8[%c0_63, %c1024], %42 {strides = array<i32>} : memref<256x1152xbf16, #tpu.memory_space<vmem>>, vector<256x128xbf16>,
    %c0_64 = arith.constant 0 : index
    %c0_65 = arith.constant 0 : index
    %44 = vector.load %arg8[%c0_64, %c0_65] : memref<256x1152xbf16, #tpu.memory_space<vmem>>, vector<256x1152xbf16>
    %c0_66 = arith.constant 0 : index
    %c0_67 = arith.constant 0 : index
    %45 = vector.load %arg2[%c0_66, %c0_67] : memref<1152x128xbf16, #tpu.memory_space<vmem>>, vector<1152x128xbf16>
    %cst_68 = arith.constant dense<0.000000e+00> : vector<256x128xf32>
    %46 = tpu.matmul %44, %45, %cst_68 {dimension_numbers = #tpu.dot_dimension_numbers<[1], [0], [0], [1], [0, 0, 1, 1], [], []>} : vector<256x1152xbf16>, vector<1152x128xbf16>, vector<256x128xf32> -> vector<256x128xf32>
    %c0_69 = arith.constant 0 : index
    %c0_70 = arith.constant 0 : index
    %47 = vector.load %arg4[%c0_69, %c0_70] : memref<1x128xf32, #tpu.memory_space<vmem>>, vector<1x128xf32>
    %48 = vector.shape_cast %47 : vector<1x128xf32> to vector<128xf32>
    %49 = vector.shape_cast %48 : vector<128xf32> to vector<1x128xf32>
    %50 = vector.broadcast %49 : vector<1x128xf32> to vector<256x128xf32>
    %51 = arith.addf %46, %50 : vector<256x128xf32>
    %cst_71 = arith.constant 0.000000e+00 : f32
    %52 = vector.broadcast %cst_71 : f32 to vector<256x128xf32>
    %53 = arith.maximumf %51, %52 : vector<256x128xf32>
    %54 = vector.shape_cast %53 : vector<256x128xf32> to vector<4x8x8x128xf32>
    %c0_72 = arith.constant 0 : index
    %c1_73 = arith.constant 1 : index
    %c8_74 = arith.constant 8 : index
    %c0_75 = arith.constant 0 : index
    %55 = vector.load %arg7[%c0_72, %c1_73, %c8_74, %c0_75] : memref<4x10x24x128xf32, #tpu.memory_space<vmem>>, vector<4x8x8x128xf32>
    tpu.vector_store %arg7[%c0_72, %c1_73, %c8_74, %c0_75], %54 {strides = array<i32>} : memref<4x10x24x128xf32, #tpu.memory_space<vmem>>, vector<4x8x8x128xf32>,
    %c0_76 = arith.constant 0 : index
    %c0_77 = arith.constant 0 : index
    %c7_78 = arith.constant 7 : index
    %c0_79 = arith.constant 0 : index
    %56 = vector.load %arg7[%c0_76, %c0_77, %c7_78, %c0_79] : memref<4x10x24x128xf32, #tpu.memory_space<vmem>>, vector<4x8x8x128xf32>
    %57 = vector.shape_cast %56 : vector<4x8x8x128xf32> to vector<256x128xf32>
    %58 = arith.truncf %57 : vector<256x128xf32> to vector<256x128xbf16>
    %c0_80 = arith.constant 0 : index
    %c0_81 = arith.constant 0 : index
    %59 = vector.load %arg8[%c0_80, %c0_81] : memref<256x1152xbf16, #tpu.memory_space<vmem>>, vector<256x128xbf16>
    tpu.vector_store %arg8[%c0_80, %c0_81], %58 {strides = array<i32>} : memref<256x1152xbf16, #tpu.memory_space<vmem>>, vector<256x128xbf16>,
    %c0_82 = arith.constant 0 : index
    %c0_83 = arith.constant 0 : index
    %c8_84 = arith.constant 8 : index
    %c0_85 = arith.constant 0 : index
    %60 = vector.load %arg7[%c0_82, %c0_83, %c8_84, %c0_85] : memref<4x10x24x128xf32, #tpu.memory_space<vmem>>, vector<4x8x8x128xf32>
    %61 = vector.shape_cast %60 : vector<4x8x8x128xf32> to vector<256x128xf32>
    %62 = arith.truncf %61 : vector<256x128xf32> to vector<256x128xbf16>
    %c0_86 = arith.constant 0 : index
    %c128_87 = arith.constant 128 : index
    %63 = vector.load %arg8[%c0_86, %c128_87] : memref<256x1152xbf16, #tpu.memory_space<vmem>>, vector<256x128xbf16>
    tpu.vector_store %arg8[%c0_86, %c128_87], %62 {strides = array<i32>} : memref<256x1152xbf16, #tpu.memory_space<vmem>>, vector<256x128xbf16>,
    %c0_88 = arith.constant 0 : index
    %c0_89 = arith.constant 0 : index
    %c9_90 = arith.constant 9 : index
    %c0_91 = arith.constant 0 : index
    %64 = vector.load %arg7[%c0_88, %c0_89, %c9_90, %c0_91] : memref<4x10x24x128xf32, #tpu.memory_space<vmem>>, vector<4x8x8x128xf32>
    %65 = vector.shape_cast %64 : vector<4x8x8x128xf32> to vector<256x128xf32>
    %66 = arith.truncf %65 : vector<256x128xf32> to vector<256x128xbf16>
    %c0_92 = arith.constant 0 : index
    %c256_93 = arith.constant 256 : index
    %67 = vector.load %arg8[%c0_92, %c256_93] : memref<256x1152xbf16, #tpu.memory_space<vmem>>, vector<256x128xbf16>
    tpu.vector_store %arg8[%c0_92, %c256_93], %66 {strides = array<i32>} : memref<256x1152xbf16, #tpu.memory_space<vmem>>, vector<256x128xbf16>,
    %c0_94 = arith.constant 0 : index
    %c1_95 = arith.constant 1 : index
    %c7_96 = arith.constant 7 : index
    %c0_97 = arith.constant 0 : index
    %68 = vector.load %arg7[%c0_94, %c1_95, %c7_96, %c0_97] : memref<4x10x24x128xf32, #tpu.memory_space<vmem>>, vector<4x8x8x128xf32>
    %69 = vector.shape_cast %68 : vector<4x8x8x128xf32> to vector<256x128xf32>
    %70 = arith.truncf %69 : vector<256x128xf32> to vector<256x128xbf16>
    %c0_98 = arith.constant 0 : index
    %c384_99 = arith.constant 384 : index
    %71 = vector.load %arg8[%c0_98, %c384_99] : memref<256x1152xbf16, #tpu.memory_space<vmem>>, vector<256x128xbf16>
    tpu.vector_store %arg8[%c0_98, %c384_99], %70 {strides = array<i32>} : memref<256x1152xbf16, #tpu.memory_space<vmem>>, vector<256x128xbf16>,
    %c0_100 = arith.constant 0 : index
    %c1_101 = arith.constant 1 : index
    %c8_102 = arith.constant 8 : index
    %c0_103 = arith.constant 0 : index
    %72 = vector.load %arg7[%c0_100, %c1_101, %c8_102, %c0_103] : memref<4x10x24x128xf32, #tpu.memory_space<vmem>>, vector<4x8x8x128xf32>
    %73 = vector.shape_cast %72 : vector<4x8x8x128xf32> to vector<256x128xf32>
    %74 = arith.truncf %73 : vector<256x128xf32> to vector<256x128xbf16>
    %c0_104 = arith.constant 0 : index
    %c512_105 = arith.constant 512 : index
    %75 = vector.load %arg8[%c0_104, %c512_105] : memref<256x1152xbf16, #tpu.memory_space<vmem>>, vector<256x128xbf16>
    tpu.vector_store %arg8[%c0_104, %c512_105], %74 {strides = array<i32>} : memref<256x1152xbf16, #tpu.memory_space<vmem>>, vector<256x128xbf16>,
    %c0_106 = arith.constant 0 : index
    %c1_107 = arith.constant 1 : index
    %c9_108 = arith.constant 9 : index
    %c0_109 = arith.constant 0 : index
    %76 = vector.load %arg7[%c0_106, %c1_107, %c9_108, %c0_109] : memref<4x10x24x128xf32, #tpu.memory_space<vmem>>, vector<4x8x8x128xf32>
    %77 = vector.shape_cast %76 : vector<4x8x8x128xf32> to vector<256x128xf32>
    %78 = arith.truncf %77 : vector<256x128xf32> to vector<256x128xbf16>
    %c0_110 = arith.constant 0 : index
    %c640_111 = arith.constant 640 : index
    %79 = vector.load %arg8[%c0_110, %c640_111] : memref<256x1152xbf16, #tpu.memory_space<vmem>>, vector<256x128xbf16>
    tpu.vector_store %arg8[%c0_110, %c640_111], %78 {strides = array<i32>} : memref<256x1152xbf16, #tpu.memory_space<vmem>>, vector<256x128xbf16>,
    %c0_112 = arith.constant 0 : index
    %c2_113 = arith.constant 2 : index
    %c7_114 = arith.constant 7 : index
    %c0_115 = arith.constant 0 : index
    %80 = vector.load %arg7[%c0_112, %c2_113, %c7_114, %c0_115] : memref<4x10x24x128xf32, #tpu.memory_space<vmem>>, vector<4x8x8x128xf32>
    %81 = vector.shape_cast %80 : vector<4x8x8x128xf32> to vector<256x128xf32>
    %82 = arith.truncf %81 : vector<256x128xf32> to vector<256x128xbf16>
    %c0_116 = arith.constant 0 : index
    %c768_117 = arith.constant 768 : index
    %83 = vector.load %arg8[%c0_116, %c768_117] : memref<256x1152xbf16, #tpu.memory_space<vmem>>, vector<256x128xbf16>
    tpu.vector_store %arg8[%c0_116, %c768_117], %82 {strides = array<i32>} : memref<256x1152xbf16, #tpu.memory_space<vmem>>, vector<256x128xbf16>,
    %c0_118 = arith.constant 0 : index
    %c2_119 = arith.constant 2 : index
    %c8_120 = arith.constant 8 : index
    %c0_121 = arith.constant 0 : index
    %84 = vector.load %arg7[%c0_118, %c2_119, %c8_120, %c0_121] : memref<4x10x24x128xf32, #tpu.memory_space<vmem>>, vector<4x8x8x128xf32>
    %85 = vector.shape_cast %84 : vector<4x8x8x128xf32> to vector<256x128xf32>
    %86 = arith.truncf %85 : vector<256x128xf32> to vector<256x128xbf16>
    %c0_122 = arith.constant 0 : index
    %c896_123 = arith.constant 896 : index
    %87 = vector.load %arg8[%c0_122, %c896_123] : memref<256x1152xbf16, #tpu.memory_space<vmem>>, vector<256x128xbf16>
    tpu.vector_store %arg8[%c0_122, %c896_123], %86 {strides = array<i32>} : memref<256x1152xbf16, #tpu.memory_space<vmem>>, vector<256x128xbf16>,
    %c0_124 = arith.constant 0 : index
    %c2_125 = arith.constant 2 : index
    %c9_126 = arith.constant 9 : index
    %c0_127 = arith.constant 0 : index
    %88 = vector.load %arg7[%c0_124, %c2_125, %c9_126, %c0_127] : memref<4x10x24x128xf32, #tpu.memory_space<vmem>>, vector<4x8x8x128xf32>
    %89 = vector.shape_cast %88 : vector<4x8x8x128xf32> to vector<256x128xf32>
    %90 = arith.truncf %89 : vector<256x128xf32> to vector<256x128xbf16>
    %c0_128 = arith.constant 0 : index
    %c1024_129 = arith.constant 1024 : index
    %91 = vector.load %arg8[%c0_128, %c1024_129] : memref<256x1152xbf16, #tpu.memory_space<vmem>>, vector<256x128xbf16>
    tpu.vector_store %arg8[%c0_128, %c1024_129], %90 {strides = array<i32>} : memref<256x1152xbf16, #tpu.memory_space<vmem>>, vector<256x128xbf16>,
    %c0_130 = arith.constant 0 : index
    %c0_131 = arith.constant 0 : index
    %92 = vector.load %arg8[%c0_130, %c0_131] : memref<256x1152xbf16, #tpu.memory_space<vmem>>, vector<256x1152xbf16>
    %c0_132 = arith.constant 0 : index
    %c0_133 = arith.constant 0 : index
    %93 = vector.load %arg3[%c0_132, %c0_133] : memref<1152x128xbf16, #tpu.memory_space<vmem>>, vector<1152x128xbf16>
    %cst_134 = arith.constant dense<0.000000e+00> : vector<256x128xf32>
    %94 = tpu.matmul %92, %93, %cst_134 {dimension_numbers = #tpu.dot_dimension_numbers<[1], [0], [0], [1], [0, 0, 1, 1], [], []>} : vector<256x1152xbf16>, vector<1152x128xbf16>, vector<256x128xf32> -> vector<256x128xf32>
    %c0_135 = arith.constant 0 : index
    %c0_136 = arith.constant 0 : index
    %95 = vector.load %arg5[%c0_135, %c0_136] : memref<1x128xf32, #tpu.memory_space<vmem>>, vector<1x128xf32>
    %96 = vector.shape_cast %95 : vector<1x128xf32> to vector<128xf32>
    %97 = vector.shape_cast %96 : vector<128xf32> to vector<1x128xf32>
    %98 = vector.broadcast %97 : vector<1x128xf32> to vector<256x128xf32>
    %99 = arith.addf %94, %98 : vector<256x128xf32>
    %c0_137 = arith.constant 0 : index
    %c0_138 = arith.constant 0 : index
    %c0_139 = arith.constant 0 : index
    %c0_140 = arith.constant 0 : index
    %100 = vector.load %arg1[%c0_137, %c0_138, %c0_139, %c0_140] : memref<4x8x8x128xf32, #tpu.memory_space<vmem>>, vector<4x8x8x128xf32>
    %101 = vector.shape_cast %100 : vector<4x8x8x128xf32> to vector<256x128xf32>
    %102 = arith.addf %99, %101 : vector<256x128xf32>
    %cst_141 = arith.constant 0.000000e+00 : f32
    %103 = vector.broadcast %cst_141 : f32 to vector<256x128xf32>
    %104 = arith.maximumf %102, %103 : vector<256x128xf32>
    %105 = vector.shape_cast %104 : vector<256x128xf32> to vector<4x8x8x128xf32>
    %c0_142 = arith.constant 0 : index
    %c0_143 = arith.constant 0 : index
    %c0_144 = arith.constant 0 : index
    %c0_145 = arith.constant 0 : index
    %106 = vector.load %arg6[%c0_142, %c0_143, %c0_144, %c0_145] : memref<4x8x8x128xf32, #tpu.memory_space<vmem>>, vector<4x8x8x128xf32>
    tpu.vector_store %arg6[%c0_142, %c0_143, %c0_144, %c0_145], %105 {strides = array<i32>} : memref<4x8x8x128xf32, #tpu.memory_space<vmem>>, vector<4x8x8x128xf32>,
    return
  }
  func.func @transform_0(%arg0: i32) -> (i32, i32, i32, i32) {
    %c0_i32 = arith.constant 0 : i32
    %c0_i32_0 = arith.constant 0 : i32
    %c0_i32_1 = arith.constant 0 : i32
    %c0_i32_2 = arith.constant 0 : i32
    return %arg0, %c0_i32, %c0_i32_0, %c0_i32_1 : i32, i32, i32, i32
  }
  func.func @transform_1(%arg0: i32) -> (i32, i32) {
    %c0_i32 = arith.constant 0 : i32
    %c0_i32_0 = arith.constant 0 : i32
    %c0_i32_1 = arith.constant 0 : i32
    return %c0_i32, %c0_i32_0 : i32, i32
  }
  func.func @transform_2(%arg0: i32) -> (i32, i32) {
    %c0_i32 = arith.constant 0 : i32
    %c0_i32_0 = arith.constant 0 : i32
    %c0_i32_1 = arith.constant 0 : i32
    return %c0_i32, %c0_i32_0 : i32, i32
  }
  func.func @transform_3(%arg0: i32) -> (i32, i32) {
    %c0_i32 = arith.constant 0 : i32
    %c0_i32_0 = arith.constant 0 : i32
    %c0_i32_1 = arith.constant 0 : i32
    return %c0_i32, %c0_i32_0 : i32, i32
  }
  func.func @transform_4(%arg0: i32) -> (i32, i32) {
    %c0_i32 = arith.constant 0 : i32
    %c0_i32_0 = arith.constant 0 : i32
    %c0_i32_1 = arith.constant 0 : i32
    return %c0_i32, %c0_i32_0 : i32, i32
  }
  func.func @transform_5(%arg0: i32) -> (i32, i32, i32, i32) {
    %c0_i32 = arith.constant 0 : i32
    %c0_i32_0 = arith.constant 0 : i32
    %c0_i32_1 = arith.constant 0 : i32
    %c0_i32_2 = arith.constant 0 : i32
    return %arg0, %c0_i32, %c0_i32_0, %c0_i32_1 : i32, i32, i32, i32
  }
}

</mosaic_0001>

<bundles_post_ra>
// kernel: tpu_custom_call.1
= control target key start
LH: loop header
LB: loop body
LE: loop exit
PB: predicated region body
PF: predicated region fallthrough
CT: control target
= control target key end

     0   :  { %10 = vsyncpa [#allocation5], 0  ;;  %s8203_s0 = inlined_call_operand.hbm [shape: f32[8,8,8,128], index: 0, kind: input, shape index: {}]   ;;  %s8204_s1 = inlined_call_operand.hbm [shape: bf16[1152,128], index: 1, kind: input, shape index: {}]   ;;  %s8205_s2 = inlined_call_operand.hbm [shape: bf16[1152,128], index: 2, kind: input, shape index: {}]   ;;  %s8206_s3 = inlined_call_operand.vmem [shape: f32[1,128], index: 3, kind: input, shape index: {}]   ;;  %s8207_s4 = inlined_call_operand.vmem [shape: f32[1,128], index: 4, kind: input, shape index: {}]   ;;  %s8208_s5 = inlined_call_operand.hbm [shape: f32[8,8,8,128], index: 5, kind: output, shape index: {}]  }
   0x1   :  { %12 = vsyncpa [#allocation5 + $0x1], 0 }
   0x2   :  { %13 = vsyncpa [#allocation8], 0 }
   0x3   :  { %14 = vsyncpa [#allocation6], 0 }
   0x4   :  { %16 = vsyncpa [#allocation6 + $0x1], 0  ;;  %s6581_s18 = smov 0   ;;  %s6583_s19 = smov 0  }
   0x5   :  { %s6585_s20 = smov 0   ;;  %s6587_s21 = smov 0  }
   0x6 LB: > { %s6602_s22 = sadd.s32 4294967295, %s6538_s21   ;;  %s4946_s23 = sadd.s32 4294967294, %s6538_s21   ;;  %s6538_s21 = sphi %s6587_s21, %s8341_s21   ;;  %s6534_s20 = sphi %s6585_s20, %s8340_s20   ;;  %s6530_s19 = sphi %s6583_s19, %s8339_s19   ;;  %s6526_s18 = sphi %s6581_s18, %s8338_s18  }
   0x7   : > { %p42_p0 = scmp.ne.s32.totalorder %s6530_s19, %s6526_s18  ;;  %p8209_p1 = scmp.eq.s32.totalorder %s6602_s22, 0 }
   0x8   : > { %p156_p3 = scmp.eq.s32.totalorder %s4946_s23, 1  ;;  %p4947_p5 = scmp.ge.s32.totalorder %s6538_s21, 1 }
   0x9   : > { %p6611_p4 = por %p8209_p1, %p42_p0  ;;  %p163_p7 = scmp.lt.s32.totalorder %s6538_s21, 3 }
   0xa   : > { %p6616_p6 = por %p156_p3, %p42_p0  ;;  %s6540_s27 = smov [#allocation7]  }
   0xb   : > { %s8246_s24 = scalar_select %p6611_p4, 1, 0 }
   0xc   : > { %s8247_s25 = scalar_select %p6616_p6, 1, 0 }
   0xd   : > { %p6621_p8 = pnand %p4947_p5, %p163_p7  ;;  %s175_s28 = sshll.u32 %s6540_s27, 4  ;;  %s6625_s28 = int_to_ptr.vmem [resolvable:$true] %s175_s28 }
   0xe   : > { %s6541_s30 = smov [#allocation9]   ;;  %s6382_s9 = scalar_lea.hbm %s8204_s1, 9216 }
   0xf   : > { %p6168_p9 = pneg %p6621_p8  ;;  %s188_s6 = sshll.u32 %s6541_s30, 4  ;;  %s6636_s6 = int_to_ptr.vmem [resolvable:$true] %s188_s6 }
  0x10   : > { %p6383_p12 = scmp.ne.s32.totalorder %s8204_s1, %s6382_s9  ;;  %p6389_p5 = scmp.lt.u32.totalorder %s6382_s9, %s8204_s1 }
  0x11   : > { %p6632_p11 = pnand %p6168_p9, %p8209_p1 }
  0x13   : > { %p6384_p13 = pneg %p6632_p11 }
  0x15   : > { %p6385_p0 = pnand %p6384_p13, %p6383_p12 }
  0x17   : > { %p6386_p3 = pneg %p6385_p0 }
  0x19   : > { %p6391_p7 = pnand %p6389_p5, %p6386_p3 }
  0x1b   : > { %6394 = shalt.err (!%p6391_p7)
}
  0x1c   : > { %s6395_s14 = scalar_lea.vmem %s6625_s28, 9216  ;;  %p6403_p2 = scmp.lt.s32.totalorder %s6625_s28, %s6625_s28 }
  0x1d   : > { %p6396_p9 = scmp.ne.s32.totalorder %s6625_s28, %s6395_s14  ;;  %p6404_p12 = scmp.lt.s32.totalorder %s6395_s14, %s6395_s14 }
  0x1f   : > { %p6398_p10 = pnand %p6396_p9, %p6384_p13  ;;  %p6405_p0 = por %p6404_p12, %p6403_p2 }
  0x21   : > { %p6399_p1 = pneg %p6398_p10 }
  0x23   : > { %p6406_p6 = pnand %p6405_p0, %p6399_p1 }
  0x25   : > { %6409 = shalt.err (!%p6406_p6)
}
  0x26   : > { %s6542_s15 = smov 64   ;;  %s6543_s16 = smov 4  }
  0x27   : > { %6171 = dma.hbm_to_vmem [thread:$0]  (!%p6632_p11), %s8204_s1, 9216, %s6625_s28, [#allocation8], %s6542_s15, %s6542_s15, %s6543_s16  }
  0x28   : > { %s6410_s7 = scalar_lea.hbm %s8205_s2, 9216 }
  0x29   : > { %p6411_p2 = scmp.ne.s32.totalorder %s8205_s2, %s6410_s7  ;;  %p6417_p10 = scmp.lt.u32.totalorder %s6410_s7, %s8205_s2 }
  0x2b   : > { %p6413_p1 = pnand %p6411_p2, %p6384_p13 }
  0x2d   : > { %p6414_p6 = pneg %p6413_p1 }
  0x2f   : > { %p6419_p3 = pnand %p6417_p10, %p6414_p6 }
  0x31   : > { %6422 = shalt.err (!%p6419_p3)
}
  0x32   : > { %s6423_s28 = scalar_lea.vmem %s6636_s6, 9216  ;;  %p6431_p12 = scmp.lt.s32.totalorder %s6636_s6, %s6636_s6 }
  0x33   : > { %p6424_p5 = scmp.ne.s32.totalorder %s6636_s6, %s6423_s28  ;;  %p6432_p0 = scmp.lt.s32.totalorder %s6423_s28, %s6423_s28 }
  0x35   : > { %p6426_p7 = pnand %p6424_p5, %p6384_p13  ;;  %p6433_p2 = por %p6432_p0, %p6431_p12 }
  0x37   : > { %p6427_p9 = pneg %p6426_p7 }
  0x39   : > { %p6434_p1 = pnand %p6433_p2, %p6427_p9 }
  0x3b   : > { %6437 = shalt.err (!%p6434_p1)
}
  0x3c   : > { %6174 = dma.hbm_to_vmem [thread:$0]  (!%p6632_p11), %s8205_s2, 9216, %s6636_s6, [#allocation8], %s6542_s15, %s6542_s15, %s6543_s16  }
  0x3d   : > { %s6691_s14 = sadd.s32 1, %s6538_s21   ;;  %s29_s29 = sadd.s32 1, %s6534_s20 }
  0x3e   : > { %s26_s17 = ssub.s32 %s6538_s21, %s6691_s14  ;;  %p36_p13 = scmp.ne.s32.totalorder %s6534_s20, %s6530_s19 }
  0x3f   : > { %p27_p6 = scmp.eq.s32.totalorder %s26_s17, 0  ;;  %p37_p10 = scmp.eq.s32.totalorder %s6538_s21, 0 }
  0x40   : > { %p8250_p3 = scmp.eq.s32.totalorder %s6602_s22, 1  ;;  %p6185_p7 = scmp.lt.s32.totalorder %s6538_s21, 2 }
  0x41   : > { %s6707_s27 = scalar_select %p27_p6, %s6534_s20, %s29_s29  }
  0x42   : > { %p6701_p5 = por %p8250_p3, %p36_p13  ;;  %p38_p9 = por %p37_p10, %p36_p13 }
  0x43   : > { %s208_s30 = sand.u32 1, %s6534_s20   ;;  %s5113_s6 = sshll.u32 %s6538_s21, 12 }
  0x44   : > { %s8251_s23 = scalar_select %p6701_p5, 1, 0 }
  0x45   : > { %s4951_s7 = sshll.u32 %s208_s30, 8  ;;  %s6714_s8 = scalar_lea.hbm %s8203_s0, %s5113_s6 }
  0x46   : > { %s212_s9 = scalar_lea.vmem [#allocation4], %s4951_s7  ;;  %p6718_p11 = pnand %p6185_p7, %p38_p9 }
  0x47   : > { %s220_s10 = sshll.u32 %s212_s9, 4  ;;  %s6722_s28 = scalar_lea.sflag [#allocation5], %s208_s30  ;;  %s6716_s10 = int_to_ptr.vmem [resolvable:$true] %s220_s10 }
  0x48   : > { %s6438_s12 = scalar_lea.hbm %s6714_s8, 4096  ;;  %p6440_p0 = pneg %p6718_p11 }
  0x49   : > { %p6439_p12 = scmp.ne.s32.totalorder %s6714_s8, %s6438_s12  ;;  %s6443_s17 = scalar_lea.hbm %s8203_s0, 8192 }
  0x4a   : > { %p6444_p13 = scmp.lt.u32.totalorder %s6714_s8, %s8203_s0  ;;  %p6445_p6 = scmp.lt.u32.totalorder %s6443_s17, %s6438_s12 }
  0x4b   : > { %p6441_p2 = pnand %p6440_p0, %p6439_p12  ;;  %p6447_p3 = scmp.lt.u32.totalorder %s6438_s12, %s6714_s8 }
  0x4c   : > { %p6446_p10 = por %p6445_p6, %p6444_p13 }
  0x4d   : > { %p6442_p1 = pneg %p6441_p2 }
  0x4e   : > { %p6448_p7 = por %p6447_p3, %p6446_p10 }
  0x50   : > { %p6449_p9 = pnand %p6448_p7, %p6442_p1 }
  0x52   : > { %6452 = shalt.err (!%p6449_p9)
}
  0x53   : > { %s6453_s30 = scalar_lea.vmem %s6716_s10, 4096  ;;  %s6544_s15 = smov [#allocation4]  }
  0x54   : > { %p6454_p12 = scmp.ne.s32.totalorder %s6716_s10, %s6453_s30  ;;  %s6458_s16 = sshll.u32 %s6544_s15, 4  ;;  %s6459_s16 = int_to_ptr.vmem [resolvable:$false] %s6458_s16 }
  0x55   : > { %s6460_s9 = scalar_lea.vmem %s6459_s16, 8192  ;;  %p6461_p4 = scmp.lt.s32.totalorder %s6716_s10, %s6459_s16 }
  0x56   : > { %p6456_p2 = pnand %p6454_p12, %p6440_p0  ;;  %p6462_p13 = scmp.lt.s32.totalorder %s6460_s9, %s6453_s30 }
  0x58   : > { %p6457_p5 = pneg %p6456_p2  ;;  %p6463_p6 = por %p6462_p13, %p6461_p4 }
  0x5a   : > { %p6464_p10 = pnand %p6463_p6, %p6457_p5 }
  0x5c   : > { %6467 = shalt.err (!%p6464_p10)
}
  0x5d   : > { %s6545_s12 = smov 128   ;;  %s6546_s13 = smov 8  }
  0x5e   : > { %6178 = dma.hbm_to_vmem [thread:$0]  (!%p6718_p11), %s6714_s8, 4096, %s6716_s10, %s6722_s28, %s6545_s12, %s6545_s12, %s6546_s13  }
  0x5f   : > { %232 = sbr.rel (%p6621_p8) target bundleno = 1195 (0x4ab), region = 40 }
  0x66   : > { %s6753_s29 = sand.u32 1, %s6530_s19   ;;  %p8253_p4 = scmp.ne.s32.totalorder %s8246_s24, 0 }
  0x67   : > { %s4956_s17 = sshll.u32 %s6753_s29, 8  ;;  %s235_s7 = scalar_lea.sflag [#allocation5], %s6753_s29 }
  0x68   : > { %s6759_s6 = scalar_lea.vmem [#allocation4], %s4956_s17 }
  0x69   : > { %6513 = dma.done.wait (%p8253_p4), %s235_s7, 4096  }
  0x6a   : > { %6515 = vsyncadd (%p8253_p4), %s235_s7, 4294963200  ;;  %p8254_p5 = scmp.eq.s32.totalorder %s6602_s22, 0 }
  0x6c   : > { %6517 = dma.done.wait (%p8254_p5), [#allocation8], 18432   ;;  %p8255_p8 = pmov %p8254_p5 }
  0x6d   : > { %v8212_v0 = vmov 0.0   ;;  %v6230_v1 = vld [vmem:[#allocation7 + $0x40] sm:$0xff]   ;;  %v6234_v5 = vld [vmem:[#allocation7 + $0x48] sm:$0xff]   ;;  %v6238_v9 = vld [vmem:[#allocation7 + $0x50] sm:$0xff]   ;;  %s8062_s11 = scalar_lea.vmem [#allocation10], %s4956_s17  ;;  %s5115_s28 = sshll.u32 %s6602_s22, 12 }
  0x6e   : > { %6519 = vsyncadd (%p8255_p8), [#allocation8], 4294948864  ;;  %277 = vst [vmem:[#allocation2 + $0x8] sm:$0xff] %v8212_v0  ;;  %v6231_v2 = vld [vmem:[#allocation7] sm:$0xff]   ;;  %5116 = vmatprep.subr.bf16.mxu0 %v6230_v1  ;;  %v6235_v6 = vld [vmem:[#allocation7 + $0x8] sm:$0xff]   ;;  %s4854_s30 = sshll.u32 %s8062_s11, 4  ;;  %s8154_s9 = scalar_lea.hbm %s8208_s5, %s5115_s28  ;;  %s8156_s30 = int_to_ptr.vmem [resolvable:$true] %s4854_s30 }
  0x6f   : > { %276 = vst [vmem:[#allocation2] sm:$0xff] %v8212_v0  ;;  %278 = vst [vmem:[#allocation2 + $0x10] sm:$0xff] %v8212_v0  ;;  %v6232_v3 = vld [vmem:[#allocation7 + $0xc0] sm:$0xff]   ;;  %5117 = vmatpush3.bf16.msra.mxu0 %v6231_v2  ;;  %v6236_v7 = vld [vmem:[#allocation7 + $0xc8] sm:$0xff]   ;;  %s4840_s22 = scalar_lea.sflag [#allocation6], %s6753_s29  ;;  %s6468_s12 = scalar_lea.vmem %s8156_s30, 4096 }
  0x70   : > { %279 = vst [vmem:[#allocation2 + $0xf0] sm:$0xff] %v8212_v0  ;;  %280 = vst [vmem:[#allocation2 + $0xf8] sm:$0xff] %v8212_v0  ;;  %v6233_v4 = vld [vmem:[#allocation7 + $0x80] sm:$0xff]   ;;  %5228 = vmatprep.subr.bf16.mxu1 %v6232_v3  ;;  %5118 = vmatprep.subr.bf16.mxu0 %v6234_v5  ;;  %v6237_v8 = vld [vmem:[#allocation7 + $0x88] sm:$0xff]   ;;  %p6469_p11 = scmp.ne.s32.totalorder %s8156_s30, %s6468_s12  ;;  %p8335_p0 = scmp.ne.s32.totalorder %s8251_s23, 0 }
  0x71   : > { %281 = vst [vmem:[#allocation2 + $0x100] sm:$0xff] %v8212_v0  ;;  %282 = vst [vmem:[#allocation2 + $0x1e0] sm:$0xff] %v8212_v0  ;;  %5229 = vmatpush3.bf16.msra.mxu1 %v6233_v4  ;;  %v6239_v10 = vld [vmem:[#allocation7 + $0x10] sm:$0xff]   ;;  %v6242_v13 = vld [vmem:[#allocation7 + $0x58] sm:$0xff]   ;;  %s6548_s13 = smov [#allocation10]  }
  0x72   : > { %283 = vst [vmem:[#allocation2 + $0x1e8] sm:$0xff] %v8212_v0  ;;  %284 = vst [vmem:[#allocation2 + $0x1f0] sm:$0xff] %v8212_v0  ;;  %5230 = vmatprep.subr.bf16.mxu1 %v6236_v7  ;;  %v6240_v11 = vld [vmem:[#allocation7 + $0xd0] sm:$0xff]   ;;  %v6243_v14 = vld [vmem:[#allocation7 + $0x18] sm:$0xff]   ;;  %p6470_p1 = pnand %p6469_p11, %p8335_p0  ;;  %s6472_s17 = sshll.u32 %s6548_s13, 4  ;;  %s6473_s17 = int_to_ptr.vmem [resolvable:$false] %s6472_s17 }
  0x73   : > { %285 = vst [vmem:[#allocation2 + $0x2d0] sm:$0xff] %v8212_v0  ;;  %286 = vst [vmem:[#allocation2 + $0x2d8] sm:$0xff] %v8212_v0  ;;  %5119 = vmatpush3.bf16.msra.mxu0 %v6235_v6  ;;  %v6241_v12 = vld [vmem:[#allocation7 + $0x90] sm:$0xff]   ;;  %v6244_v15 = vld [vmem:[#allocation7 + $0xd8] sm:$0xff]   ;;  %s6474_s7 = scalar_lea.vmem %s6473_s17, 8192  ;;  %p6475_p7 = scmp.lt.s32.totalorder %s8156_s30, %s6473_s17 }
  0x74   : > { %287 = vst [vmem:[#allocation2 + $0x2e0] sm:$0xff] %v8212_v0  ;;  %289 = vst [vmem:[#allocation2 + $0xd8] sm:$0xff] %v8212_v0  ;;  %5120 = vmatprep.subr.bf16.mxu0 %v6238_v9  ;;  %v6245_v16 = vld [vmem:[#allocation7 + $0x98] sm:$0xff]   ;;  %v6246_v17 = vld [vmem:[#allocation7 + $0x60] sm:$0xff]   ;;  %p6471_p3 = pneg %p6470_p1  ;;  %p6476_p9 = scmp.lt.s32.totalorder %s6474_s7, %s6468_s12 }
  0x75   : > { %290 = vst [vmem:[#allocation2 + $0xe0] sm:$0xff] %v8212_v0  ;;  %291 = vst [vmem:[#allocation2 + $0xe8] sm:$0xff] %v8212_v0  ;;  %5231 = vmatpush3.bf16.msra.mxu1 %v6237_v8  ;;  %v6247_v18 = vld [vmem:[#allocation7 + $0x20] sm:$0xff]   ;;  %v6250_v21 = vld [vmem:[#allocation7 + $0x68] sm:$0xff]  }
  0x76   : > { %292 = vst [vmem:[#allocation2 + $0x1c8] sm:$0xff] %v8212_v0  ;;  %293 = vst [vmem:[#allocation2 + $0x1d0] sm:$0xff] %v8212_v0  ;;  %5232 = vmatprep.subr.bf16.mxu1 %v6240_v11  ;;  %v6248_v19 = vld [vmem:[#allocation7 + $0xe0] sm:$0xff]   ;;  %v6251_v22 = vld [vmem:[#allocation7 + $0x28] sm:$0xff]   ;;  %p6477_p12 = por %p6476_p9, %p6475_p7 }
  0x77   : > { %294 = vst [vmem:[#allocation2 + $0x1d8] sm:$0xff] %v8212_v0  ;;  %295 = vst [vmem:[#allocation2 + $0x2b8] sm:$0xff] %v8212_v0  ;;  %5121 = vmatpush3.bf16.msra.mxu0 %v6239_v10  ;;  %v6249_v20 = vld [vmem:[#allocation7 + $0xa0] sm:$0xff]   ;;  %v6252_v23 = vld [vmem:[#allocation7 + $0xe8] sm:$0xff]  }
  0x78   : > { %296 = vst [vmem:[#allocation2 + $0x2c0] sm:$0xff] %v8212_v0  ;;  %297 = vst [vmem:[#allocation2 + $0x2c8] sm:$0xff] %v8212_v0  ;;  %5122 = vmatprep.subr.bf16.mxu0 %v6242_v13  ;;  %v6253_v24 = vld [vmem:[#allocation7 + $0xa8] sm:$0xff]   ;;  %v6254_v25 = vld [vmem:[#allocation7 + $0x70] sm:$0xff]   ;;  %p6478_p2 = pnand %p6477_p12, %p6471_p3 }
  0x79   : > { %298 = vst [vmem:[#allocation2 + $0x3a8] sm:$0xff] %v8212_v0  ;;  %299 = vst [vmem:[#allocation2 + $0x3b0] sm:$0xff] %v8212_v0  ;;  %5233 = vmatpush3.bf16.msra.mxu1 %v6241_v12  ;;  %v6255_v26 = vld [vmem:[#allocation7 + $0x30] sm:$0xff]   ;;  %v6258_v29 = vld [vmem:[#allocation7 + $0x78] sm:$0xff]  }
  0x7a   : > { %300 = vst [vmem:[#allocation2 + $0x3b8] sm:$0xff] %v8212_v0  ;;  %302 = vst [vmem:[#allocation2 + $0x1f] sm:$0x1] %v8212_v0  ;;  %5234 = vmatprep.subr.bf16.mxu1 %v6244_v15  ;;  %v6256_v27 = vld [vmem:[#allocation7 + $0xf0] sm:$0xff]   ;;  %v6259_v30 = vld [vmem:[#allocation7 + $0x38] sm:$0xff]  }
  0x7b   : > { %303 = vst [vmem:[#allocation2 + $0x37] sm:$0x1] %v8212_v0  ;;  %304 = vst [vmem:[#allocation2 + $0x4f] sm:$0x1] %v8212_v0  ;;  %5123 = vmatpush3.bf16.msra.mxu0 %v6243_v14  ;;  %v6257_v28 = vld [vmem:[#allocation7 + $0xb0] sm:$0xff]   ;;  %v6260_v31 = vld [vmem:[#allocation7 + $0xf8] sm:$0xff]  }
  0x7c   : > { %305 = vst [vmem:[#allocation2 + $0x67] sm:$0x1] %v8212_v0  ;;  %306 = vst [vmem:[#allocation2 + $0x7f] sm:$0x1] %v8212_v0  ;;  %5124 = vmatprep.subr.bf16.mxu0 %v6246_v17  ;;  %v366_v32 = vld [vmem:[%s6759_s6] sm:$0xff]  ;;  %v6261_v34 = vld [vmem:[#allocation7 + $0xb8] sm:$0xff]  }
  0x7d   : > { %307 = vst [vmem:[#allocation2 + $0x97] sm:$0x1] %v8212_v0  ;;  %308 = vst [vmem:[#allocation2 + $0xaf] sm:$0x1] %v8212_v0  ;;  %5235 = vmatpush3.bf16.msra.mxu1 %v6245_v16  ;;  %v526_v33 = vpack.c.bf16 %v366_v32, %v8212_v0  ;;  %v6262_v35 = vld [vmem:[#allocation7 + $0x140] sm:$0xff]   ;;  %v367_v36 = vld [vmem:[%s6759_s6 + $0x8] sm:$0xff] }
  0x7e   : > { %309 = vst [vmem:[#allocation2 + $0xc7] sm:$0x1] %v8212_v0  ;;  %310 = vst [vmem:[#allocation2 + $0x10f] sm:$0x1] %v8212_v0  ;;  %5236 = vmatprep.subr.bf16.mxu1 %v6248_v19  ;;  %v430_v37 = vld [vmem:[#allocation2 + $0x7] sm:$0xff]  ;;  %v6861_v38 = vld [vmem:[%s6759_s6 + $0x10] sm:$0xff] }
  0x7f   : > { %311 = vst [vmem:[#allocation2 + $0x127] sm:$0x1] %v8212_v0  ;;  %312 = vst [vmem:[#allocation2 + $0x13f] sm:$0x1] %v8212_v0  ;;  %5125 = vmatpush3.bf16.msra.mxu0 %v6247_v18  ;;  %1766 = vmatprep.mubr.bf16.mxu0 %v526_v33  ;;  %v6864_v39 = vld [vmem:[%s6759_s6 + $0x18] sm:$0xff]  ;;  %v6869_v40 = vld [vmem:[%s6759_s6 + $0x20] sm:$0xff]  ;;  %v6880_v47 = vpack.c.bf16 %v6861_v38, %v367_v36 }
  0x80   : > { %313 = vst [vmem:[#allocation2 + $0x157] sm:$0x1] %v8212_v0  ;;  %314 = vst [vmem:[#allocation2 + $0x16f] sm:$0x1] %v8212_v0  ;;  %5126 = vmatprep.subr.bf16.mxu0 %v6250_v21  ;;  %v6263_v41 = vld [vmem:[#allocation7 + $0x100] sm:$0xff]   ;;  %v6873_v42 = vld [vmem:[%s6759_s6 + $0x28] sm:$0xff]  ;;  %v6906_v3 = vpack.c.bf16 %v6869_v40, %v6864_v39 }
  0x81   : > { %315 = vst [vmem:[#allocation2 + $0x187] sm:$0x1] %v8212_v0  ;;  %316 = vst [vmem:[#allocation2 + $0x19f] sm:$0x1] %v8212_v0  ;;  %5237 = vmatpush3.bf16.msra.mxu1 %v6249_v20  ;;  %v558_v43 = vld [vmem:[#allocation2 + $0x9] sm:$0xff]  ;;  %v6884_v48 = vld [vmem:[%s6759_s6 + $0x38] sm:$0xff] }
  0x82   : > { %317 = vst [vmem:[#allocation2 + $0x1b7] sm:$0x1] %v8212_v0  ;;  %318 = vst [vmem:[#allocation2 + $0x1ff] sm:$0x1] %v8212_v0  ;;  %5238 = vmatprep.subr.bf16.mxu1 %v6252_v23  ;;  %v6877_v44 = vld [vmem:[%s6759_s6 + $0x30] sm:$0xff]  ;;  %v6264_v50 = vld [vmem:[#allocation7 + $0x148] sm:$0xff]  }
  0x83   : > { %319 = vst [vmem:[#allocation2 + $0x217] sm:$0x1] %v8212_v0  ;;  %320 = vst [vmem:[#allocation2 + $0x22f] sm:$0x1] %v8212_v0  ;;  %5127 = vmatpush3.bf16.msra.mxu0 %v6251_v22  ;;  %v6888_v51 = vld [vmem:[%s6759_s6 + $0x40] sm:$0xff]  ;;  %v6892_v55 = vld [vmem:[%s6759_s6 + $0x48] sm:$0xff]  ;;  %v6953_v23 = vpack.c.bf16 %v6877_v44, %v6873_v42 }
  0x84   : > { %321 = vst [vmem:[#allocation2 + $0x247] sm:$0x1] %v8212_v0  ;;  %322 = vst [vmem:[#allocation2 + $0x25f] sm:$0x1] %v8212_v0  ;;  %5128 = vmatprep.subr.bf16.mxu0 %v6254_v25  ;;  %v6265_v58 = vld [vmem:[#allocation7 + $0x108] sm:$0xff]   ;;  %v6266_v60 = vld [vmem:[#allocation7 + $0x150] sm:$0xff]  }
  0x85   : > { %323 = vst [vmem:[#allocation2 + $0x277] sm:$0x1] %v8212_v0  ;;  %324 = vst [vmem:[#allocation2 + $0x28f] sm:$0x1] %v8212_v0  ;;  %5239 = vmatpush3.bf16.msra.mxu1 %v6253_v24  ;;  %v6267_v5 = vld [vmem:[#allocation7 + $0x110] sm:$0xff]   ;;  %v6913_v7 = vld [vmem:[%s6759_s6 + $0x58] sm:$0xff] }
  0x86   : > { %325 = vst [vmem:[#allocation2 + $0x2a7] sm:$0x1] %v8212_v0  ;;  %326 = vst [vmem:[#allocation2 + $0x2ef] sm:$0x1] %v8212_v0  ;;  %5240 = vmatprep.subr.bf16.mxu1 %v6256_v27  ;;  %v6909_v6 = vld [vmem:[%s6759_s6 + $0x50] sm:$0xff]  ;;  %v6919_v9 = vld [vmem:[%s6759_s6 + $0x60] sm:$0xff] }
  0x87   : > { %327 = vst [vmem:[#allocation2 + $0x307] sm:$0x1] %v8212_v0  ;;  %328 = vst [vmem:[#allocation2 + $0x31f] sm:$0x1] %v8212_v0  ;;  %5129 = vmatpush3.bf16.msra.mxu0 %v6255_v26  ;;  %v6268_v11 = vld [vmem:[#allocation7 + $0x158] sm:$0xff]   ;;  %v6925_v12 = vld [vmem:[%s6759_s6 + $0x68] sm:$0xff] }
  0x88   : > { %329 = vst [vmem:[#allocation2 + $0x337] sm:$0x1] %v8212_v0  ;;  %330 = vst [vmem:[#allocation2 + $0x34f] sm:$0x1] %v8212_v0  ;;  %5130 = vmatprep.subr.bf16.mxu0 %v6258_v29  ;;  %v6269_v14 = vld [vmem:[#allocation7 + $0x118] sm:$0xff]   ;;  %v6931_v15 = vld [vmem:[%s6759_s6 + $0x70] sm:$0xff] }
  0x89   : > { %331 = vst [vmem:[#allocation2 + $0x367] sm:$0x1] %v8212_v0  ;;  %332 = vst [vmem:[#allocation2 + $0x37f] sm:$0x1] %v8212_v0  ;;  %5241 = vmatpush3.bf16.msra.mxu1 %v6257_v28  ;;  %v6934_v16 = vld [vmem:[%s6759_s6 + $0x78] sm:$0xff]  ;;  %v6941_v18 = vld [vmem:[%s6759_s6 + $0x80] sm:$0xff] }
  0x8a   : > { %333 = vst [vmem:[#allocation2 + $0x397] sm:$0x1] %v8212_v0  ;;  %334 = vst [vmem:[#allocation2 + $0x28] sm:$0x1] %v8212_v0  ;;  %5242 = vmatprep.subr.bf16.mxu1 %v6260_v31  ;;  %v6270_v21 = vld [vmem:[#allocation7 + $0x160] sm:$0xff]   ;;  %v6949_v22 = vld [vmem:[%s6759_s6 + $0x88] sm:$0xff] }
  0x8b   : > { %335 = vst [vmem:[#allocation2 + $0x40] sm:$0x1] %v8212_v0  ;;  %336 = vst [vmem:[#allocation2 + $0x58] sm:$0x1] %v8212_v0  ;;  %5131 = vmatpush3.bf16.msra.mxu0 %v6259_v30  ;;  %v6271_v27 = vld [vmem:[#allocation7 + $0x120] sm:$0xff]   ;;  %v6963_v29 = vld [vmem:[%s6759_s6 + $0x90] sm:$0xff] }
  0x8c   : > { %337 = vst [vmem:[#allocation2 + $0x70] sm:$0x1] %v8212_v0  ;;  %338 = vst [vmem:[#allocation2 + $0x88] sm:$0x1] %v8212_v0  ;;  %5340 = vmatprep.subr.bf16.mxu0 %v6262_v35  ;;  %v6966_v30 = vld [vmem:[%s6759_s6 + $0x98] sm:$0xff]  ;;  %v6972_v31 = vld [vmem:[%s6759_s6 + $0xa0] sm:$0xff] }
  0x8d   : > { %339 = vst [vmem:[#allocation2 + $0xa0] sm:$0x1] %v8212_v0  ;;  %340 = vst [vmem:[#allocation2 + $0xb8] sm:$0x1] %v8212_v0  ;;  %5243 = vmatpush3.bf16.msra.mxu1 %v6261_v34  ;;  %v7074_v61 = vld [vmem:[%s6759_s6 + $0xf8] sm:$0xff] }
  0x8e   : > { %341 = vst [vmem:[#allocation2 + $0xd0] sm:$0x1] %v8212_v0  ;;  %342 = vst [vmem:[#allocation2 + $0x118] sm:$0x1] %v8212_v0 }
  0x8f   : > { %343 = vst [vmem:[#allocation2 + $0x130] sm:$0x1] %v8212_v0  ;;  %344 = vst [vmem:[#allocation2 + $0x148] sm:$0x1] %v8212_v0 }
  0x90   : > { %345 = vst [vmem:[#allocation2 + $0x160] sm:$0x1] %v8212_v0  ;;  %346 = vst [vmem:[#allocation2 + $0x178] sm:$0x1] %v8212_v0 }
  0x91   : > { %347 = vst [vmem:[#allocation2 + $0x190] sm:$0x1] %v8212_v0  ;;  %348 = vst [vmem:[#allocation2 + $0x1a8] sm:$0x1] %v8212_v0 }
  0x92   : > { %349 = vst [vmem:[#allocation2 + $0x1c0] sm:$0x1] %v8212_v0  ;;  %350 = vst [vmem:[#allocation2 + $0x208] sm:$0x1] %v8212_v0 }
  0x93   : > { %351 = vst [vmem:[#allocation2 + $0x220] sm:$0x1] %v8212_v0  ;;  %352 = vst [vmem:[#allocation2 + $0x238] sm:$0x1] %v8212_v0 }
  0x94   : > { %353 = vst [vmem:[#allocation2 + $0x250] sm:$0x1] %v8212_v0  ;;  %354 = vst [vmem:[#allocation2 + $0x268] sm:$0x1] %v8212_v0 }
  0x95   : > { %355 = vst [vmem:[#allocation2 + $0x280] sm:$0x1] %v8212_v0  ;;  %356 = vst [vmem:[#allocation2 + $0x298] sm:$0x1] %v8212_v0 }
  0x96   : > { %357 = vst [vmem:[#allocation2 + $0x2b0] sm:$0x1] %v8212_v0  ;;  %358 = vst [vmem:[#allocation2 + $0x2f8] sm:$0x1] %v8212_v0 }
  0x97   : > { %359 = vst [vmem:[#allocation2 + $0x310] sm:$0x1] %v8212_v0  ;;  %360 = vst [vmem:[#allocation2 + $0x328] sm:$0x1] %v8212_v0 }
  0x98   : > { %361 = vst [vmem:[#allocation2 + $0x340] sm:$0x1] %v8212_v0  ;;  %362 = vst [vmem:[#allocation2 + $0x358] sm:$0x1] %v8212_v0 }
  0x99   : > { %363 = vst [vmem:[#allocation2 + $0x370] sm:$0x1] %v8212_v0  ;;  %364 = vst [vmem:[#allocation2 + $0x388] sm:$0x1] %v8212_v0 }
  0x9a   : > { %365 = vst [vmem:[#allocation2 + $0x3a0] sm:$0x1] %v8212_v0  ;;  %398 = vst [vmem:[#allocation2 + $0x20] sm:$0xff] %v366_v32 }
  0x9b   : > { %399 = vst [vmem:[#allocation2 + $0x38] sm:$0xff] %v367_v36  ;;  %400 = vst [vmem:[#allocation2 + $0x50] sm:$0xff] %v6861_v38 }
  0x9c   : > { %401 = vst [vmem:[#allocation2 + $0x68] sm:$0xff] %v6864_v39  ;;  %402 = vst [vmem:[#allocation2 + $0x80] sm:$0xff] %v6869_v40 }
  0x9d   : > { %403 = vst [vmem:[#allocation2 + $0x98] sm:$0xff] %v6873_v42  ;;  %404 = vst [vmem:[#allocation2 + $0xb0] sm:$0xff] %v6877_v44 }
  0x9e   : > { %405 = vst [vmem:[#allocation2 + $0xc8] sm:$0xff] %v6884_v48  ;;  %406 = vst [vmem:[#allocation2 + $0x110] sm:$0xff] %v6888_v51 }
  0x9f   : > { %407 = vst [vmem:[#allocation2 + $0x128] sm:$0xff] %v6892_v55  ;;  %8256 = vst [vmem:[#allocation14_spill] sm:$0xff] %v6909_v6 }
  0xa0   : > { %408 = vst [vmem:[#allocation2 + $0x140] sm:$0xff] %v6909_v6  ;;  %8257 = vst [vmem:[#allocation15_spill] sm:$0xff] %v6913_v7 }
  0xa1   : > { %v431_v45 = vld [vmem:[#allocation2 + $0x1f] sm:$0xff]  ;;  %409 = vst [vmem:[#allocation2 + $0x158] sm:$0xff] %v6913_v7  ;;  %8258 = vst [vmem:[#allocation16_spill] sm:$0xff] %v6919_v9 }
  0xa2   : > { %v559_v46 = vld [vmem:[#allocation2 + $0x21] sm:$0xff]  ;;  %v462_v49 = vpack.c.bf16 %v431_v45, %v430_v37  ;;  %v623_v52 = vld [vmem:[#allocation2 + $0x37] sm:$0xff]  ;;  %v433_v56 = vld [vmem:[#allocation2 + $0x4f] sm:$0xff]  ;;  %410 = vst [vmem:[#allocation2 + $0x170] sm:$0xff] %v6919_v9 }
  0xa3   : > { %v590_v53 = vpack.c.bf16 %v559_v46, %v558_v43  ;;  %v654_v54 = vpack.c.bf16 %v623_v52, %v431_v45  ;;  %v625_v57 = vld [vmem:[#allocation2 + $0x67] sm:$0xff]  ;;  %v6898_v62 = vpack.c.bf16 %v433_v56, %v623_v52  ;;  %v6900_v63 = vld [vmem:[#allocation2 + $0x39] sm:$0xff]  ;;  %v6902_v1 = vld [vmem:[#allocation2 + $0x51] sm:$0xff]  ;;  %8259 = vst [vmem:[#allocation17_spill] sm:$0xff] %v6925_v12 }
  0xa4   : > { %1767 = vmatmul.mubr.bf16.vlgmr.msra.gmra.mrb[0].mxu0 %v462_v49  ;;  %v655_v59 = vpack.c.bf16 %v625_v57, %v433_v56  ;;  %v435_v2 = vld [vmem:[#allocation2 + $0x7f] sm:$0xff]  ;;  %v627_v4 = vld [vmem:[#allocation2 + $0x97] sm:$0xff]  ;;  %v591_v8 = vpack.c.bf16 %v6902_v1, %v6900_v63  ;;  %v6927_v13 = vld [vmem:[#allocation2 + $0x69] sm:$0xff]  ;;  %411 = vst [vmem:[#allocation2 + $0x188] sm:$0xff] %v6925_v12 }
  0xa5   : > { %5341 = vmatpush3.bf16.msra.mxu0 %v6263_v41  ;;  %1774 = vmatprep.mubr.bf16.mxu0 %v6880_v47  ;;  %v656_v10 = vpack.c.bf16 %v627_v4, %v435_v2  ;;  %8260 = vst [vmem:[#allocation18_spill] sm:$0xff] %v6931_v15  ;;  %v6936_v17 = vld [vmem:[#allocation2 + $0x81] sm:$0xff]  ;;  %412 = vst [vmem:[#allocation2 + $0x1a0] sm:$0xff] %v6931_v15  ;;  %v6945_v20 = vpack.c.bf16 %v435_v2, %v625_v57  ;;  %v437_v24 = vld [vmem:[#allocation2 + $0xaf] sm:$0xff] }
  0xa6   : > { %1927 = vmatprep.mubr.bf16.mxu1 %v654_v54  ;;  %5342 = vmatprep.subr.bf16.mxu0 %v6264_v50  ;;  %413 = vst [vmem:[#allocation2 + $0x1b8] sm:$0xff] %v6934_v16  ;;  %8261 = vst [vmem:[#allocation19_spill] sm:$0xff] %v6941_v18  ;;  %v6955_v25 = vld [vmem:[#allocation2 + $0xc7] sm:$0xff]  ;;  %v592_v26 = vpack.c.bf16 %v6936_v17, %v6927_v13  ;;  %v6975_v32 = vld [vmem:[#allocation2 + $0x99] sm:$0xff]  ;;  %v6981_v35 = vpack.c.bf16 %v437_v24, %v627_v4 }
  0xa7   : > { %1928 = vmatmul.mubr.bf16.vlgmr.msra.gmra.mrb[0].mxu1 %v590_v53  ;;  %414 = vst [vmem:[#allocation2 + $0x200] sm:$0xff] %v6941_v18  ;;  %8262 = vst [vmem:[#allocation20_spill] sm:$0xff] %v6949_v22  ;;  %v657_v28 = vpack.c.bf16 %v6955_v25, %v437_v24  ;;  %v6977_v33 = vld [vmem:[#allocation2 + $0xb1] sm:$0xff]  ;;  %v631_v37 = vld [vmem:[#allocation2 + $0x127] sm:$0xff]  ;;  %v530_v41 = vpack.c.bf16 %v6888_v51, %v8212_v0 }
  0xa8   : > { %1935 = vmatprep.mubr.bf16.mxu1 %v655_v59  ;;  %415 = vst [vmem:[#allocation2 + $0x218] sm:$0xff] %v6949_v22  ;;  %8263 = vst [vmem:[#allocation21_spill] sm:$0xff] %v6963_v29  ;;  %v439_v36 = vld [vmem:[#allocation2 + $0x10f] sm:$0xff]  ;;  %v593_v50 = vpack.c.bf16 %v6977_v33, %v6975_v32  ;;  %v6996_v52 = vld [vmem:[%s6759_s6 + $0xb8] sm:$0xff] }
  0xa9   : > { %5343 = vmatpush3.bf16.msra.mxu0 %v6265_v58  ;;  %8264 = vst [vmem:[#allocation22_spill] sm:$0xff] %v6966_v30  ;;  %416 = vst [vmem:[#allocation2 + $0x230] sm:$0xff] %v6963_v29  ;;  %v6272_v43 = vld [vmem:[#allocation7 + $0x168] sm:$0xff]   ;;  %v6990_v49 = vld [vmem:[%s6759_s6 + $0xb0] sm:$0xff]  ;;  %v658_v54 = vpack.c.bf16 %v631_v37, %v439_v36 }
  0xaa   : > { %5344 = vmatprep.subr.bf16.mxu0 %v6266_v60  ;;  %417 = vst [vmem:[#allocation2 + $0x248] sm:$0xff] %v6966_v30  ;;  %8265 = vst [vmem:[#allocation23_spill] sm:$0xff] %v6972_v31  ;;  %v6986_v45 = vld [vmem:[%s6759_s6 + $0xa8] sm:$0xff]  ;;  %v6999_v53 = vld [vmem:[%s6759_s6 + $0xc0] sm:$0xff] }
  0xab   : > { %418 = vst [vmem:[#allocation2 + $0x260] sm:$0xff] %v6972_v31  ;;  %8266 = vst [vmem:[#allocation24_spill] sm:$0xff] %v6986_v45  ;;  %v6273_v46 = vld [vmem:[#allocation7 + $0x128] sm:$0xff]   ;;  %v438_v56 = vld [vmem:[#allocation2 + $0xf7] sm:$0xff] }
  0xac   : > { %1775 = vmatmul.mubr.bf16.gmra.mrb[4].mxu0 %v6898_v62  ;;  %419 = vst [vmem:[#allocation2 + $0x278] sm:$0xff] %v6986_v45  ;;  %8267 = vst [vmem:[#allocation25_spill] sm:$0xff] %v6990_v49  ;;  %v566_v57 = vld [vmem:[#allocation2 + $0xf9] sm:$0xff]  ;;  %v6274_v58 = vld [vmem:[#allocation7 + $0x170] sm:$0xff]   ;;  %v466_v2 = vpack.c.bf16 %v439_v36, %v438_v56 }
  0xad   : > { %1782 = vmatprep.mubr.bf16.mxu0 %v6906_v3  ;;  %5345 = vmatpush3.bf16.msra.mxu0 %v6267_v5  ;;  %420 = vst [vmem:[#allocation2 + $0x290] sm:$0xff] %v6990_v49  ;;  %8268 = vst [vmem:[#allocation26_spill] sm:$0xff] %v6996_v52  ;;  %v7005_v59 = vld [vmem:[%s6759_s6 + $0xc8] sm:$0xff]  ;;  %v7009_v4 = vld [vmem:[#allocation2 + $0x111] sm:$0xff] }
  0xae   : > { %5346 = vmatprep.subr.bf16.mxu0 %v6268_v11  ;;  %421 = vst [vmem:[#allocation2 + $0x2a8] sm:$0xff] %v6996_v52  ;;  %422 = vst [vmem:[#allocation2 + $0x2f0] sm:$0xff] %v6999_v53  ;;  %v6275_v5 = vld [vmem:[#allocation7 + $0x130] sm:$0xff]   ;;  %v7020_v36 = vld [vmem:[#allocation2 + $0x141] sm:$0xff] }
  0xaf   : > { %1936 = vmatmul.mubr.bf16.gmra.mrb[4].mxu1 %v591_v8  ;;  %423 = vst [vmem:[#allocation2 + $0x308] sm:$0xff] %v7005_v59  ;;  %v7014_v8 = vpack.c.bf16 %v6909_v6, %v6892_v55  ;;  %v633_v11 = vld [vmem:[#allocation2 + $0x157] sm:$0xff]  ;;  %8275 = vst [vmem:[#allocation33_spill] sm:$0xff] %v7074_v61  ;;  %v6289_v0 = vld [vmem:[#allocation7 + $0x1a8] sm:$0xff]  }
  0xb0   : > { %1943 = vmatprep.mubr.bf16.mxu1 %v656_v10  ;;  %v441_v10 = vld [vmem:[#allocation2 + $0x13f] sm:$0xff]  ;;  %v7056_v19 = vld [vmem:[#allocation2 + $0x1b7] sm:$0xff]  ;;  %429 = vst [vmem:[#allocation2 + $0x398] sm:$0xff] %v7074_v61 }
  0xb1   : > { %5347 = vmatpush3.bf16.msra.mxu0 %v6269_v14  ;;  %v6276_v14 = vld [vmem:[#allocation7 + $0x1c0] sm:$0xff]   ;;  %v659_v24 = vpack.c.bf16 %v633_v11, %v441_v10  ;;  %v7031_v56 = vpack.c.bf16 %v441_v10, %v631_v37  ;;  %v6284_v10 = vld [vmem:[#allocation7 + $0x178] sm:$0xff]   ;;  %8272 = vst [vmem:[#allocation30_spill] sm:$0xff] %v7056_v19 }
  0xb2   : > { %5348 = vmatprep.subr.bf16.mxu0 %v6270_v21  ;;  %v594_v21 = vpack.c.bf16 %v7009_v4, %v566_v57  ;;  %5452 = vmatprep.subr.bf16.mxu1 %v6276_v14  ;;  %v635_v57 = vld [vmem:[#allocation2 + $0x187] sm:$0xff]  ;;  %v6285_v60 = vld [vmem:[#allocation7 + $0x138] sm:$0xff]  }
  0xb3   : > { %v639_v6 = vld [vmem:[#allocation2 + $0x217] sm:$0xff] }
  0xb4   : > { %1783 = vmatmul.mubr.bf16.gmra.mrb[8].mxu0 %v6945_v20 }
  0xb5   : > { %1790 = vmatprep.mubr.bf16.mxu0 %v6953_v23  ;;  %5349 = vmatpush3.bf16.msra.mxu0 %v6271_v27  ;;  %v6278_v27 = vld [vmem:[#allocation7 + $0x1c8] sm:$0xff]  }
  0xb6   : > { %5350 = vmatprep.subr.bf16.mxu0 %v6272_v43  ;;  %v443_v43 = vld [vmem:[#allocation2 + $0x16f] sm:$0xff] }
  0xb7   : > { %1944 = vmatmul.mubr.bf16.gmra.mrb[8].mxu1 %v592_v26  ;;  %v6277_v26 = vld [vmem:[#allocation7 + $0x180] sm:$0xff]   ;;  %v660_v37 = vpack.c.bf16 %v635_v57, %v443_v43  ;;  %v7054_v34 = vpack.c.bf16 %v443_v43, %v633_v11  ;;  %v6288_v43 = vld [vmem:[#allocation7 + $0x1e8] sm:$0xff]  }
  0xb8   : > { %1951 = vmatprep.mubr.bf16.mxu1 %v657_v28  ;;  %v7018_v28 = vld [vmem:[#allocation2 + $0x129] sm:$0xff]  ;;  %5453 = vmatpush3.bf16.msra.mxu1 %v6277_v26  ;;  %v7041_v26 = vld [vmem:[%s6759_s6 + $0xe0] sm:$0xff] }
  0xb9   : > { %5351 = vmatpush3.bf16.msra.mxu0 %v6273_v46  ;;  %5454 = vmatprep.subr.bf16.mxu1 %v6278_v27  ;;  %v6279_v46 = vld [vmem:[#allocation7 + $0x188] sm:$0xff]   ;;  %v595_v14 = vpack.c.bf16 %v7020_v36, %v7018_v28  ;;  %8269 = vst [vmem:[#allocation27_spill] sm:$0xff] %v7041_v26  ;;  %426 = vst [vmem:[#allocation2 + $0x350] sm:$0xff] %v7041_v26  ;;  %v7049_v27 = vld [vmem:[#allocation2 + $0x159] sm:$0xff] }
  0xba   : > { %5352 = vmatprep.subr.bf16.mxu0 %v6274_v58  ;;  %v7036_v58 = vpack.c.bf16 %v6919_v9, %v6913_v7  ;;  %8271 = vst [vmem:[#allocation29_spill] sm:$0xff] %v7054_v34  ;;  %v6291_v7 = vld [vmem:[#allocation7 + $0x1b0] sm:$0xff]  }
  0xbc   : > { %1791 = vmatmul.mubr.bf16.gmra.mrb[12].mxu0 %v6981_v35  ;;  %5455 = vmatpush3.bf16.msra.mxu1 %v6279_v46  ;;  %v7051_v46 = vld [vmem:[#allocation2 + $0x171] sm:$0xff] }
  0xbd   : > { %1798 = vmatprep.mubr.bf16.mxu0 %v530_v41  ;;  %5353 = vmatpush3.bf16.msra.mxu0 %v6275_v5  ;;  %v7023_v41 = vld [vmem:[%s6759_s6 + $0xd0] sm:$0xff]  ;;  %v596_v11 = vpack.c.bf16 %v7051_v46, %v7049_v27 }
  0xbe   : > { %424 = vst [vmem:[#allocation2 + $0x320] sm:$0xff] %v7023_v41  ;;  %v6281_v5 = vld [vmem:[#allocation7 + $0x190] sm:$0xff]   ;;  %5354 = vmatprep.subr.bf16.mxu0 %v6284_v10 }
  0xbf   : > { %1952 = vmatmul.mubr.bf16.gmra.mrb[12].mxu1 %v593_v50  ;;  %v7027_v50 = vld [vmem:[%s6759_s6 + $0xd8] sm:$0xff]  ;;  %v7069_v10 = vld [vmem:[%s6759_s6 + $0xf0] sm:$0xff] }
  0xc0   : > { %1959 = vmatprep.mubr.bf16.mxu1 %v658_v54  ;;  %425 = vst [vmem:[#allocation2 + $0x338] sm:$0xff] %v7027_v50  ;;  %v6283_v54 = vld [vmem:[#allocation7 + $0x198] sm:$0xff]   ;;  %8274 = vst [vmem:[#allocation32_spill] sm:$0xff] %v7069_v10 }
  0xc1   : > { %5355 = vmatpush3.bf16.msra.mxu0 %v6285_v60  ;;  %428 = vst [vmem:[#allocation2 + $0x380] sm:$0xff] %v7069_v10  ;;  %v7076_v60 = vld [vmem:[#allocation2 + $0x189] sm:$0xff] }
  0xc4   : > { %1799 = vmatmul.mubr.bf16.gmra.mrb[16].mxu0 %v466_v2  ;;  %v6280_v2 = vld [vmem:[#allocation7 + $0x1d0] sm:$0xff]  }
  0xc5   : > { %1806 = vmatprep.mubr.bf16.mxu0 %v7014_v8  ;;  %5456 = vmatprep.subr.bf16.mxu1 %v6280_v2  ;;  %v445_v2 = vld [vmem:[#allocation2 + $0x19f] sm:$0xff] }
  0xc6   : > { %5457 = vmatpush3.bf16.msra.mxu1 %v6281_v5  ;;  %v7062_v5 = vpack.c.bf16 %v6931_v15, %v6925_v12  ;;  %v7083_v9 = vpack.c.bf16 %v445_v2, %v635_v57  ;;  %v447_v12 = vld [vmem:[#allocation2 + $0x1ff] sm:$0xff]  ;;  %v446_v57 = vld [vmem:[#allocation2 + $0x1e7] sm:$0xff] }
  0xc7   : > { %1960 = vmatmul.mubr.bf16.gmra.mrb[16].mxu1 %v594_v21  ;;  %v6282_v21 = vld [vmem:[#allocation7 + $0x1d8] sm:$0xff]   ;;  %v641_v15 = vld [vmem:[#allocation2 + $0x247] sm:$0xff] }
  0xc8   : > { %1967 = vmatprep.mubr.bf16.mxu1 %v659_v24  ;;  %v7047_v24 = vld [vmem:[%s6759_s6 + $0xe8] sm:$0xff]  ;;  %5458 = vmatprep.subr.bf16.mxu1 %v6282_v21  ;;  %8273 = vst [vmem:[#allocation31_spill] sm:$0xff] %v7062_v5  ;;  %v6287_v21 = vld [vmem:[#allocation7 + $0x1a0] sm:$0xff]  }
  0xc9   : > { %8270 = vst [vmem:[#allocation28_spill] sm:$0xff] %v7047_v24  ;;  %427 = vst [vmem:[#allocation2 + $0x368] sm:$0xff] %v7047_v24 }
  0xca   : > { %5459 = vmatpush3.bf16.msra.mxu1 %v6283_v54  ;;  %v7078_v54 = vld [vmem:[#allocation2 + $0x1a1] sm:$0xff] }
  0xcb   : > { %v597_v61 = vpack.c.bf16 %v7078_v54, %v7076_v60 }
  0xcc   : > { %1807 = vmatmul.mubr.bf16.gmra.mrb[20].mxu0 %v7031_v56 }
  0xcd   : > { %1814 = vmatprep.mubr.bf16.mxu0 %v7036_v58 }
  0xcf   : > { %1968 = vmatmul.mubr.bf16.gmra.mrb[20].mxu1 %v595_v14  ;;  %v6286_v14 = vld [vmem:[#allocation7 + $0x1e0] sm:$0xff]  }
  0xd0   : > { %1975 = vmatprep.mubr.bf16.mxu1 %v660_v37  ;;  %5460 = vmatprep.subr.bf16.mxu1 %v6286_v14  ;;  %v661_v37 = vpack.c.bf16 %v7056_v19, %v445_v2  ;;  %v6290_v14 = vld [vmem:[#allocation7 + $0x1f0] sm:$0xff]   ;;  %v6293_v2 = vld [vmem:[#allocation7 + $0x1b8] sm:$0xff]  }
  0xd1   : > { %5461 = vmatpush3.bf16.msra.mxu1 %v6287_v21  ;;  %v6292_v21 = vld [vmem:[#allocation7 + $0x1f8] sm:$0xff]   ;;  %v449_v19 = vld [vmem:[#allocation2 + $0x22f] sm:$0xff] }
  0xd2   : > { %5462 = vmatprep.subr.bf16.mxu1 %v6288_v43  ;;  %v662_v43 = vpack.c.bf16 %v639_v6, %v447_v12 }
  0xd4   : > { %1815 = vmatmul.mubr.bf16.gmra.mrb[24].mxu0 %v7054_v34 }
  0xd5   : > { %1822 = vmatprep.mubr.bf16.mxu0 %v7062_v5  ;;  %v8276_v5 = vmov 0.0   ;;  %5463 = vmatpush3.bf16.msra.mxu1 %v6289_v0  ;;  %v7105_v0 = vld [vmem:[#allocation2 + $0x231] sm:$0xff] }
  0xd6   : > { %v534_v34 = vpack.c.bf16 %v6941_v18, %v8276_v5  ;;  %5464 = vmatprep.subr.bf16.mxu1 %v6290_v14  ;;  %v574_v5 = vld [vmem:[#allocation2 + $0x1e9] sm:$0xff]  ;;  %v7095_v14 = vld [vmem:[#allocation2 + $0x201] sm:$0xff]  ;;  %v7109_v18 = vpack.c.bf16 %v449_v19, %v639_v6 }
  0xd7   : > { %1976 = vmatmul.mubr.bf16.gmra.mrb[24].mxu1 %v596_v11  ;;  %v7089_v11 = vld [vmem:[#allocation7 + $0x200] sm:$0xff]   ;;  %v453_v6 = vld [vmem:[#allocation2 + $0x28f] sm:$0xff] }
  0xd8   : > { %1983 = vmatprep.mubr.bf16.mxu1 %v661_v37  ;;  %6060 = vmatprep.subr.bf16.mxu0 %v7089_v11  ;;  %v470_v37 = vpack.c.bf16 %v447_v12, %v446_v57  ;;  %v451_v12 = vld [vmem:[#allocation2 + $0x25f] sm:$0xff]  ;;  %8277 = vst [vmem:[#allocation34_spill] sm:$0xff] %v7109_v18 }
  0xd9   : > { %5465 = vmatpush3.bf16.msra.mxu1 %v6291_v7  ;;  %v598_v7 = vpack.c.bf16 %v7095_v14, %v574_v5  ;;  %v7127_v57 = vpack.c.bf16 %v451_v12, %v641_v15 }
  0xda   : > { %5466 = vmatprep.subr.bf16.mxu1 %v6292_v21  ;;  %v7103_v21 = vld [vmem:[#allocation2 + $0x219] sm:$0xff] }
  0xdb   : > { %v599_v5 = vpack.c.bf16 %v7105_v0, %v7103_v21  ;;  %8281 = vst [vmem:[#allocation38_spill] sm:$0xff] %v7127_v57 }
  0xdc   : > { %1823 = vmatmul.mubr.bf16.gmra.mrb[28].mxu0 %v7083_v9 }
  0xdd   : > { %1830 = vmatprep.mubr.bf16.mxu0 %v534_v34  ;;  %v7099_v34 = vpack.c.bf16 %v6963_v29, %v6949_v22  ;;  %5467 = vmatpush3.bf16.msra.mxu1 %v6293_v2  ;;  %v7113_v2 = vpack.c.bf16 %v6972_v31, %v6966_v30  ;;  %v7121_v22 = vld [vmem:[#allocation2 + $0x261] sm:$0xff]  ;;  %v7131_v29 = vpack.c.bf16 %v6990_v49, %v6986_v45  ;;  %v7161_v49 = vld [vmem:[#allocation2 + $0x309] sm:$0xff] }
  0xde   : > { %8279 = vst [vmem:[#allocation36_spill] sm:$0xff] %v7121_v22  ;;  %v647_v31 = vld [vmem:[#allocation2 + $0x307] sm:$0xff] }
  0xdf   : > { %1984 = vmatmul.mubr.bf16.gmra.mrb[28].mxu1 %v597_v61  ;;  %v663_v61 = vpack.c.bf16 %v641_v15, %v449_v19  ;;  %8278 = vst [vmem:[#allocation35_spill] sm:$0xff] %v7113_v2  ;;  %v7123_v19 = vld [vmem:[#allocation2 + $0x2a7] sm:$0xff]  ;;  %8282 = vst [vmem:[#allocation39_spill] sm:$0xff] %v7131_v29  ;;  %v455_v15 = vld [vmem:[#allocation2 + $0x2ef] sm:$0xff] }
  0xe0   : > { %1991 = vmatprep.mubr.bf16.mxu1 %v662_v43  ;;  %v643_v43 = vld [vmem:[#allocation2 + $0x277] sm:$0xff]  ;;  %8280 = vst [vmem:[#allocation37_spill] sm:$0xff] %v7123_v19 }
  0xe4   : > { %1831 = vmatmul.mubr.bf16.gmra.mrb[32].mxu0 %v470_v37  ;;  %v664_v37 = vpack.c.bf16 %v643_v43, %v451_v12  ;;  %v7142_v12 = vpack.c.bf16 %v453_v6, %v643_v43  ;;  %v582_v43 = vld [vmem:[#allocation2 + $0x2d9] sm:$0xff] }
  0xe5   : > { %1838 = vmatprep.mubr.bf16.mxu0 %v7099_v34 }
  0xe6   : > { %8284 = vst [vmem:[#allocation41_spill] sm:$0xff] %v7142_v12 }
  0xe7   : > { %1992 = vmatmul.mubr.bf16.gmra.mrb[32].mxu1 %v598_v7  ;;  %v7119_v7 = vld [vmem:[#allocation2 + $0x249] sm:$0xff] }
  0xe8   : > { %1999 = vmatprep.mubr.bf16.mxu1 %v663_v61  ;;  %v600_v30 = vpack.c.bf16 %v7121_v22, %v7119_v7 }
  0xec   : > { %1839 = vmatmul.mubr.bf16.gmra.mrb[36].mxu0 %v7109_v18  ;;  %v7140_v18 = vld [vmem:[#allocation2 + $0x291] sm:$0xff] }
  0xed   : > { %1846 = vmatprep.mubr.bf16.mxu0 %v7113_v2  ;;  %v7138_v2 = vld [vmem:[#allocation2 + $0x279] sm:$0xff]  ;;  %8283 = vst [vmem:[#allocation40_spill] sm:$0xff] %v7140_v18 }
  0xef   : > { %2000 = vmatmul.mubr.bf16.gmra.mrb[36].mxu1 %v599_v5  ;;  %v665_v5 = vpack.c.bf16 %v7123_v19, %v453_v6  ;;  %v601_v19 = vpack.c.bf16 %v7140_v18, %v7138_v2  ;;  %v7153_v6 = vld [vmem:[#allocation2 + $0x2f1] sm:$0xff] }
  0xf0   : > { %2007 = vmatprep.mubr.bf16.mxu1 %v664_v37  ;;  %v7144_v37 = vld [vmem:[#allocation2 + $0x8] sm:$0xff]  ;;  %v602_v18 = vpack.c.bf16 %v7153_v6, %v582_v43  ;;  %v7179_v43 = vld [vmem:[#allocation2 + $0x397] sm:$0xff] }
  0xf1   : > { %v538_v61 = vpack.c.bf16 %v6999_v53, %v7144_v37  ;;  %v7157_v53 = vpack.c.bf16 %v7023_v41, %v7005_v59  ;;  %8286 = vst [vmem:[#allocation43_spill] sm:$0xff] %v7179_v43 }
  0xf4   : > { %1847 = vmatmul.mubr.bf16.gmra.mrb[40].mxu0 %v7127_v57  ;;  %v649_v57 = vld [vmem:[#allocation2 + $0x337] sm:$0xff] }
  0xf5   : > { %1854 = vmatprep.mubr.bf16.mxu0 %v7131_v29  ;;  %v454_v29 = vld [vmem:[#allocation2 + $0x2d7] sm:$0xff] }
  0xf6   : > { %v474_v22 = vpack.c.bf16 %v455_v15, %v454_v29  ;;  %v7169_v29 = vpack.c.bf16 %v7041_v26, %v7027_v50 }
  0xf7   : > { %2008 = vmatmul.mubr.bf16.gmra.mrb[40].mxu1 %v600_v30  ;;  %v666_v30 = vpack.c.bf16 %v647_v31, %v455_v15 }
  0xf8   : > { %2015 = vmatprep.mubr.bf16.mxu1 %v665_v5  ;;  %v457_v5 = vld [vmem:[#allocation2 + $0x31f] sm:$0xff]  ;;  %8285 = vst [vmem:[#allocation42_spill] sm:$0xff] %v7169_v29 }
  0xf9   : > { %v667_v45 = vpack.c.bf16 %v649_v57, %v457_v5  ;;  %v7165_v52 = vpack.c.bf16 %v457_v5, %v647_v31  ;;  %v461_v31 = vld [vmem:[#allocation2 + $0x37f] sm:$0xff]  ;;  %v7185_v5 = vpack.c.bf16 %v7069_v10, %v7047_v24 }
  0xfb   : > { %8287 = vst [vmem:[#allocation44_spill] sm:$0xff] %v7185_v5 }
  0xfc   : > { %1855 = vmatmul.mubr.bf16.gmra.mrb[44].mxu0 %v7142_v12  ;;  %v651_v12 = vld [vmem:[#allocation2 + $0x367] sm:$0xff] }
  0xfd   : > { %1862 = vmatprep.mubr.bf16.mxu0 %v538_v61  ;;  %v7163_v61 = vld [vmem:[#allocation2 + $0x321] sm:$0xff] }
  0xff   : > { %2016 = vmatmul.mubr.bf16.gmra.mrb[44].mxu1 %v601_v19  ;;  %v459_v19 = vld [vmem:[#allocation2 + $0x34f] sm:$0xff] }
 0x100   : > { %2023 = vmatprep.mubr.bf16.mxu1 %v666_v30  ;;  %v668_v15 = vpack.c.bf16 %v651_v12, %v459_v19  ;;  %v7175_v30 = vld [vmem:[#allocation2 + $0x339] sm:$0xff] }
 0x104   : > { %1863 = vmatmul.mubr.bf16.gmra.mrb[48].mxu0 %v474_v22  ;;  %v603_v22 = vpack.c.bf16 %v7163_v61, %v7161_v49 }
 0x105   : > { %1870 = vmatprep.mubr.bf16.mxu0 %v7157_v53 }
 0x107   : > { %2024 = vmatmul.mubr.bf16.gmra.mrb[48].mxu1 %v602_v18  ;;  %v7177_v18 = vld [vmem:[#allocation2 + $0x351] sm:$0xff] }
 0x108   : > { %2031 = vmatprep.mubr.bf16.mxu1 %v667_v45  ;;  %v7181_v45 = vpack.c.bf16 %v459_v19, %v649_v57  ;;  %v604_v26 = vpack.c.bf16 %v7177_v18, %v7175_v30  ;;  %v7194_v57 = vld [vmem:[#allocation2 + $0x369] sm:$0xff]  ;;  %v7196_v19 = vld [vmem:[#allocation2 + $0x381] sm:$0xff] }
 0x109   : > { %v605_v24 = vpack.c.bf16 %v7196_v19, %v7194_v57 }
 0x10c   : > { %1871 = vmatmul.mubr.bf16.gmra.mrb[52].mxu0 %v7165_v52 }
 0x10d   : > { %1878 = vmatprep.mubr.bf16.mxu0 %v7169_v29  ;;  %v669_v29 = vpack.c.bf16 %v7179_v43, %v461_v31  ;;  %v686_v43 = vld [vmem:[#allocation2 + $0x20] sm:$0xff] }
 0x10f   : > { %2032 = vmatmul.mubr.bf16.gmra.mrb[52].mxu1 %v603_v22  ;;  %v7192_v22 = vpack.c.bf16 %v461_v31, %v651_v12  ;;  %v783_v12 = vpack.c.bf16 %v6927_v13, %v6902_v1  ;;  %v8288_v1 = vpack.c.bf16 %v6864_v39, %v6861_v38  ;;  %v7213_v13 = vld [vmem:[#allocation2 + $0xc9] sm:$0xff]  ;;  %v8289_v38 = vpack.c.bf16 %v6873_v42, %v6869_v40 }
 0x110   : > { %2039 = vmatprep.mubr.bf16.mxu1 %v668_v15  ;;  %v6375_v15 = vld [vmem:[#allocation2 + $0x21] sm:$0xff]  ;;  %v8290_v42 = vpack.c.bf16 %v6884_v48, %v6877_v44  ;;  %v788_v44 = vpack.c.bf16 %v7076_v60, %v7051_v46  ;;  %v830_v60 = vld [vmem:[#allocation2 + $0x1cf] sm:$0xff]  ;;  %v790_v31 = vpack.c.bf16 %v7103_v21, %v7095_v14 }
 0x111   : > { %v782_v10 = vpack.c.bf16 %v6900_v63, %v6375_v15  ;;  %v6296_v63 = vld [vmem:[#allocation7 + $0x210] sm:$0xff]   ;;  %v6377_v39 = vld [vmem:[#allocation2 + $0xc8] sm:$0xff]  ;;  %v8301_v15 = vld [vmem:[#allocation18_spill] sm:$0xff] }
 0x112   : > { %v8292_v48 = vld [vmem:[#allocation15_spill] sm:$0xff]  ;;  %v8308_v21 = vld [vmem:[#allocation36_spill] sm:$0xff] }
 0x113   : > { %v8307_v14 = vld [vmem:[#allocation35_spill] sm:$0xff] }
 0x114   : > { %1879 = vmatmul.mubr.bf16.gmra.mrb[56].mxu0 %v7181_v45 }
 0x115   : > { %1886 = vmatprep.mubr.bf16.mxu0 %v7185_v5  ;;  %v6376_v5 = vld [vmem:[#allocation2 + $0x38] sm:$0xff] }
 0x117   : > { %2040 = vmatmul.mubr.bf16.gmra.mrb[56].mxu1 %v604_v26  ;;  %v718_v26 = vpack.c.bf16 %v6376_v5, %v686_v43  ;;  %v8300_v43 = vld [vmem:[#allocation30_spill] sm:$0xff] }
 0x118   : > { %2047 = vmatprep.mubr.bf16.mxu1 %v669_v29  ;;  %v6295_v29 = vld [vmem:[#allocation7 + $0x208] sm:$0xff]   ;;  %v854_v5 = vpack.c.bf16 %v830_v60, %v8300_v43 }
 0x11c   : > { %1887 = vmatmul.mubr.bf16.gmra.mrb[60].mxu0 %v7192_v22 }
 0x11d   : > { %2088 = vmatprep.mubr.bf16.mxu0 %v782_v10  ;;  %v6298_v10 = vld [vmem:[#allocation7 + $0x220] sm:$0xff]  }
 0x11f   : > { %2048 = vmatmul.mubr.bf16.gmra.mrb[60].mxu1 %v605_v24  ;;  %v784_v24 = vpack.c.bf16 %v6975_v32, %v6936_v17  ;;  %v914_v17 = vpack.c.bf16 %v7144_v37, %v6377_v39  ;;  %v6300_v32 = vld [vmem:[#allocation7 + $0x230] sm:$0xff]  }
 0x120   : > { %2249 = vmatprep.mubr.bf16.mxu1 %v6880_v47  ;;  %v6297_v47 = vld [vmem:[#allocation7 + $0x218] sm:$0xff]  }
 0x124   : > { %2089 = vmatmul.mubr.bf16.vlgmr.msra.gmra.mrb[64].mxu0 %v718_v26  ;;  %v791_v26 = vpack.c.bf16 %v7119_v7, %v7105_v0  ;;  %v8312_v0 = vld [vmem:[#allocation38_spill] sm:$0xff]  ;;  %v8313_v7 = vld [vmem:[#allocation39_spill] sm:$0xff] }
 0x125   : > { %6061 = vmatpush3.bf16.msra.mxu0 %v7089_v11  ;;  %2096 = vmatprep.mubr.bf16.mxu0 %v783_v12  ;;  %v6378_v11 = vld [vmem:[#allocation2 + $0x1b8] sm:$0xff]  ;;  %v8303_v12 = vld [vmem:[#allocation20_spill] sm:$0xff] }
 0x126   : > { %6062 = vmatprep.subr.bf16.mxu0 %v6295_v29  ;;  %v918_v46 = vpack.c.bf16 %v7144_v37, %v6378_v11 }
 0x127   : > { %2250 = vmatmul.mubr.bf16.vlgmr.msra.gmra.mrb[64].mxu1 %v6898_v62  ;;  %v785_v62 = vpack.c.bf16 %v7213_v13, %v6977_v33  ;;  %v6301_v33 = vld [vmem:[#allocation7 + $0x238] sm:$0xff]  }
 0x128   : > { %2257 = vmatprep.mubr.bf16.mxu1 %v6906_v3  ;;  %v6299_v3 = vld [vmem:[#allocation7 + $0x228] sm:$0xff]  }
 0x129   : > { %6063 = vmatpush3.bf16.msra.mxu0 %v6295_v29 }
 0x12a   : > { %6064 = vmatprep.subr.bf16.mxu0 %v6296_v63 }
 0x12c   : > { %2097 = vmatmul.mubr.bf16.gmra.mrb[68].mxu0 %v8288_v1 }
 0x12d   : > { %2104 = vmatprep.mubr.bf16.mxu0 %v784_v24  ;;  %6065 = vmatpush3.bf16.msra.mxu0 %v6296_v63  ;;  %v8306_v63 = vld [vmem:[#allocation34_spill] sm:$0xff] }
 0x12e   : > { %6066 = vmatprep.subr.bf16.mxu0 %v6297_v47  ;;  %v8309_v24 = vld [vmem:[#allocation22_spill] sm:$0xff] }
 0x12f   : > { %2258 = vmatmul.mubr.bf16.gmra.mrb[68].mxu1 %v6945_v20  ;;  %v822_v20 = vld [vmem:[#allocation2 + $0xdf] sm:$0xff] }
 0x130   : > { %2265 = vmatprep.mubr.bf16.mxu1 %v6953_v23  ;;  %v786_v23 = vpack.c.bf16 %v7018_v28, %v7009_v4  ;;  %v850_v40 = vpack.c.bf16 %v822_v20, %v6955_v25  ;;  %v8291_v4 = vpack.c.bf16 %v6892_v55, %v6888_v51  ;;  %v8293_v25 = vld [vmem:[#allocation14_spill] sm:$0xff]  ;;  %v8297_v55 = vld [vmem:[#allocation17_spill] sm:$0xff] }
 0x131   : > { %6067 = vmatpush3.bf16.msra.mxu0 %v6297_v47  ;;  %v8294_v28 = vpack.c.bf16 %v8292_v48, %v8293_v25  ;;  %v8310_v47 = vld [vmem:[#allocation21_spill] sm:$0xff] }
 0x132   : > { %6068 = vmatprep.subr.bf16.mxu0 %v6298_v10  ;;  %v8311_v1 = vpack.c.bf16 %v8309_v24, %v8310_v47 }
 0x134   : > { %2105 = vmatmul.mubr.bf16.gmra.mrb[72].mxu0 %v8289_v38  ;;  %v8316_v38 = vld [vmem:[#allocation23_spill] sm:$0xff] }
 0x135   : > { %2112 = vmatprep.mubr.bf16.mxu0 %v785_v62  ;;  %6069 = vmatpush3.bf16.msra.mxu0 %v6298_v10  ;;  %v8314_v10 = vld [vmem:[#allocation40_spill] sm:$0xff] }
 0x136   : > { %6070 = vmatprep.subr.bf16.mxu0 %v6299_v3 }
 0x137   : > { %2266 = vmatmul.mubr.bf16.gmra.mrb[72].mxu1 %v6981_v35  ;;  %v787_v35 = vpack.c.bf16 %v7049_v27, %v7020_v36  ;;  %v8295_v36 = vld [vmem:[#allocation29_spill] sm:$0xff]  ;;  %v8296_v27 = vld [vmem:[#allocation31_spill] sm:$0xff] }
 0x138   : > { %2273 = vmatprep.mubr.bf16.mxu1 %v914_v17  ;;  %v8318_v17 = vld [vmem:[#allocation26_spill] sm:$0xff] }
 0x139   : > { %6071 = vmatpush3.bf16.msra.mxu0 %v6299_v3  ;;  %v8315_v3 = vld [vmem:[#allocation24_spill] sm:$0xff] }
 0x13a   : > { %6072 = vmatprep.subr.bf16.mxu0 %v6300_v32  ;;  %v8317_v39 = vpack.c.bf16 %v8315_v3, %v8316_v38 }
 0x13c   : > { %2113 = vmatmul.mubr.bf16.gmra.mrb[76].mxu0 %v8290_v42 }
 0x13d   : > { %2120 = vmatprep.mubr.bf16.mxu0 %v786_v23  ;;  %6073 = vmatpush3.bf16.msra.mxu0 %v6300_v32  ;;  %v8319_v32 = vld [vmem:[#allocation41_spill] sm:$0xff]  ;;  %v7288_v23 = vld [vmem:[%s8206_s3] ss:$0 sm:$0xff] }
 0x13e   : > { %6074 = vmatprep.subr.bf16.mxu0 %v6301_v33 }
 0x13f   : > { %2274 = vmatmul.mubr.bf16.gmra.mrb[76].mxu1 %v850_v40  ;;  %v838_v40 = vld [vmem:[#allocation2 + $0x2bf] sm:$0xff] }
 0x140   : > { %2281 = vmatprep.mubr.bf16.mxu1 %v7014_v8  ;;  %v7243_v8 = vld [vmem:[#allocation2 + $0x1b9] sm:$0xff] }
 0x141   : > { %6075 = vmatpush3.bf16.msra.mxu0 %v6301_v33  ;;  %v789_v51 = vpack.c.bf16 %v7243_v8, %v7078_v54  ;;  %v8302_v54 = vpack.c.bf16 %v6934_v16, %v8301_v15  ;;  %v792_v16 = vpack.c.bf16 %v7138_v2, %v8308_v21  ;;  %v922_v2 = vpack.c.bf16 %v7144_v37, %v8318_v17 }
 0x144   : > { %2121 = vmatmul.mubr.bf16.gmra.mrb[80].mxu0 %v8291_v4  ;;  %v794_v4 = vpack.c.bf16 %v7161_v49, %v7153_v6 }
 0x145   : > { %2128 = vmatprep.mubr.bf16.mxu0 %v787_v35 }
 0x147   : > { %2282 = vmatmul.mubr.bf16.gmra.mrb[80].mxu1 %v7031_v56  ;;  %v8298_v56 = vld [vmem:[#allocation16_spill] sm:$0xff] }
 0x148   : > { %2289 = vmatprep.mubr.bf16.mxu1 %v7036_v58  ;;  %v8299_v58 = vpack.c.bf16 %v8297_v55, %v8298_v56 }
 0x14c   : > { %2129 = vmatmul.mubr.bf16.gmra.mrb[84].mxu0 %v8294_v28 }
 0x14d   : > { %2136 = vmatprep.mubr.bf16.mxu0 %v788_v44 }
 0x14f   : > { %2290 = vmatmul.mubr.bf16.gmra.mrb[84].mxu1 %v8295_v36 }
 0x150   : > { %2297 = vmatprep.mubr.bf16.mxu1 %v8296_v27  ;;  %v8320_v27 = vld [vmem:[#allocation37_spill] sm:$0xff] }
 0x154   : > { %2137 = vmatmul.mubr.bf16.gmra.mrb[88].mxu0 %v8299_v58  ;;  %v8321_v58 = vld [vmem:[#allocation25_spill] sm:$0xff] }
 0x155   : > { %2144 = vmatprep.mubr.bf16.mxu0 %v789_v51  ;;  %v858_v51 = vpack.c.bf16 %v838_v40, %v8320_v27  ;;  %v8322_v11 = vpack.c.bf16 %v8318_v17, %v8321_v58  ;;  %v6303_v40 = vld [vmem:[#allocation9] sm:$0xff]   ;;  %v8326_v27 = vld [vmem:[#allocation44_spill] sm:$0xff] }
 0x157   : > { %2298 = vmatmul.mubr.bf16.gmra.mrb[88].mxu1 %v7083_v9  ;;  %v8304_v9 = vld [vmem:[#allocation19_spill] sm:$0xff] }
 0x158   : > { %2305 = vmatprep.mubr.bf16.mxu1 %v918_v46  ;;  %v8305_v29 = vpack.c.bf16 %v8303_v12, %v8304_v9  ;;  %v795_v9 = vpack.c.bf16 %v7175_v30, %v7163_v61  ;;  %v731_v30 = vpack.c.bf16 %v7027_v50, %v7023_v41 }
 0x15c   : > { %2145 = vmatmul.mubr.bf16.gmra.mrb[92].mxu0 %v8302_v54 }
 0x15d   : > { %2152 = vmatprep.mubr.bf16.mxu0 %v790_v31 }
 0x15f   : > { %2306 = vmatmul.mubr.bf16.gmra.mrb[92].mxu1 %v854_v5  ;;  %v6379_v5 = vld [vmem:[#allocation2 + $0x2f0] sm:$0xff] }
 0x160   : > { %2313 = vmatprep.mubr.bf16.mxu1 %v7099_v34  ;;  %v7273_v34 = vld [vmem:[#allocation2 + $0x2a9] sm:$0xff]  ;;  %v730_v15 = vpack.c.bf16 %v7005_v59, %v6379_v5  ;;  %v8327_v5 = vld [vmem:[#allocation33_spill] sm:$0xff] }
 0x161   : > { %v793_v62 = vpack.c.bf16 %v7273_v34, %v8314_v10  ;;  %v8323_v10 = vld [vmem:[#allocation42_spill] sm:$0xff] }
 0x164   : > { %2153 = vmatmul.mubr.bf16.gmra.mrb[96].mxu0 %v8305_v29 }
 0x165   : > { %2160 = vmatprep.mubr.bf16.mxu0 %v791_v26 }
 0x167   : > { %2314 = vmatmul.mubr.bf16.gmra.mrb[96].mxu1 %v8306_v63 }
 0x168   : > { %2321 = vmatprep.mubr.bf16.mxu1 %v8307_v14 }
 0x16c   : > { %2161 = vmatmul.mubr.bf16.gmra.mrb[100].mxu0 %v8311_v1 }
 0x16d   : > { %2168 = vmatprep.mubr.bf16.mxu0 %v792_v16 }
 0x16f   : > { %2322 = vmatmul.mubr.bf16.gmra.mrb[100].mxu1 %v8312_v0 }
 0x170   : > { %2329 = vmatprep.mubr.bf16.mxu1 %v8313_v7 }
 0x174   : > { %2169 = vmatmul.mubr.bf16.gmra.mrb[104].mxu0 %v8317_v39  ;;  %v796_v39 = vpack.c.bf16 %v7194_v57, %v7177_v18 }
 0x175   : > { %2176 = vmatprep.mubr.bf16.mxu0 %v793_v62 }
 0x177   : > { %2330 = vmatmul.mubr.bf16.gmra.mrb[104].mxu1 %v8319_v32  ;;  %v5132_v20 = vpop.f32.mrb[0].mxu0 }
 0x178   : > { %v5133_v33 = vpop.f32.mrb[1].mxu0  ;;  %2337 = vmatprep.mubr.bf16.mxu1 %v922_v2 }
 0x179   : > { %v5134_v42 = vadd.f32 %v5133_v33, %v5132_v20  ;;  %v5135_v35 = vpop.f32.mrb[2].mxu0  ;;  %v6302_v33 = vld [vmem:[#allocation9 + $0x40] sm:$0xff]  }
 0x17a   : > { %v5244_v44 = vpop.f32.mrb[0].mxu1  ;;  %v5136_v48 = vpop.f32.mrb[3].mxu0  ;;  %5588 = vmatprep.subr.bf16.mxu1 %v6302_v33  ;;  %v945_v33 = vld [vmem:[#allocation2 + $0x69] sm:$0xff] }
 0x17b   : > { %v1769_v25 = vadd.f32 %v5134_v42, %v7288_v23  ;;  %v5137_v28 = vadd.f32 %v5136_v48, %v5135_v35  ;;  %v5245_v36 = vpop.f32.mrb[1].mxu1  ;;  %5589 = vmatpush3.bf16.msra.mxu1 %v6303_v40  ;;  %v946_v40 = vld [vmem:[#allocation2 + $0x81] sm:$0xff] }
 0x17c   : > { %v5246_v55 = vadd.f32 %v5245_v36, %v5244_v44  ;;  %v5247_v56 = vpop.f32.mrb[2].mxu1  ;;  %2177 = vmatmul.mubr.bf16.gmra.mrb[108].mxu0 %v8322_v11  ;;  %v7320_v44 = vld [vmem:[#allocation2 + $0x399] sm:$0xff] }
 0x17d   : > { %v1772_v46 = vadd.f32 %v5137_v28, %v7288_v23  ;;  %v5248_v60 = vpop.f32.mrb[3].mxu1  ;;  %2184 = vmatprep.mubr.bf16.mxu0 %v794_v4  ;;  %v8325_v28 = vld [vmem:[#allocation28_spill] sm:$0xff]  ;;  %v797_v58 = vpack.c.bf16 %v7320_v44, %v7196_v19 }
 0x17e   : > { %v5249_v31 = vadd.f32 %v5248_v60, %v5247_v56  ;;  %v7298_v49 = vadd.f32 %v5246_v55, %v1769_v25  ;;  %v8324_v25 = vld [vmem:[#allocation27_spill] sm:$0xff] }
 0x17f   : > { %2338 = vmatmul.mubr.bf16.gmra.mrb[108].mxu1 %v858_v51  ;;  %v5138_v6 = vpop.f32.mrb[4].mxu0  ;;  %v732_v36 = vpack.c.bf16 %v8325_v28, %v8324_v25 }
 0x180   : > { %v5139_v43 = vpop.f32.mrb[5].mxu0  ;;  %2345 = vmatprep.mubr.bf16.mxu1 %v7157_v53  ;;  %v7302_v54 = vadd.f32 %v5249_v31, %v1772_v46 }
 0x181   : > { %v5140_v26 = vadd.f32 %v5139_v43, %v5138_v6  ;;  %v5141_v12 = vpop.f32.mrb[6].mxu0 }
 0x182   : > { %v5250_v29 = vpop.f32.mrb[4].mxu1  ;;  %v5142_v63 = vpop.f32.mrb[7].mxu0 }
 0x183   : > { %v1777_v14 = vadd.f32 %v5140_v26, %v7288_v23  ;;  %v5143_v21 = vadd.f32 %v5142_v63, %v5141_v12  ;;  %v5251_v16 = vpop.f32.mrb[5].mxu1  ;;  %v944_v63 = vld [vmem:[#allocation2 + $0x51] sm:$0xff] }
 0x184   : > { %v5252_v24 = vadd.f32 %v5251_v16, %v5250_v29  ;;  %v5253_v47 = vpop.f32.mrb[6].mxu1  ;;  %2185 = vmatmul.mubr.bf16.gmra.mrb[112].mxu0 %v730_v15  ;;  %v926_v15 = vpack.c.bf16 %v7144_v37, %v8327_v5  ;;  %v943_v29 = vld [vmem:[#allocation2 + $0x39] sm:$0xff]  ;;  %v8328_v16 = vld [vmem:[#allocation32_spill] sm:$0xff] }
 0x185   : > { %v1780_v59 = vadd.f32 %v5143_v21, %v7288_v23  ;;  %v5254_v1 = vpop.f32.mrb[7].mxu1  ;;  %2192 = vmatprep.mubr.bf16.mxu0 %v795_v9 }
 0x186   : > { %v5255_v53 = vadd.f32 %v5254_v1, %v5253_v47  ;;  %v7308_v0 = vadd.f32 %v5252_v24, %v1777_v14  ;;  %v733_v24 = vpack.c.bf16 %v8327_v5, %v8328_v16  ;;  %v846_v47 = vld [vmem:[#allocation2 + $0x3af] sm:$0xff] }
 0x187   : > { %2346 = vmatmul.mubr.bf16.gmra.mrb[112].mxu1 %v7165_v52  ;;  %v5144_v7 = vpop.f32.mrb[8].mxu0 }
 0x188   : > { %v5145_v61 = vpop.f32.mrb[9].mxu0  ;;  %2353 = vmatprep.mubr.bf16.mxu1 %v8323_v10  ;;  %v7314_v62 = vadd.f32 %v5255_v53, %v1780_v59  ;;  %v975_v53 = vpack.c.bf16 %v944_v63, %v943_v29 }
 0x189   : > { %v5146_v3 = vadd.f32 %v5145_v61, %v5144_v7  ;;  %v5147_v38 = vpop.f32.mrb[10].mxu0 }
 0x18a   : > { %v5256_v17 = vpop.f32.mrb[8].mxu1  ;;  %v5148_v2 = vpop.f32.mrb[11].mxu0 }
 0x18b   : > { %v1785_v32 = vadd.f32 %v5146_v3, %v7288_v23  ;;  %v5149_v20 = vadd.f32 %v5148_v2, %v5147_v38  ;;  %v5257_v52 = vpop.f32.mrb[9].mxu1  ;;  %v8329_v38 = vld [vmem:[#allocation43_spill] sm:$0xff] }
 0x18c   : > { %v5258_v42 = vadd.f32 %v5257_v52, %v5256_v17  ;;  %v5259_v35 = vpop.f32.mrb[10].mxu1  ;;  %2193 = vmatmul.mubr.bf16.gmra.mrb[116].mxu0 %v731_v30  ;;  %v6305_v17 = vld [vmem:[#allocation9 + $0x8] sm:$0xff]  }
 0x18d   : > { %v1788_v41 = vadd.f32 %v5149_v20, %v7288_v23  ;;  %v5260_v50 = vpop.f32.mrb[11].mxu1  ;;  %2200 = vmatprep.mubr.bf16.mxu0 %v796_v39  ;;  %v6304_v39 = vld [vmem:[#allocation9 + $0x48] sm:$0xff]  }
 0x18e   : > { %v5261_v4 = vadd.f32 %v5260_v50, %v5259_v35  ;;  %v7322_v18 = vadd.f32 %v5258_v42, %v1785_v32  ;;  %5590 = vmatprep.subr.bf16.mxu1 %v6304_v39  ;;  %v947_v35 = vld [vmem:[#allocation2 + $0x99] sm:$0xff]  ;;  %v954_v39 = vld [vmem:[#allocation2 + $0x171] sm:$0xff] }
 0x18f   : > { %2354 = vmatmul.mubr.bf16.gmra.mrb[116].mxu1 %v7181_v45  ;;  %v5150_v57 = vpop.f32.mrb[12].mxu0 }
 0x190   : > { %v5151_v48 = vpop.f32.mrb[13].mxu0  ;;  %2361 = vmatprep.mubr.bf16.mxu1 %v8326_v27  ;;  %v7328_v51 = vadd.f32 %v5261_v4, %v1788_v41  ;;  %v948_v41 = vld [vmem:[#allocation2 + $0xb1] sm:$0xff]  ;;  %5591 = vmatpush3.bf16.msra.mxu1 %v6305_v17 }
 0x191   : > { %v5152_v55 = vadd.f32 %v5151_v48, %v5150_v57  ;;  %v5153_v56 = vpop.f32.mrb[14].mxu0  ;;  %v976_v48 = vpack.c.bf16 %v946_v40, %v945_v33  ;;  %v977_v27 = vpack.c.bf16 %v948_v41, %v947_v35 }
 0x192   : > { %v5262_v11 = vpop.f32.mrb[12].mxu1  ;;  %v5154_v46 = vpop.f32.mrb[15].mxu0 }
 0x193   : > { %v1793_v60 = vadd.f32 %v5152_v55, %v7288_v23  ;;  %v5155_v31 = vadd.f32 %v5154_v46, %v5153_v56  ;;  %v5263_v45 = vpop.f32.mrb[13].mxu1 }
 0x194   : > { %v5264_v6 = vadd.f32 %v5263_v45, %v5262_v11  ;;  %v5265_v43 = vpop.f32.mrb[14].mxu1  ;;  %2201 = vmatmul.mubr.bf16.gmra.mrb[120].mxu0 %v732_v36 }
 0x195   : > { %v1796_v26 = vadd.f32 %v5155_v31, %v7288_v23  ;;  %v5266_v12 = vpop.f32.mrb[15].mxu1  ;;  %2208 = vmatprep.mubr.bf16.mxu0 %v797_v58 }
 0x196   : > { %v5267_v9 = vadd.f32 %v5266_v12, %v5265_v43  ;;  %v7336_v19 = vadd.f32 %v5264_v6, %v1793_v60  ;;  %v950_v43 = vld [vmem:[#allocation2 + $0xe1] sm:$0xff] }
 0x197   : > { %2362 = vmatmul.mubr.bf16.gmra.mrb[120].mxu1 %v7192_v22  ;;  %v5156_v14 = vpop.f32.mrb[16].mxu0  ;;  %v862_v22 = vpack.c.bf16 %v846_v47, %v8329_v38  ;;  %v978_v63 = vpack.c.bf16 %v950_v43, %v7213_v13  ;;  %v953_v13 = vld [vmem:[#allocation2 + $0x159] sm:$0xff] }
 0x198   : > { %v5157_v21 = vpop.f32.mrb[17].mxu0  ;;  %2369 = vmatprep.mubr.bf16.mxu1 %v926_v15  ;;  %v7341_v59 = vadd.f32 %v5267_v9, %v1796_v26  ;;  %v951_v15 = vld [vmem:[#allocation2 + $0x129] sm:$0xff]  ;;  %v952_v26 = vld [vmem:[#allocation2 + $0x141] sm:$0xff]  ;;  %v980_v40 = vpack.c.bf16 %v954_v39, %v953_v13  ;;  %v963_v13 = vld [vmem:[#allocation2 + $0x279] sm:$0xff] }
 0x199   : > { %v5158_v37 = vadd.f32 %v5157_v21, %v5156_v14  ;;  %v5159_v1 = vpop.f32.mrb[18].mxu0  ;;  %v964_v39 = vld [vmem:[#allocation2 + $0x291] sm:$0xff] }
 0x19a   : > { %v5268_v7 = vpop.f32.mrb[16].mxu1  ;;  %v5160_v61 = vpop.f32.mrb[19].mxu0 }
 0x19b   : > { %v1801_v30 = vadd.f32 %v5158_v37, %v7288_v23  ;;  %v5161_v10 = vadd.f32 %v5160_v61, %v5159_v1  ;;  %v5269_v3 = vpop.f32.mrb[17].mxu1  ;;  %v6306_v61 = vld [vmem:[#allocation9 + $0x50] sm:$0xff]  }
 0x19c   : > { %v5270_v2 = vadd.f32 %v5269_v3, %v5268_v7  ;;  %v5271_v32 = vpop.f32.mrb[18].mxu1  ;;  %2209 = vmatmul.mubr.bf16.gmra.mrb[124].mxu0 %v733_v24  ;;  %v979_v24 = vpack.c.bf16 %v952_v26, %v951_v15  ;;  %5592 = vmatprep.subr.bf16.mxu1 %v6306_v61 }
 0x19d   : > { %v1804_v20 = vadd.f32 %v5161_v10, %v7288_v23  ;;  %v5272_v52 = vpop.f32.mrb[19].mxu1  ;;  %6076 = vmatprep.mubr.bf16.mxu0 %v975_v53 }
 0x19e   : > { %v5273_v42 = vadd.f32 %v5272_v52, %v5271_v32  ;;  %v7346_v50 = vadd.f32 %v5270_v2, %v1801_v30  ;;  %v6307_v30 = vld [vmem:[#allocation9 + $0x10] sm:$0xff]   ;;  %v956_v32 = vld [vmem:[#allocation2 + $0x1a1] sm:$0xff] }
 0x19f   : > { %2370 = vmatmul.mubr.bf16.gmra.mrb[124].mxu1 %v862_v22  ;;  %v5162_v4 = vpop.f32.mrb[20].mxu0  ;;  %v955_v2 = vld [vmem:[#allocation2 + $0x189] sm:$0xff] }
 0x1a0   : > { %v5163_v57 = vpop.f32.mrb[21].mxu0  ;;  %v7348_v25 = vadd.f32 %v5273_v42, %v1804_v20  ;;  %5593 = vmatpush3.bf16.msra.mxu1 %v6307_v30 }
 0x1a1   : > { %v5164_v28 = vadd.f32 %v5163_v57, %v5162_v4  ;;  %v5165_v36 = vpop.f32.mrb[22].mxu0  ;;  %v981_v4 = vpack.c.bf16 %v956_v32, %v955_v2 }
 0x1a2   : > { %v5274_v55 = vpop.f32.mrb[20].mxu1  ;;  %v5166_v56 = vpop.f32.mrb[23].mxu0 }
 0x1a3   : > { %v1809_v58 = vadd.f32 %v5164_v28, %v7288_v23  ;;  %v5167_v11 = vadd.f32 %v5166_v56, %v5165_v36  ;;  %v5275_v46 = vpop.f32.mrb[21].mxu1 }
 0x1a4   : > { %v5276_v60 = vadd.f32 %v5275_v46, %v5274_v55  ;;  %v5277_v31 = vpop.f32.mrb[22].mxu1  ;;  %6077 = vmatmul.mubr.bf16.vlgmr.msra.gmra.mrb[128].mxu0 %v976_v48  ;;  %v958_v46 = vld [vmem:[#allocation2 + $0x1d1] sm:$0xff] }
 0x1a5   : > { %v1812_v45 = vadd.f32 %v5167_v11, %v7288_v23  ;;  %v5278_v6 = vpop.f32.mrb[23].mxu1  ;;  %6080 = vmatprep.mubr.bf16.mxu0 %v977_v27  ;;  %v982_v15 = vpack.c.bf16 %v958_v46, %v7243_v8  ;;  %v961_v8 = vld [vmem:[#allocation2 + $0x249] sm:$0xff] }
 0x1a6   : > { %v5279_v5 = vadd.f32 %v5278_v6, %v5277_v31  ;;  %v7352_v12 = vadd.f32 %v5276_v60, %v1809_v58  ;;  %v959_v31 = vld [vmem:[#allocation2 + $0x219] sm:$0xff] }
 0x1a7   : > { %v5168_v9 = vpop.f32.mrb[24].mxu0 }
 0x1a8   : > { %v5169_v29 = vpop.f32.mrb[25].mxu0  ;;  %v7355_v14 = vadd.f32 %v5279_v5, %v1812_v45  ;;  %v960_v45 = vld [vmem:[#allocation2 + $0x231] sm:$0xff] }
 0x1a9   : > { %v5170_v21 = vadd.f32 %v5169_v29, %v5168_v9  ;;  %v5171_v16 = vpop.f32.mrb[26].mxu0 }
 0x1aa   : > { %v5280_v47 = vpop.f32.mrb[24].mxu1  ;;  %v5172_v37 = vpop.f32.mrb[27].mxu0 }
 0x1ab   : > { %v1817_v1 = vadd.f32 %v5170_v21, %v7288_v23  ;;  %v5173_v53 = vadd.f32 %v5172_v37, %v5171_v16  ;;  %v5281_v7 = vpop.f32.mrb[25].mxu1 }
 0x1ac   : > { %v5282_v10 = vadd.f32 %v5281_v7, %v5280_v47  ;;  %v5283_v3 = vpop.f32.mrb[26].mxu1  ;;  %6081 = vmatmul.mubr.bf16.gmra.mrb[132].mxu0 %v978_v63  ;;  %v983_v63 = vpack.c.bf16 %v960_v45, %v959_v31  ;;  %v968_v31 = vld [vmem:[#allocation2 + $0x321] sm:$0xff] }
 0x1ad   : > { %v1820_v38 = vadd.f32 %v5173_v53, %v7288_v23  ;;  %v5284_v22 = vpop.f32.mrb[27].mxu1  ;;  %6084 = vmatprep.mubr.bf16.mxu0 %v979_v24  ;;  %v6309_v53 = vld [vmem:[#allocation9 + $0x18] sm:$0xff]  }
 0x1ae   : > { %v5285_v17 = vadd.f32 %v5284_v22, %v5283_v3  ;;  %v7359_v20 = vadd.f32 %v5282_v10, %v1817_v1  ;;  %v6308_v1 = vld [vmem:[#allocation9 + $0x58] sm:$0xff]   ;;  %v962_v3 = vld [vmem:[#allocation2 + $0x261] sm:$0xff] }
 0x1af   : > { %v5174_v52 = vpop.f32.mrb[28].mxu0  ;;  %5594 = vmatprep.subr.bf16.mxu1 %v6308_v1  ;;  %v6310_v1 = vld [vmem:[#allocation9 + $0x60] sm:$0xff]  }
 0x1b0   : > { %v5175_v33 = vpop.f32.mrb[29].mxu0  ;;  %v7361_v42 = vadd.f32 %v5285_v17, %v1820_v38  ;;  %5595 = vmatpush3.bf16.msra.mxu1 %v6309_v53  ;;  %v6311_v53 = vld [vmem:[#allocation9 + $0x20] sm:$0xff]  }
 0x1b1   : > { %v5176_v35 = vadd.f32 %v5175_v33, %v5174_v52  ;;  %v5177_v41 = vpop.f32.mrb[30].mxu0  ;;  %v984_v52 = vpack.c.bf16 %v962_v3, %v961_v8  ;;  %v969_v8 = vld [vmem:[#allocation2 + $0x339] sm:$0xff]  ;;  %5596 = vmatprep.subr.bf16.mxu1 %v6310_v1  ;;  %v6312_v1 = vld [vmem:[#allocation9 + $0x68] sm:$0xff]  }
 0x1b2   : > { %v5286_v57 = vpop.f32.mrb[28].mxu1  ;;  %v5178_v48 = vpop.f32.mrb[31].mxu0 }
 0x1b3   : > { %v1825_v28 = vadd.f32 %v5176_v35, %v7288_v23  ;;  %v5179_v36 = vadd.f32 %v5178_v48, %v5177_v41  ;;  %v5287_v27 = vpop.f32.mrb[29].mxu1  ;;  %v985_v35 = vpack.c.bf16 %v964_v39, %v963_v13  ;;  %v971_v13 = vld [vmem:[#allocation2 + $0x369] sm:$0xff]  ;;  %v972_v39 = vld [vmem:[#allocation2 + $0x381] sm:$0xff] }
 0x1b4   : > { %v5288_v55 = vadd.f32 %v5287_v27, %v5286_v57  ;;  %v5289_v56 = vpop.f32.mrb[30].mxu1  ;;  %6085 = vmatmul.mubr.bf16.gmra.mrb[136].mxu0 %v980_v40  ;;  %5597 = vmatpush3.bf16.msra.mxu1 %v6311_v53  ;;  %v6313_v53 = vld [vmem:[#allocation9 + $0x28] sm:$0xff]  }
 0x1b5   : > { %v1828_v58 = vadd.f32 %v5179_v36, %v7288_v23  ;;  %v5290_v11 = vpop.f32.mrb[31].mxu1  ;;  %6088 = vmatprep.mubr.bf16.mxu0 %v981_v4  ;;  %5598 = vmatprep.subr.bf16.mxu1 %v6312_v1 }
 0x1b6   : > { %v5291_v60 = vadd.f32 %v5290_v11, %v5289_v56  ;;  %v7365_v6 = vadd.f32 %v5288_v55, %v1825_v28 }
 0x1b7   : > { %v5180_v43 = vpop.f32.mrb[32].mxu0 }
 0x1b8   : > { %v5181_v5 = vpop.f32.mrb[33].mxu0  ;;  %v7368_v26 = vadd.f32 %v5291_v60, %v1828_v58  ;;  %v966_v58 = vld [vmem:[#allocation2 + $0x2c1] sm:$0xff]  ;;  %v967_v60 = vld [vmem:[#allocation2 + $0x309] sm:$0xff]  ;;  %5599 = vmatpush3.bf16.msra.mxu1 %v6313_v53 }
 0x1b9   : > { %v5182_v9 = vadd.f32 %v5181_v5, %v5180_v43  ;;  %v5183_v29 = vpop.f32.mrb[34].mxu0 }
 0x1ba   : > { %v5292_v21 = vpop.f32.mrb[32].mxu1  ;;  %v5184_v16 = vpop.f32.mrb[35].mxu0 }
 0x1bb   : > { %v1833_v24 = vadd.f32 %v5182_v9, %v7288_v23  ;;  %v5185_v47 = vadd.f32 %v5184_v16, %v5183_v29  ;;  %v5293_v37 = vpop.f32.mrb[33].mxu1 }
 0x1bc   : > { %v5294_v7 = vadd.f32 %v5293_v37, %v5292_v21  ;;  %v5295_v61 = vpop.f32.mrb[34].mxu1  ;;  %6089 = vmatmul.mubr.bf16.gmra.mrb[140].mxu0 %v982_v15  ;;  %v986_v15 = vpack.c.bf16 %v966_v58, %v7273_v34  ;;  %v970_v34 = vld [vmem:[#allocation2 + $0x351] sm:$0xff] }
 0x1bd   : > { %v1836_v30 = vadd.f32 %v5185_v47, %v7288_v23  ;;  %v5296_v10 = vpop.f32.mrb[35].mxu1  ;;  %6092 = vmatprep.mubr.bf16.mxu0 %v983_v63  ;;  %v987_v63 = vpack.c.bf16 %v968_v31, %v967_v60 }
 0x1be   : > { %v7372_v38 = vadd.f32 %v5294_v7, %v1833_v24  ;;  %v5297_v22 = vadd.f32 %v5296_v10, %v5295_v61 }
 0x1bf   : > { %v5186_v17 = vpop.f32.mrb[36].mxu0 }
 0x1c0   : > { %v7374_v2 = vadd.f32 %v5297_v22, %v1836_v30  ;;  %v5187_v32 = vpop.f32.mrb[37].mxu0 }
 0x1c1   : > { %v5188_v33 = vadd.f32 %v5187_v32, %v5186_v17  ;;  %v5189_v40 = vpop.f32.mrb[38].mxu0 }
 0x1c2   : > { %v5298_v41 = vpop.f32.mrb[36].mxu1  ;;  %v5190_v4 = vpop.f32.mrb[39].mxu0 }
 0x1c3   : > { %v1841_v57 = vadd.f32 %v5188_v33, %v7288_v23  ;;  %v5191_v48 = vadd.f32 %v5190_v4, %v5189_v40  ;;  %v5299_v28 = vpop.f32.mrb[37].mxu1  ;;  %v988_v33 = vpack.c.bf16 %v970_v34, %v969_v8 }
 0x1c4   : > { %v5300_v36 = vadd.f32 %v5299_v28, %v5298_v41  ;;  %v5301_v27 = vpop.f32.mrb[38].mxu1  ;;  %6093 = vmatmul.mubr.bf16.gmra.mrb[144].mxu0 %v984_v52  ;;  %v989_v41 = vpack.c.bf16 %v972_v39, %v971_v13 }
 0x1c5   : > { %v1844_v55 = vadd.f32 %v5191_v48, %v7288_v23  ;;  %v5302_v56 = vpop.f32.mrb[39].mxu1  ;;  %6096 = vmatprep.mubr.bf16.mxu0 %v985_v35 }
 0x1c6   : > { %v7378_v11 = vadd.f32 %v5300_v36, %v1841_v57  ;;  %v5303_v46 = vadd.f32 %v5302_v56, %v5301_v27 }
 0x1c7   : > { %v5192_v45 = vpop.f32.mrb[40].mxu0 }
 0x1c8   : > { %v7380_v43 = vadd.f32 %v5303_v46, %v1844_v55  ;;  %v5193_v5 = vpop.f32.mrb[41].mxu0  ;;  %v974_v46 = vld [vmem:[#allocation2 + $0x3b1] sm:$0xff] }
 0x1c9   : > { %v5194_v9 = vadd.f32 %v5193_v5, %v5192_v45  ;;  %v5195_v29 = vpop.f32.mrb[42].mxu0 }
 0x1ca   : > { %v5304_v21 = vpop.f32.mrb[40].mxu1  ;;  %v5196_v16 = vpop.f32.mrb[43].mxu0 }
 0x1cb   : > { %v1849_v24 = vadd.f32 %v5194_v9, %v7288_v23  ;;  %v5197_v47 = vadd.f32 %v5196_v16, %v5195_v29  ;;  %v5305_v37 = vpop.f32.mrb[41].mxu1  ;;  %v990_v9 = vpack.c.bf16 %v974_v46, %v7320_v44 }
 0x1cc   : > { %v5306_v7 = vadd.f32 %v5305_v37, %v5304_v21  ;;  %v5307_v61 = vpop.f32.mrb[42].mxu1  ;;  %6097 = vmatmul.mubr.bf16.gmra.mrb[148].mxu0 %v986_v15 }
 0x1cd   : > { %v1852_v30 = vadd.f32 %v5197_v47, %v7288_v23  ;;  %v5308_v10 = vpop.f32.mrb[43].mxu1  ;;  %6100 = vmatprep.mubr.bf16.mxu0 %v987_v63 }
 0x1ce   : > { %v7385_v3 = vadd.f32 %v5306_v7, %v1849_v24  ;;  %v5309_v22 = vadd.f32 %v5308_v10, %v5307_v61 }
 0x1cf   : > { %v5198_v17 = vpop.f32.mrb[44].mxu0 }
 0x1d0   : > { %v7387_v32 = vadd.f32 %v5309_v22, %v1852_v30  ;;  %v5199_v52 = vpop.f32.mrb[45].mxu0 }
 0x1d1   : > { %v5200_v40 = vadd.f32 %v5199_v52, %v5198_v17  ;;  %v5201_v35 = vpop.f32.mrb[46].mxu0 }
 0x1d2   : > { %v5310_v4 = vpop.f32.mrb[44].mxu1  ;;  %v5202_v57 = vpop.f32.mrb[47].mxu0 }
 0x1d3   : > { %v1857_v48 = vadd.f32 %v5200_v40, %v7288_v23  ;;  %v5203_v28 = vadd.f32 %v5202_v57, %v5201_v35  ;;  %v5311_v36 = vpop.f32.mrb[45].mxu1 }
 0x1d4   : > { %v5312_v27 = vadd.f32 %v5311_v36, %v5310_v4  ;;  %v5313_v55 = vpop.f32.mrb[46].mxu1  ;;  %6101 = vmatmul.mubr.bf16.gmra.mrb[152].mxu0 %v988_v33 }
 0x1d5   : > { %v1860_v56 = vadd.f32 %v5203_v28, %v7288_v23  ;;  %v5314_v58 = vpop.f32.mrb[47].mxu1  ;;  %6104 = vmatprep.mubr.bf16.mxu0 %v989_v41 }
 0x1d6   : > { %v7391_v60 = vadd.f32 %v5312_v27, %v1857_v48  ;;  %v5315_v31 = vadd.f32 %v5314_v58, %v5313_v55 }
 0x1d7   : > { %v5204_v45 = vpop.f32.mrb[48].mxu0 }
 0x1d8   : > { %v7393_v5 = vadd.f32 %v5315_v31, %v1860_v56  ;;  %v5205_v15 = vpop.f32.mrb[49].mxu0 }
 0x1d9   : > { %v5206_v29 = vadd.f32 %v5205_v15, %v5204_v45  ;;  %v5207_v63 = vpop.f32.mrb[50].mxu0  ;;  %v6316_v45 = vld [vmem:[#allocation9 + $0xc0] sm:$0xff]  }
 0x1da   : > { %v5316_v21 = vpop.f32.mrb[48].mxu1  ;;  %v5208_v16 = vpop.f32.mrb[51].mxu0  ;;  %5700 = vmatprep.subr.bf16.mxu0 %v6316_v45 }
 0x1db   : > { %v1865_v24 = vadd.f32 %v5206_v29, %v7288_v23  ;;  %v5209_v47 = vadd.f32 %v5208_v16, %v5207_v63  ;;  %v5317_v37 = vpop.f32.mrb[49].mxu1  ;;  %v6317_v29 = vld [vmem:[#allocation9 + $0x80] sm:$0xff]  }
 0x1dc   : > { %v5318_v7 = vadd.f32 %v5317_v37, %v5316_v21  ;;  %v5319_v61 = vpop.f32.mrb[50].mxu1  ;;  %6105 = vmatmul.mubr.bf16.gmra.mrb[156].mxu0 %v990_v9 }
 0x1dd   : > { %v1868_v30 = vadd.f32 %v5209_v47, %v7288_v23  ;;  %v5320_v10 = vpop.f32.mrb[51].mxu1  ;;  %v6315_v47 = vld [vmem:[#allocation9 + $0x30] sm:$0xff]   ;;  %5701 = vmatpush3.bf16.msra.mxu0 %v6317_v29 }
 0x1de   : > { %v7398_v8 = vadd.f32 %v5318_v7, %v1865_v24  ;;  %v5321_v44 = vadd.f32 %v5320_v10, %v5319_v61  ;;  %v6314_v24 = vld [vmem:[#allocation9 + $0x70] sm:$0xff]   ;;  %v6318_v61 = vld [vmem:[#allocation9 + $0xc8] sm:$0xff]  }
 0x1df   : > { %v5210_v34 = vpop.f32.mrb[52].mxu0  ;;  %5600 = vmatprep.subr.bf16.mxu1 %v6314_v24  ;;  %5702 = vmatprep.subr.bf16.mxu0 %v6318_v61  ;;  %v6326_v24 = vld [vmem:[#allocation9 + $0xe0] sm:$0xff]  }
 0x1e0   : > { %v7400_v22 = vadd.f32 %v5321_v44, %v1868_v30  ;;  %v5211_v13 = vpop.f32.mrb[53].mxu0  ;;  %5601 = vmatpush3.bf16.msra.mxu1 %v6315_v47  ;;  %v6319_v44 = vld [vmem:[#allocation9 + $0x88] sm:$0xff]  }
 0x1e1   : > { %v5212_v39 = vadd.f32 %v5211_v13, %v5210_v34  ;;  %v5213_v17 = vpop.f32.mrb[54].mxu0  ;;  %5703 = vmatpush3.bf16.msra.mxu0 %v6319_v44 }
 0x1e2   : > { %v5322_v52 = vpop.f32.mrb[52].mxu1  ;;  %v5214_v33 = vpop.f32.mrb[55].mxu0 }
 0x1e3   : > { %v1873_v40 = vadd.f32 %v5212_v39, %v7288_v23  ;;  %v5215_v35 = vadd.f32 %v5214_v33, %v5213_v17  ;;  %v5323_v41 = vpop.f32.mrb[53].mxu1  ;;  %v6320_v33 = vld [vmem:[#allocation9 + $0xd0] sm:$0xff]  }
 0x1e4   : > { %v5324_v4 = vadd.f32 %v5323_v41, %v5322_v52  ;;  %v5325_v57 = vpop.f32.mrb[54].mxu1  ;;  %v6321_v41 = vld [vmem:[#allocation9 + $0x90] sm:$0xff]   ;;  %5704 = vmatprep.subr.bf16.mxu0 %v6320_v33 }
 0x1e5   : > { %v1876_v48 = vadd.f32 %v5215_v35, %v7288_v23  ;;  %v5326_v28 = vpop.f32.mrb[55].mxu1  ;;  %5705 = vmatpush3.bf16.msra.mxu0 %v6321_v41 }
 0x1e6   : > { %v7404_v36 = vadd.f32 %v5324_v4, %v1873_v40  ;;  %v5327_v27 = vadd.f32 %v5326_v28, %v5325_v57 }
 0x1e7   : > { %v5216_v55 = vpop.f32.mrb[56].mxu0 }
 0x1e8   : > { %v7406_v56 = vadd.f32 %v5327_v27, %v1876_v48  ;;  %v5217_v58 = vpop.f32.mrb[57].mxu0 }
 0x1e9   : > { %v5218_v46 = vadd.f32 %v5217_v58, %v5216_v55  ;;  %v5219_v31 = vpop.f32.mrb[58].mxu0 }
 0x1ea   : > { %v5328_v15 = vpop.f32.mrb[56].mxu1  ;;  %v5220_v9 = vpop.f32.mrb[59].mxu0 }
 0x1eb   : > { %v1881_v63 = vadd.f32 %v5218_v46, %v7288_v23  ;;  %v5221_v21 = vadd.f32 %v5220_v9, %v5219_v31  ;;  %v5329_v16 = vpop.f32.mrb[57].mxu1  ;;  %v6322_v46 = vld [vmem:[#allocation9 + $0xd8] sm:$0xff]  }
 0x1ec   : > { %v5330_v37 = vadd.f32 %v5329_v16, %v5328_v15  ;;  %v5331_v1 = vpop.f32.mrb[58].mxu1  ;;  %v6323_v15 = vld [vmem:[#allocation9 + $0x98] sm:$0xff]   ;;  %5706 = vmatprep.subr.bf16.mxu0 %v6322_v46 }
 0x1ed   : > { %v1884_v53 = vadd.f32 %v5221_v21, %v7288_v23  ;;  %v5332_v7 = vpop.f32.mrb[59].mxu1  ;;  %5707 = vmatpush3.bf16.msra.mxu0 %v6323_v15 }
 0x1ee   : > { %v7410_v30 = vadd.f32 %v5330_v37, %v1881_v63  ;;  %v5333_v10 = vadd.f32 %v5332_v7, %v5331_v1  ;;  %v6327_v1 = vld [vmem:[#allocation9 + $0xa0] sm:$0xff]   ;;  %5708 = vmatprep.subr.bf16.mxu0 %v6326_v24 }
 0x1ef   : > { %v5222_v34 = vpop.f32.mrb[60].mxu0 }
 0x1f0   : > { %v7412_v13 = vadd.f32 %v5333_v10, %v1884_v53  ;;  %v5223_v39 = vpop.f32.mrb[61].mxu0 }
 0x1f1   : > { %v5224_v17 = vadd.f32 %v5223_v39, %v5222_v34  ;;  %v5225_v52 = vpop.f32.mrb[62].mxu0  ;;  %5709 = vmatpush3.bf16.msra.mxu0 %v6327_v1  ;;  %v6324_v39 = vld [vmem:[#allocation9 + $0x78] sm:$0xff]  }
 0x1f2   : > { %v5334_v40 = vpop.f32.mrb[60].mxu1  ;;  %v5226_v35 = vpop.f32.mrb[63].mxu0  ;;  %5602 = vmatprep.subr.bf16.mxu1 %v6324_v39 }
 0x1f3   : > { %v1889_v4 = vadd.f32 %v5224_v17, %v7288_v23  ;;  %v5227_v57 = vadd.f32 %v5226_v35, %v5225_v52  ;;  %v5335_v48 = vpop.f32.mrb[61].mxu1  ;;  %v6328_v17 = vld [vmem:[#allocation9 + $0xe8] sm:$0xff]  }
 0x1f4   : > { %v5336_v28 = vadd.f32 %v5335_v48, %v5334_v40  ;;  %v5337_v27 = vpop.f32.mrb[62].mxu1  ;;  %v6325_v40 = vld [vmem:[#allocation9 + $0x38] sm:$0xff]   ;;  %v6329_v35 = vld [vmem:[#allocation9 + $0xa8] sm:$0xff]   ;;  %5710 = vmatprep.subr.bf16.mxu0 %v6328_v17 }
 0x1f5   : > { %v1892_v55 = vadd.f32 %v5227_v57, %v7288_v23  ;;  %v5338_v58 = vpop.f32.mrb[63].mxu1  ;;  %5603 = vmatpush3.bf16.msra.mxu1 %v6325_v40  ;;  %5711 = vmatpush3.bf16.msra.mxu0 %v6329_v35  ;;  %v6334_v35 = vld [vmem:[#allocation9 + $0x140] sm:$0xff]  }
 0x1f6   : > { %v7416_v31 = vadd.f32 %v5336_v28, %v1889_v4  ;;  %v5339_v45 = vadd.f32 %v5338_v58, %v5337_v27  ;;  %v6330_v28 = vld [vmem:[#allocation9 + $0xf0] sm:$0xff]   ;;  %5812 = vmatprep.subr.bf16.mxu1 %v6334_v35 }
 0x1f7   : > { %v5356_v9 = vpop.f32.mrb[64].mxu0  ;;  %5712 = vmatprep.subr.bf16.mxu0 %v6330_v28 }
 0x1f8   : > { %v7418_v29 = vadd.f32 %v5339_v45, %v1892_v55  ;;  %v5357_v63 = vpop.f32.mrb[65].mxu0  ;;  %v6331_v55 = vld [vmem:[#allocation9 + $0xb0] sm:$0xff]  }
 0x1f9   : > { %v5358_v21 = vadd.f32 %v5357_v63, %v5356_v9  ;;  %v5359_v16 = vpop.f32.mrb[66].mxu0  ;;  %5713 = vmatpush3.bf16.msra.mxu0 %v6331_v55 }
 0x1fa   : > { %v5468_v47 = vpop.f32.mrb[64].mxu1  ;;  %v5360_v37 = vpop.f32.mrb[67].mxu0 }
 0x1fb   : > { %v2091_v23 = vadd.f32 %v5358_v21, %v7298_v49  ;;  %v5361_v53 = vadd.f32 %v5360_v37, %v5359_v16  ;;  %v5469_v7 = vpop.f32.mrb[65].mxu1  ;;  %v6332_v16 = vld [vmem:[#allocation9 + $0xf8] sm:$0xff]  }
 0x1fc   : > { %v5470_v61 = vadd.f32 %v5469_v7, %v5468_v47  ;;  %v5471_v10 = vpop.f32.mrb[66].mxu1  ;;  %v6333_v37 = vld [vmem:[#allocation9 + $0xb8] sm:$0xff]   ;;  %5714 = vmatprep.subr.bf16.mxu0 %v6332_v16 }
 0x1fd   : > { %v2094_v44 = vadd.f32 %v5361_v53, %v7302_v54  ;;  %v5472_v34 = vpop.f32.mrb[67].mxu1  ;;  %5715 = vmatpush3.bf16.msra.mxu0 %v6333_v37 }
 0x1fe   : > { %v5473_v52 = vadd.f32 %v5472_v34, %v5471_v10  ;;  %v7422_v33 = vadd.f32 %v5470_v61, %v2091_v23 }
 0x1ff   : > { %v5362_v41 = vpop.f32.mrb[68].mxu0 }
 0x200   : > { %v5363_v49 = vpop.f32.mrb[69].mxu0  ;;  %v7424_v4 = vadd.f32 %v5473_v52, %v2094_v44 }
 0x201   : > { %v5364_v57 = vadd.f32 %v5363_v49, %v5362_v41  ;;  %v5365_v48 = vpop.f32.mrb[70].mxu0 }
 0x202   : > { %v5474_v54 = vpop.f32.mrb[68].mxu1  ;;  %v5366_v27 = vpop.f32.mrb[71].mxu0 }
 0x203   : > { %v2099_v58 = vadd.f32 %v5364_v57, %v7308_v0  ;;  %v5367_v46 = vadd.f32 %v5366_v27, %v5365_v48  ;;  %v5475_v45 = vpop.f32.mrb[69].mxu1 }
 0x204   : > { %v5476_v15 = vadd.f32 %v5475_v45, %v5474_v54  ;;  %v5477_v9 = vpop.f32.mrb[70].mxu1 }
 0x205   : > { %v2102_v63 = vadd.f32 %v5367_v46, %v7314_v62  ;;  %v5478_v21 = vpop.f32.mrb[71].mxu1 }
 0x206   : > { %v5479_v24 = vadd.f32 %v5478_v21, %v5477_v9  ;;  %v7428_v47 = vadd.f32 %v5476_v15, %v2099_v58 }
 0x207   : > { %v5368_v1 = vpop.f32.mrb[72].mxu0 }
 0x208   : > { %v5369_v23 = vpop.f32.mrb[73].mxu0  ;;  %v7430_v53 = vadd.f32 %v5479_v24, %v2102_v63 }
 0x209   : > { %v5370_v0 = vadd.f32 %v5369_v23, %v5368_v1  ;;  %v5371_v7 = vpop.f32.mrb[74].mxu0 }
 0x20a   : > { %v5480_v61 = vpop.f32.mrb[72].mxu1  ;;  %v5372_v10 = vpop.f32.mrb[75].mxu0 }
 0x20b   : > { %v2107_v44 = vadd.f32 %v5370_v0, %v7322_v18  ;;  %v5373_v34 = vadd.f32 %v5372_v10, %v5371_v7  ;;  %v5481_v62 = vpop.f32.mrb[73].mxu1 }
 0x20c   : > { %v5482_v39 = vadd.f32 %v5481_v62, %v5480_v61  ;;  %v5483_v17 = vpop.f32.mrb[74].mxu1 }
 0x20d   : > { %v2110_v52 = vadd.f32 %v5373_v34, %v7328_v51  ;;  %v5484_v40 = vpop.f32.mrb[75].mxu1 }
 0x20e   : > { %v5485_v41 = vadd.f32 %v5484_v40, %v5483_v17  ;;  %v7434_v49 = vadd.f32 %v5482_v39, %v2107_v44 }
 0x20f   : > { %v5374_v57 = vpop.f32.mrb[76].mxu0 }
 0x210   : > { %v5375_v48 = vpop.f32.mrb[77].mxu0  ;;  %v7436_v28 = vadd.f32 %v5485_v41, %v2110_v52 }
 0x211   : > { %v5376_v54 = vadd.f32 %v5375_v48, %v5374_v57  ;;  %v5377_v27 = vpop.f32.mrb[78].mxu0 }
 0x212   : > { %v5486_v55 = vpop.f32.mrb[76].mxu1  ;;  %v5378_v18 = vpop.f32.mrb[79].mxu0 }
 0x213   : > { %v2115_v58 = vadd.f32 %v5376_v54, %v7336_v19  ;;  %v5379_v46 = vadd.f32 %v5378_v18, %v5377_v27  ;;  %v5487_v45 = vpop.f32.mrb[77].mxu1 }
 0x214   : > { %v5488_v15 = vadd.f32 %v5487_v45, %v5486_v55  ;;  %v5489_v51 = vpop.f32.mrb[78].mxu1 }
 0x215   : > { %v2118_v9 = vadd.f32 %v5379_v46, %v7341_v59  ;;  %v5490_v63 = vpop.f32.mrb[79].mxu1 }
 0x216   : > { %v5491_v21 = vadd.f32 %v5490_v63, %v5489_v51  ;;  %v7440_v16 = vadd.f32 %v5488_v15, %v2115_v58 }
 0x217   : > { %v5380_v24 = vpop.f32.mrb[80].mxu0 }
 0x218   : > { %v5381_v37 = vpop.f32.mrb[81].mxu0  ;;  %v7442_v1 = vadd.f32 %v5491_v21, %v2118_v9 }
 0x219   : > { %v5382_v23 = vadd.f32 %v5381_v37, %v5380_v24  ;;  %v5383_v0 = vpop.f32.mrb[82].mxu0 }
 0x21a   : > { %v5492_v7 = vpop.f32.mrb[80].mxu1  ;;  %v5384_v61 = vpop.f32.mrb[83].mxu0 }
 0x21b   : > { %v2123_v19 = vadd.f32 %v5382_v23, %v7346_v50  ;;  %v5385_v10 = vadd.f32 %v5384_v61, %v5383_v0  ;;  %v5493_v44 = vpop.f32.mrb[81].mxu1 }
 0x21c   : > { %v5494_v34 = vadd.f32 %v5493_v44, %v5492_v7  ;;  %v5495_v62 = vpop.f32.mrb[82].mxu1 }
 0x21d   : > { %v2126_v59 = vadd.f32 %v5385_v10, %v7348_v25  ;;  %v5496_v39 = vpop.f32.mrb[83].mxu1 }
 0x21e   : > { %v5497_v17 = vadd.f32 %v5496_v39, %v5495_v62  ;;  %v7446_v52 = vadd.f32 %v5494_v34, %v2123_v19 }
 0x21f   : > { %v5386_v40 = vpop.f32.mrb[84].mxu0 }
 0x220   : > { %v5387_v35 = vpop.f32.mrb[85].mxu0  ;;  %v7448_v41 = vadd.f32 %v5497_v17, %v2126_v59 }
 0x221   : > { %v5388_v57 = vadd.f32 %v5387_v35, %v5386_v40  ;;  %v5389_v48 = vpop.f32.mrb[86].mxu0 }
 0x222   : > { %v5498_v54 = vpop.f32.mrb[84].mxu1  ;;  %v5390_v27 = vpop.f32.mrb[87].mxu0 }
 0x223   : > { %v2131_v50 = vadd.f32 %v5388_v57, %v7352_v12  ;;  %v5391_v55 = vadd.f32 %v5390_v27, %v5389_v48  ;;  %v5499_v18 = vpop.f32.mrb[85].mxu1 }
 0x224   : > { %v5500_v58 = vadd.f32 %v5499_v18, %v5498_v54  ;;  %v5501_v46 = vpop.f32.mrb[86].mxu1 }
 0x225   : > { %v2134_v25 = vadd.f32 %v5391_v55, %v7355_v14  ;;  %v5502_v45 = vpop.f32.mrb[87].mxu1 }
 0x226   : > { %v5503_v15 = vadd.f32 %v5502_v45, %v5501_v46  ;;  %v7452_v51 = vadd.f32 %v5500_v58, %v2131_v50 }
 0x227   : > { %v5392_v9 = vpop.f32.mrb[88].mxu0 }
 0x228   : > { %v5393_v63 = vpop.f32.mrb[89].mxu0  ;;  %v7454_v21 = vadd.f32 %v5503_v15, %v2134_v25 }
 0x229   : > { %v5394_v24 = vadd.f32 %v5393_v63, %v5392_v9  ;;  %v5395_v37 = vpop.f32.mrb[90].mxu0 }
 0x22a   : > { %v5504_v23 = vpop.f32.mrb[88].mxu1  ;;  %v5396_v0 = vpop.f32.mrb[91].mxu0 }
 0x22b   : > { %v2139_v12 = vadd.f32 %v5394_v24, %v7359_v20  ;;  %v5397_v7 = vadd.f32 %v5396_v0, %v5395_v37  ;;  %v5505_v61 = vpop.f32.mrb[89].mxu1 }
 0x22c   : > { %v5506_v19 = vadd.f32 %v5505_v61, %v5504_v23  ;;  %v5507_v10 = vpop.f32.mrb[90].mxu1 }
 0x22d   : > { %v2142_v14 = vadd.f32 %v5397_v7, %v7361_v42  ;;  %v5508_v44 = vpop.f32.mrb[91].mxu1 }
 0x22e   : > { %v5509_v34 = vadd.f32 %v5508_v44, %v5507_v10  ;;  %v7458_v62 = vadd.f32 %v5506_v19, %v2139_v12 }
 0x22f   : > { %v5398_v59 = vpop.f32.mrb[92].mxu0 }
 0x230   : > { %v5399_v39 = vpop.f32.mrb[93].mxu0  ;;  %v7460_v17 = vadd.f32 %v5509_v34, %v2142_v14 }
 0x231   : > { %v5400_v40 = vadd.f32 %v5399_v39, %v5398_v59  ;;  %v5401_v35 = vpop.f32.mrb[94].mxu0 }
 0x232   : > { %v5510_v57 = vpop.f32.mrb[92].mxu1  ;;  %v5402_v48 = vpop.f32.mrb[95].mxu0 }
 0x233   : > { %v2147_v20 = vadd.f32 %v5400_v40, %v7365_v6  ;;  %v5403_v54 = vadd.f32 %v5402_v48, %v5401_v35  ;;  %v5511_v27 = vpop.f32.mrb[93].mxu1 }
 0x234   : > { %v5512_v50 = vadd.f32 %v5511_v27, %v5510_v57  ;;  %v5513_v55 = vpop.f32.mrb[94].mxu1 }
 0x235   : > { %v2150_v42 = vadd.f32 %v5403_v54, %v7368_v26  ;;  %v5514_v18 = vpop.f32.mrb[95].mxu1 }
 0x236   : > { %v5515_v58 = vadd.f32 %v5514_v18, %v5513_v55  ;;  %v7464_v46 = vadd.f32 %v5512_v50, %v2147_v20  ;;  %v6342_v20 = vld [vmem:[#allocation9 + $0x1c0] sm:$0xff]  }
 0x237   : > { %v5404_v25 = vpop.f32.mrb[96].mxu0  ;;  %5924 = vmatprep.subr.bf16.mxu0 %v6342_v20 }
 0x238   : > { %v5405_v45 = vpop.f32.mrb[97].mxu0  ;;  %v7466_v15 = vadd.f32 %v5515_v58, %v2150_v42 }
 0x239   : > { %v5406_v9 = vadd.f32 %v5405_v45, %v5404_v25  ;;  %v5407_v63 = vpop.f32.mrb[98].mxu0 }
 0x23a   : > { %v5516_v24 = vpop.f32.mrb[96].mxu1  ;;  %v5408_v37 = vpop.f32.mrb[99].mxu0 }
 0x23b   : > { %v2155_v6 = vadd.f32 %v5406_v9, %v7372_v38  ;;  %v5409_v23 = vadd.f32 %v5408_v37, %v5407_v63  ;;  %v5517_v0 = vpop.f32.mrb[97].mxu1 }
 0x23c   : > { %v5518_v12 = vadd.f32 %v5517_v0, %v5516_v24  ;;  %v5519_v7 = vpop.f32.mrb[98].mxu1 }
 0x23d   : > { %v2158_v26 = vadd.f32 %v5409_v23, %v7374_v2  ;;  %v5520_v61 = vpop.f32.mrb[99].mxu1 }
 0x23e   : > { %v5521_v19 = vadd.f32 %v5520_v61, %v5519_v7  ;;  %v7470_v10 = vadd.f32 %v5518_v12, %v2155_v6 }
 0x23f   : > { %v5410_v14 = vpop.f32.mrb[100].mxu0 }
 0x240   : > { %v5411_v44 = vpop.f32.mrb[101].mxu0  ;;  %v7472_v34 = vadd.f32 %v5521_v19, %v2158_v26 }
 0x241   : > { %v5412_v59 = vadd.f32 %v5411_v44, %v5410_v14  ;;  %v5413_v39 = vpop.f32.mrb[102].mxu0 }
 0x242   : > { %v5522_v40 = vpop.f32.mrb[100].mxu1  ;;  %v5414_v35 = vpop.f32.mrb[103].mxu0 }
 0x243   : > { %v2163_v38 = vadd.f32 %v5412_v59, %v7378_v11  ;;  %v5415_v57 = vadd.f32 %v5414_v35, %v5413_v39  ;;  %v5523_v48 = vpop.f32.mrb[101].mxu1 }
 0x244   : > { %v5524_v54 = vadd.f32 %v5523_v48, %v5522_v40  ;;  %v5525_v27 = vpop.f32.mrb[102].mxu1 }
 0x245   : > { %v2166_v2 = vadd.f32 %v5415_v57, %v7380_v43  ;;  %v5526_v50 = vpop.f32.mrb[103].mxu1 }
 0x246   : > { %v5527_v55 = vadd.f32 %v5526_v50, %v5525_v27  ;;  %v7476_v42 = vadd.f32 %v5524_v54, %v2163_v38 }
 0x247   : > { %v5416_v18 = vpop.f32.mrb[104].mxu0 }
 0x248   : > { %v5417_v58 = vpop.f32.mrb[105].mxu0  ;;  %v7478_v25 = vadd.f32 %v5527_v55, %v2166_v2 }
 0x249   : > { %v5418_v45 = vadd.f32 %v5417_v58, %v5416_v18  ;;  %v5419_v9 = vpop.f32.mrb[106].mxu0 }
 0x24a   : > { %v5528_v63 = vpop.f32.mrb[104].mxu1  ;;  %v5420_v11 = vpop.f32.mrb[107].mxu0 }
 0x24b   : > { %v2171_v24 = vadd.f32 %v5418_v45, %v7385_v3  ;;  %v5421_v37 = vadd.f32 %v5420_v11, %v5419_v9  ;;  %v5529_v6 = vpop.f32.mrb[105].mxu1 }
 0x24c   : > { %v5530_v23 = vadd.f32 %v5529_v6, %v5528_v63  ;;  %v5531_v0 = vpop.f32.mrb[106].mxu1 }
 0x24d   : > { %v2174_v43 = vadd.f32 %v5421_v37, %v7387_v32  ;;  %v5532_v12 = vpop.f32.mrb[107].mxu1 }
 0x24e   : > { %v5533_v7 = vadd.f32 %v5532_v12, %v5531_v0  ;;  %v7482_v26 = vadd.f32 %v5530_v23, %v2171_v24 }
 0x24f   : > { %v5422_v61 = vpop.f32.mrb[108].mxu0 }
 0x250   : > { %v5423_v19 = vpop.f32.mrb[109].mxu0  ;;  %v7484_v14 = vadd.f32 %v5533_v7, %v2174_v43 }
 0x251   : > { %v5424_v44 = vadd.f32 %v5423_v19, %v5422_v61  ;;  %v5425_v59 = vpop.f32.mrb[110].mxu0 }
 0x252   : > { %v5534_v39 = vpop.f32.mrb[108].mxu1  ;;  %v5426_v40 = vpop.f32.mrb[111].mxu0 }
 0x253   : > { %v2179_v3 = vadd.f32 %v5424_v44, %v7391_v60  ;;  %v5427_v35 = vadd.f32 %v5426_v40, %v5425_v59  ;;  %v5535_v38 = vpop.f32.mrb[109].mxu1 }
 0x254   : > { %v5536_v57 = vadd.f32 %v5535_v38, %v5534_v39  ;;  %v5537_v48 = vpop.f32.mrb[110].mxu1 }
 0x255   : > { %v2182_v32 = vadd.f32 %v5427_v35, %v7393_v5  ;;  %v5538_v20 = vpop.f32.mrb[111].mxu1 }
 0x256   : > { %v5539_v54 = vadd.f32 %v5538_v20, %v5537_v48  ;;  %v7488_v27 = vadd.f32 %v5536_v57, %v2179_v3 }
 0x257   : > { %v5428_v2 = vpop.f32.mrb[112].mxu0 }
 0x258   : > { %v5429_v50 = vpop.f32.mrb[113].mxu0  ;;  %v7490_v55 = vadd.f32 %v5539_v54, %v2182_v32 }
 0x259   : > { %v5430_v18 = vadd.f32 %v5429_v50, %v5428_v2  ;;  %v5431_v58 = vpop.f32.mrb[114].mxu0 }
 0x25a   : > { %v5540_v45 = vpop.f32.mrb[112].mxu1  ;;  %v5432_v9 = vpop.f32.mrb[115].mxu0 }
 0x25b   : > { %v2187_v60 = vadd.f32 %v5430_v18, %v7398_v8  ;;  %v5433_v63 = vadd.f32 %v5432_v9, %v5431_v58  ;;  %v5541_v11 = vpop.f32.mrb[113].mxu1 }
 0x25c   : > { %v5542_v24 = vadd.f32 %v5541_v11, %v5540_v45  ;;  %v5543_v37 = vpop.f32.mrb[114].mxu1 }
 0x25d   : > { %v2190_v5 = vadd.f32 %v5433_v63, %v7400_v22  ;;  %v5544_v6 = vpop.f32.mrb[115].mxu1 }
 0x25e   : > { %v5545_v23 = vadd.f32 %v5544_v6, %v5543_v37  ;;  %v7494_v0 = vadd.f32 %v5542_v24, %v2187_v60 }
 0x25f   : > { %v5434_v43 = vpop.f32.mrb[116].mxu0 }
 0x260   : > { %v5435_v12 = vpop.f32.mrb[117].mxu0  ;;  %v7496_v7 = vadd.f32 %v5545_v23, %v2190_v5 }
 0x261   : > { %v5436_v61 = vadd.f32 %v5435_v12, %v5434_v43  ;;  %v5437_v19 = vpop.f32.mrb[118].mxu0 }
 0x262   : > { %v5546_v44 = vpop.f32.mrb[116].mxu1  ;;  %v5438_v59 = vpop.f32.mrb[119].mxu0 }
 0x263   : > { %v2195_v8 = vadd.f32 %v5436_v61, %v7404_v36  ;;  %v5439_v39 = vadd.f32 %v5438_v59, %v5437_v19  ;;  %v5547_v40 = vpop.f32.mrb[117].mxu1 }
 0x264   : > { %v5548_v3 = vadd.f32 %v5547_v40, %v5546_v44  ;;  %v5549_v35 = vpop.f32.mrb[118].mxu1 }
 0x265   : > { %v2198_v22 = vadd.f32 %v5439_v39, %v7406_v56  ;;  %v5550_v38 = vpop.f32.mrb[119].mxu1 }
 0x266   : > { %v5551_v57 = vadd.f32 %v5550_v38, %v5549_v35  ;;  %v7500_v48 = vadd.f32 %v5548_v3, %v2195_v8 }
 0x267   : > { %v5440_v32 = vpop.f32.mrb[120].mxu0 }
 0x268   : > { %v5441_v20 = vpop.f32.mrb[121].mxu0  ;;  %v7502_v54 = vadd.f32 %v5551_v57, %v2198_v22 }
 0x269   : > { %v5442_v2 = vadd.f32 %v5441_v20, %v5440_v32  ;;  %v5443_v50 = vpop.f32.mrb[122].mxu0 }
 0x26a   : > { %v5552_v18 = vpop.f32.mrb[120].mxu1  ;;  %v5444_v58 = vpop.f32.mrb[123].mxu0 }
 0x26b   : > { %v2203_v36 = vadd.f32 %v5442_v2, %v7410_v30  ;;  %v5445_v45 = vadd.f32 %v5444_v58, %v5443_v50  ;;  %v5553_v9 = vpop.f32.mrb[121].mxu1 }
 0x26c   : > { %v5554_v60 = vadd.f32 %v5553_v9, %v5552_v18  ;;  %v5555_v63 = vpop.f32.mrb[122].mxu1  ;;  %v7520_v9 = vld [vmem:[#allocation2 + $0x8] sm:$0xff] }
 0x26d   : > { %v2206_v56 = vadd.f32 %v5445_v45, %v7412_v13  ;;  %v5556_v11 = vpop.f32.mrb[123].mxu1 }
 0x26e   : > { %v5557_v24 = vadd.f32 %v5556_v11, %v5555_v63  ;;  %v7506_v37 = vadd.f32 %v5554_v60, %v2203_v36 }
 0x26f   : > { %v5446_v5 = vpop.f32.mrb[124].mxu0 }
 0x270   : > { %v5447_v6 = vpop.f32.mrb[125].mxu0  ;;  %v7508_v23 = vadd.f32 %v5557_v24, %v2206_v56 }
 0x271   : > { %v5448_v43 = vadd.f32 %v5447_v6, %v5446_v5  ;;  %v5449_v12 = vpop.f32.mrb[126].mxu0  ;;  %v2603_v6 = vld [vmem:[#allocation2 + $0x7] sm:$0xff] }
 0x272   : > { %v5558_v61 = vpop.f32.mrb[124].mxu1  ;;  %v5450_v19 = vpop.f32.mrb[127].mxu0 }
 0x273   : > { %v2211_v30 = vadd.f32 %v5448_v43, %v7416_v31  ;;  %v5451_v44 = vadd.f32 %v5450_v19, %v5449_v12  ;;  %v5559_v59 = vpop.f32.mrb[125].mxu1 }
 0x274   : > { %v5560_v8 = vadd.f32 %v5559_v59, %v5558_v61  ;;  %v5561_v39 = vpop.f32.mrb[126].mxu1  ;;  %v2731_v61 = vld [vmem:[#allocation2 + $0x9] sm:$0xff] }
 0x275   : > { %v2214_v13 = vadd.f32 %v5451_v44, %v7418_v29  ;;  %v5562_v40 = vpop.f32.mrb[127].mxu1  ;;  %v6335_v44 = vld [vmem:[#allocation9 + $0x100] sm:$0xff]   ;;  %v6336_v59 = vld [vmem:[#allocation9 + $0x148] sm:$0xff]  }
 0x276   : > { %v5563_v3 = vadd.f32 %v5562_v40, %v5561_v39  ;;  %v7512_v35 = vadd.f32 %v5560_v8, %v2211_v30 }
 0x277   : > { %v6078_v22 = vpop.f32.mrb[128].mxu0 }
 0x278   : > { %v2421_v38 = vadd.f32 %v6078_v22, %v7428_v47  ;;  %v2412_v57 = vpop.f32.mrb[129].mxu0  ;;  %v7515_v32 = vadd.f32 %v5563_v3, %v2214_v13 }
 0x279   : > { %v2413_v20 = vadd.f32 %v2412_v57, %v7422_v33  ;;  %v6079_v2 = vpop.f32.mrb[130].mxu0 }
 0x27a   : > { %v2541_v31 = vmax.f32 %v2421_v38, 0.0  ;;  %v2424_v50 = vadd.f32 %v6079_v2, %v7430_v53  ;;  %v2415_v18 = vpop.f32.mrb[131].mxu0  ;;  %v6343_v2 = vld [vmem:[#allocation9 + $0x180] sm:$0xff]  }
 0x27b   : > { %v2539_v58 = vmax.f32 %v2413_v20, 0.0  ;;  %v2416_v29 = vadd.f32 %v2415_v18, %v7424_v4 }
 0x27c   : > { %2573 = vst [vmem:[#allocation2 + $0x50] sm:$0xff] %v2541_v31  ;;  %v2542_v36 = vmax.f32 %v2424_v50, 0.0 }
 0x27d   : > { %2571 = vst [vmem:[#allocation2 + $0x20] sm:$0xff] %v2539_v58  ;;  %v2540_v45 = vmax.f32 %v2416_v29, 0.0  ;;  %v2699_v47 = vpack.c.bf16 %v2539_v58, %v7520_v9  ;;  %v6337_v29 = vld [vmem:[#allocation9 + $0x108] sm:$0xff]  }
 0x27e   : > { %2574 = vst [vmem:[#allocation2 + $0x68] sm:$0xff] %v2542_v36 }
 0x27f   : > { %2572 = vst [vmem:[#allocation2 + $0x38] sm:$0xff] %v2540_v45  ;;  %v6082_v60 = vpop.f32.mrb[132].mxu0  ;;  %3938 = vmatprep.mubr.bf16.mxu1 %v2699_v47  ;;  %v2700_v33 = vpack.c.bf16 %v2541_v31, %v2540_v45 }
 0x280   : > { %v2437_v63 = vadd.f32 %v6082_v60, %v7440_v16  ;;  %v2428_v53 = vpop.f32.mrb[133].mxu0 }
 0x281   : > { %v2429_v56 = vadd.f32 %v2428_v53, %v7434_v49  ;;  %v6083_v11 = vpop.f32.mrb[134].mxu0 }
 0x282   : > { %v2545_v4 = vmax.f32 %v2437_v63, 0.0  ;;  %v2440_v24 = vadd.f32 %v6083_v11, %v7442_v1  ;;  %v2431_v5 = vpop.f32.mrb[135].mxu0 }
 0x283   : > { %v2543_v43 = vmax.f32 %v2429_v56, 0.0  ;;  %v2432_v12 = vadd.f32 %v2431_v5, %v7436_v28  ;;  %v7529_v13 = vld [vmem:[#allocation2 + $0x51] sm:$0xff] }
 0x284   : > { %2577 = vst [vmem:[#allocation2 + $0xb0] sm:$0xff] %v2545_v4  ;;  %v2546_v19 = vmax.f32 %v2440_v24, 0.0  ;;  %v2604_v30 = vld [vmem:[#allocation2 + $0x1f] sm:$0xff]  ;;  %v2797_v58 = vld [vmem:[#allocation2 + $0x4f] sm:$0xff] }
 0x285   : > { %2575 = vst [vmem:[#allocation2 + $0x80] sm:$0xff] %v2543_v43  ;;  %v2544_v16 = vmax.f32 %v2432_v12, 0.0  ;;  %v2635_v8 = vpack.c.bf16 %v2604_v30, %v2603_v6  ;;  %v7527_v39 = vld [vmem:[#allocation2 + $0x21] sm:$0xff]  ;;  %v2701_v49 = vpack.c.bf16 %v2543_v43, %v2542_v36  ;;  %v7531_v1 = vld [vmem:[#allocation2 + $0x69] sm:$0xff] }
 0x286   : > { %2578 = vst [vmem:[#allocation2 + $0xc8] sm:$0xff] %v2546_v19  ;;  %v2796_v40 = vld [vmem:[#allocation2 + $0x37] sm:$0xff]  ;;  %v7533_v3 = vld [vmem:[#allocation2 + $0x67] sm:$0xff]  ;;  %v2956_v22 = vpack.c.bf16 %v7531_v1, %v7529_v13  ;;  %v2763_v18 = vpack.c.bf16 %v7527_v39, %v2731_v61 }
 0x287   : > { %v7535_v28 = vld [vmem:[#allocation2 + $0x39] sm:$0xff]  ;;  %2576 = vst [vmem:[#allocation2 + $0x98] sm:$0xff] %v2544_v16  ;;  %v6086_v38 = vpop.f32.mrb[136].mxu0  ;;  %3939 = vmatmul.mubr.bf16.vlgmr.msra.gmra.mrb[128].mxu1 %v2635_v8  ;;  %v2827_v57 = vpack.c.bf16 %v2796_v40, %v2604_v30  ;;  %v7539_v20 = vpack.c.bf16 %v2545_v4, %v2544_v16  ;;  %v6346_v36 = vld [vmem:[#allocation9 + $0x1c8] sm:$0xff]   ;;  %v2828_v63 = vpack.c.bf16 %v7533_v3, %v2797_v58  ;;  %v6339_v24 = vld [vmem:[#allocation9 + $0x110] sm:$0xff]  }
 0x288   : > { %v2453_v31 = vadd.f32 %v6086_v38, %v7452_v51  ;;  %v2444_v50 = vpop.f32.mrb[137].mxu0  ;;  %3946 = vmatprep.mubr.bf16.mxu1 %v2700_v33  ;;  %5813 = vmatpush3.bf16.msra.mxu1 %v6335_v44  ;;  %v2955_v45 = vpack.c.bf16 %v7535_v28, %v7527_v39  ;;  %v6338_v51 = vld [vmem:[#allocation9 + $0x150] sm:$0xff]   ;;  %v7554_v6 = vpack.c.bf16 %v2797_v58, %v2796_v40  ;;  %v6347_v43 = vld [vmem:[#allocation9 + $0x188] sm:$0xff]   ;;  %v6341_v38 = vld [vmem:[#allocation9 + $0x118] sm:$0xff]  }
 0x289   : > { %v7546_v47 = vadd.f32 %v2444_v50, %v7446_v52  ;;  %v6087_v60 = vpop.f32.mrb[138].mxu0  ;;  %4099 = vmatprep.mubr.bf16.mxu0 %v2827_v57  ;;  %5814 = vmatprep.subr.bf16.mxu1 %v6336_v59  ;;  %v6350_v61 = vld [vmem:[#allocation9 + $0x1d0] sm:$0xff]   ;;  %v2764_v8 = vpack.c.bf16 %v7529_v13, %v7535_v28  ;;  %v3053_v39 = vld [vmem:[#allocation2 + $0x68] sm:$0xff] }
 0x28a   : > { %v2549_v53 = vmax.f32 %v2453_v31, 0.0  ;;  %v2456_v33 = vadd.f32 %v6087_v60, %v7454_v21  ;;  %v2447_v56 = vpop.f32.mrb[139].mxu0  ;;  %4100 = vmatmul.mubr.bf16.vlgmr.msra.gmra.mrb[160].mxu0 %v2763_v18  ;;  %v6340_v21 = vld [vmem:[#allocation9 + $0x158] sm:$0xff]   ;;  %v6344_v18 = vld [vmem:[#allocation9 + $0x160] sm:$0xff]  }
 0x28b   : > { %v2547_v11 = vmax.f32 %v7546_v47, 0.0  ;;  %v2448_v4 = vadd.f32 %v2447_v56, %v7448_v41  ;;  %4107 = vmatprep.mubr.bf16.mxu0 %v2828_v63  ;;  %5925 = vmatpush3.bf16.msra.mxu0 %v6343_v2  ;;  %v3056_v13 = vld [vmem:[#allocation2 + $0xb0] sm:$0xff] }
 0x28c   : > { %2581 = vst [vmem:[#allocation2 + $0x140] sm:$0xff] %v2549_v53  ;;  %v2550_v52 = vmax.f32 %v2456_v33, 0.0  ;;  %5815 = vmatpush3.bf16.msra.mxu1 %v6337_v29  ;;  %5926 = vmatprep.subr.bf16.mxu0 %v6346_v36  ;;  %v7561_v30 = vld [vmem:[#allocation2 + $0x81] sm:$0xff]  ;;  %v6354_v36 = vld [vmem:[#allocation9 + $0x1d8] sm:$0xff]  }
 0x28d   : > { %2579 = vst [vmem:[#allocation2 + $0x110] sm:$0xff] %v2547_v11  ;;  %v2548_v5 = vmax.f32 %v2448_v4, 0.0  ;;  %5816 = vmatprep.subr.bf16.mxu1 %v6338_v51  ;;  %v2799_v40 = vld [vmem:[#allocation2 + $0x7f] sm:$0xff] }
 0x28e   : > { %2582 = vst [vmem:[#allocation2 + $0x158] sm:$0xff] %v2550_v52  ;;  %v7556_v12 = vld [vmem:[#allocation2 + $0x97] sm:$0xff]  ;;  %v6345_v51 = vld [vmem:[#allocation9 + $0x120] sm:$0xff]   ;;  %v7575_v56 = vpack.c.bf16 %v2799_v40, %v7533_v3 }
 0x28f   : > { %v7558_v41 = vld [vmem:[#allocation2 + $0x99] sm:$0xff]  ;;  %2580 = vst [vmem:[#allocation2 + $0x128] sm:$0xff] %v2548_v5  ;;  %v6090_v19 = vpop.f32.mrb[140].mxu0  ;;  %3947 = vmatmul.mubr.bf16.gmra.mrb[132].mxu1 %v7554_v6  ;;  %v7563_v44 = vpack.c.bf16 %v2549_v53, %v2548_v5  ;;  %v2829_v50 = vpack.c.bf16 %v7556_v12, %v2799_v40  ;;  %5927 = vmatpush3.bf16.msra.mxu0 %v6347_v43  ;;  %v6348_v53 = vld [vmem:[#allocation9 + $0x168] sm:$0xff]  }
 0x290   : > { %v2469_v59 = vadd.f32 %v6090_v19, %v7464_v46  ;;  %v2460_v16 = vpop.f32.mrb[141].mxu0  ;;  %3954 = vmatprep.mubr.bf16.mxu1 %v2701_v49  ;;  %5817 = vmatpush3.bf16.msra.mxu1 %v6339_v24  ;;  %v2957_v57 = vpack.c.bf16 %v7558_v41, %v7561_v30  ;;  %v6351_v46 = vld [vmem:[#allocation9 + $0x190] sm:$0xff]   ;;  %v7583_v5 = vld [vmem:[#allocation2 + $0xc7] sm:$0xff] }
 0x291   : > { %v2461_v2 = vadd.f32 %v2460_v16, %v7458_v62  ;;  %v6091_v31 = vpop.f32.mrb[142].mxu0  ;;  %5818 = vmatprep.subr.bf16.mxu1 %v6340_v21  ;;  %5928 = vmatprep.subr.bf16.mxu0 %v6350_v61  ;;  %v6358_v43 = vld [vmem:[#allocation9 + $0x1e0] sm:$0xff]   ;;  %v2801_v40 = vld [vmem:[#allocation2 + $0xaf] sm:$0xff] }
 0x292   : > { %v2553_v58 = vmax.f32 %v2469_v59, 0.0  ;;  %v2472_v49 = vadd.f32 %v6091_v31, %v7466_v15  ;;  %v2463_v29 = vpop.f32.mrb[143].mxu0  ;;  %4108 = vmatmul.mubr.bf16.gmra.mrb[164].mxu0 %v2764_v8  ;;  %v2765_v8 = vpack.c.bf16 %v7561_v30, %v7531_v1  ;;  %v6372_v30 = vld [vmem:[#allocation9 + $0x230] sm:$0xff]  }
 0x293   : > { %v2551_v60 = vmax.f32 %v2461_v2, 0.0  ;;  %v2464_v63 = vadd.f32 %v2463_v29, %v7460_v17  ;;  %4115 = vmatprep.mubr.bf16.mxu0 %v2829_v50  ;;  %v7579_v15 = vld [vmem:[#allocation2 + $0x141] sm:$0xff]  ;;  %5929 = vmatpush3.bf16.msra.mxu0 %v6351_v46  ;;  %v6355_v17 = vld [vmem:[#allocation9 + $0x198] sm:$0xff]  }
 0x294   : > { %2585 = vst [vmem:[#allocation2 + $0x1a0] sm:$0xff] %v2553_v58  ;;  %v2554_v62 = vmax.f32 %v2472_v49, 0.0  ;;  %5819 = vmatpush3.bf16.msra.mxu1 %v6341_v38  ;;  %5930 = vmatprep.subr.bf16.mxu0 %v6354_v36  ;;  %v7590_v61 = vld [vmem:[#allocation2 + $0x111] sm:$0xff]  ;;  %v6349_v38 = vld [vmem:[#allocation9 + $0x128] sm:$0xff]   ;;  %v6359_v46 = vld [vmem:[#allocation9 + $0x1a0] sm:$0xff]  }
 0x295   : > { %2583 = vst [vmem:[#allocation2 + $0x170] sm:$0xff] %v2551_v60  ;;  %v2552_v33 = vmax.f32 %v2464_v63, 0.0  ;;  %v7577_v4 = vpack.c.bf16 %v2551_v60, %v2550_v52  ;;  %v7581_v24 = vld [vmem:[#allocation2 + $0x159] sm:$0xff]  ;;  %5820 = vmatprep.subr.bf16.mxu1 %v6344_v18  ;;  %v2830_v18 = vpack.c.bf16 %v7583_v5, %v2801_v40  ;;  %v6360_v29 = vld [vmem:[#allocation9 + $0x1e8] sm:$0xff]   ;;  %v6353_v63 = vld [vmem:[#allocation9 + $0x130] sm:$0xff]  }
 0x296   : > { %2586 = vst [vmem:[#allocation2 + $0x1b8] sm:$0xff] %v2554_v62  ;;  %v7585_v21 = vld [vmem:[#allocation2 + $0x129] sm:$0xff]  ;;  %v2960_v3 = vpack.c.bf16 %v7581_v24, %v7579_v15 }
 0x297   : > { %2584 = vst [vmem:[#allocation2 + $0x188] sm:$0xff] %v2552_v33  ;;  %v6094_v52 = vpop.f32.mrb[144].mxu0  ;;  %3955 = vmatmul.mubr.bf16.gmra.mrb[136].mxu1 %v7575_v56  ;;  %v7592_v19 = vpack.c.bf16 %v2553_v58, %v2552_v33  ;;  %v2959_v2 = vpack.c.bf16 %v7585_v21, %v7590_v61  ;;  %5931 = vmatpush3.bf16.msra.mxu0 %v6355_v17  ;;  %v7618_v33 = vld [vmem:[#allocation2 + $0x127] sm:$0xff] }
 0x298   : > { %v2485_v59 = vadd.f32 %v6094_v52, %v7476_v42  ;;  %v2476_v16 = vpop.f32.mrb[145].mxu0  ;;  %3962 = vmatprep.mubr.bf16.mxu1 %v7539_v20  ;;  %5821 = vmatpush3.bf16.msra.mxu1 %v6345_v51  ;;  %v6352_v42 = vld [vmem:[#allocation9 + $0x170] sm:$0xff]   ;;  %v6356_v51 = vld [vmem:[#allocation9 + $0x178] sm:$0xff]  }
 0x299   : > { %v7601_v31 = vadd.f32 %v2476_v16, %v7470_v10  ;;  %v6095_v50 = vpop.f32.mrb[146].mxu0  ;;  %5822 = vmatprep.subr.bf16.mxu1 %v6348_v53  ;;  %5932 = vmatprep.subr.bf16.mxu0 %v6358_v43  ;;  %v6361_v53 = vld [vmem:[#allocation9 + $0x1a8] sm:$0xff]   ;;  %v6362_v43 = vld [vmem:[#allocation9 + $0x1f0] sm:$0xff]  }
 0x29a   : > { %v2557_v20 = vmax.f32 %v2485_v59, 0.0  ;;  %v7605_v58 = vadd.f32 %v6095_v50, %v7478_v25  ;;  %v2479_v49 = vpop.f32.mrb[147].mxu0  ;;  %4116 = vmatmul.mubr.bf16.gmra.mrb[168].mxu0 %v2765_v8  ;;  %v7613_v25 = vpack.c.bf16 %v2801_v40, %v7556_v12  ;;  %v7623_v12 = vld [vmem:[#allocation2 + $0xb1] sm:$0xff] }
 0x29b   : > { %v2555_v36 = vmax.f32 %v7601_v31, 0.0  ;;  %v2480_v10 = vadd.f32 %v2479_v49, %v7472_v34  ;;  %4123 = vmatprep.mubr.bf16.mxu0 %v2830_v18  ;;  %5933 = vmatpush3.bf16.msra.mxu0 %v6359_v46  ;;  %v2703_v34 = vpack.c.bf16 %v2547_v11, %v7520_v9  ;;  %v2766_v11 = vpack.c.bf16 %v7623_v12, %v7558_v41  ;;  %v2803_v40 = vld [vmem:[#allocation2 + $0x10f] sm:$0xff]  ;;  %v2619_v31 = vld [vmem:[#allocation2 + $0x1e7] sm:$0xff] }
 0x29c   : > { %2589 = vst [vmem:[#allocation2 + $0x230] sm:$0xff] %v2557_v20  ;;  %v2558_v60 = vmax.f32 %v7605_v58, 0.0  ;;  %5823 = vmatpush3.bf16.msra.mxu1 %v6349_v38  ;;  %5934 = vmatprep.subr.bf16.mxu0 %v6360_v29  ;;  %v7625_v59 = vld [vmem:[#allocation2 + $0x171] sm:$0xff]  ;;  %v2831_v46 = vpack.c.bf16 %v7618_v33, %v2803_v40 }
 0x29d   : > { %2587 = vst [vmem:[#allocation2 + $0x200] sm:$0xff] %v2555_v36  ;;  %v2556_v62 = vmax.f32 %v2480_v10, 0.0  ;;  %5824 = vmatprep.subr.bf16.mxu1 %v6352_v42  ;;  %v6357_v38 = vld [vmem:[#allocation9 + $0x138] sm:$0xff]  }
 0x29e   : > { %2590 = vst [vmem:[#allocation2 + $0x248] sm:$0xff] %v2558_v60  ;;  %v7620_v17 = vld [vmem:[#allocation2 + $0x189] sm:$0xff]  ;;  %v2611_v10 = vld [vmem:[#allocation2 + $0xf7] sm:$0xff] }
 0x29f   : > { %2588 = vst [vmem:[#allocation2 + $0x218] sm:$0xff] %v2556_v62  ;;  %v6098_v52 = vpop.f32.mrb[148].mxu0  ;;  %3963 = vmatmul.mubr.bf16.gmra.mrb[140].mxu1 %v7613_v25  ;;  %v7627_v16 = vpack.c.bf16 %v2557_v20, %v2556_v62  ;;  %v2961_v50 = vpack.c.bf16 %v7620_v17, %v7625_v59  ;;  %5935 = vmatpush3.bf16.msra.mxu0 %v6361_v53  ;;  %v6363_v20 = vld [vmem:[#allocation9 + $0x1b0] sm:$0xff]  }
 0x2a0   : > { %v2501_v8 = vadd.f32 %v6098_v52, %v7488_v27  ;;  %v2492_v47 = vpop.f32.mrb[149].mxu0  ;;  %3970 = vmatprep.mubr.bf16.mxu1 %v2703_v34  ;;  %5825 = vmatpush3.bf16.msra.mxu1 %v6353_v63  ;;  %v7636_v27 = vld [vmem:[#allocation9 + $0x200] sm:$0xff]   ;;  %v6364_v63 = vld [vmem:[#allocation9 + $0x1f8] sm:$0xff]   ;;  %v2639_v53 = vpack.c.bf16 %v2803_v40, %v2611_v10 }
 0x2a1   : > { %v2493_v18 = vadd.f32 %v2492_v47, %v7482_v26  ;;  %v6099_v42 = vpop.f32.mrb[150].mxu0  ;;  %5826 = vmatprep.subr.bf16.mxu1 %v6356_v51  ;;  %5936 = vmatprep.subr.bf16.mxu0 %v6362_v43  ;;  %v2739_v52 = vld [vmem:[#allocation2 + $0xf9] sm:$0xff] }
 0x2a2   : > { %v2561_v58 = vmax.f32 %v2501_v8, 0.0  ;;  %v2504_v49 = vadd.f32 %v6099_v42, %v7490_v55  ;;  %v2495_v29 = vpop.f32.mrb[151].mxu0  ;;  %4124 = vmatmul.mubr.bf16.gmra.mrb[172].mxu0 %v2766_v11  ;;  %v6365_v43 = vld [vmem:[#allocation9 + $0x1b8] sm:$0xff]  }
 0x2a3   : > { %v2559_v62 = vmax.f32 %v2493_v18, 0.0  ;;  %v2496_v34 = vadd.f32 %v2495_v29, %v7484_v14  ;;  %4131 = vmatprep.mubr.bf16.mxu0 %v2831_v46  ;;  %v7642_v8 = vld [vmem:[#allocation2 + $0x231] sm:$0xff]  ;;  %5937 = vmatpush3.bf16.msra.mxu0 %v6363_v20  ;;  %v2767_v20 = vpack.c.bf16 %v7590_v61, %v2739_v52  ;;  %v3063_v61 = vld [vmem:[#allocation2 + $0x188] sm:$0xff] }
 0x2a4   : > { %2593 = vst [vmem:[#allocation2 + $0x290] sm:$0xff] %v2561_v58  ;;  %v2562_v26 = vmax.f32 %v2504_v49, 0.0  ;;  %5827 = vmatpush3.bf16.msra.mxu1 %v6357_v38  ;;  %v2806_v14 = vld [vmem:[#allocation2 + $0x157] sm:$0xff]  ;;  %5938 = vmatprep.subr.bf16.mxu0 %v6364_v63  ;;  %v2805_v49 = vld [vmem:[#allocation2 + $0x13f] sm:$0xff] }
 0x2a5   : > { %2591 = vst [vmem:[#allocation2 + $0x260] sm:$0xff] %v2559_v62  ;;  %v2560_v51 = vmax.f32 %v2496_v34, 0.0  ;;  %v7640_v47 = vpack.c.bf16 %v2559_v62, %v2558_v60  ;;  %v7644_v55 = vld [vmem:[#allocation2 + $0x249] sm:$0xff]  ;;  %6108 = vmatprep.subr.bf16.mxu1 %v7636_v27  ;;  %v7651_v60 = vld [vmem:[#allocation2 + $0x201] sm:$0xff]  ;;  %v2832_v62 = vpack.c.bf16 %v2806_v14, %v2805_v49 }
 0x2a6   : > { %2594 = vst [vmem:[#allocation2 + $0x2a8] sm:$0xff] %v2562_v26  ;;  %v7647_v11 = vld [vmem:[#allocation2 + $0x219] sm:$0xff] }
 0x2a7   : > { %2592 = vst [vmem:[#allocation2 + $0x278] sm:$0xff] %v2560_v51  ;;  %v6102_v40 = vpop.f32.mrb[152].mxu0  ;;  %3971 = vmatmul.mubr.bf16.gmra.mrb[144].mxu1 %v2639_v53  ;;  %v7653_v18 = vpack.c.bf16 %v2561_v58, %v2560_v51  ;;  %v2963_v29 = vpack.c.bf16 %v7647_v11, %v7651_v60  ;;  %5939 = vmatpush3.bf16.msra.mxu0 %v6365_v43  ;;  %v2808_v53 = vld [vmem:[#allocation2 + $0x187] sm:$0xff] }
 0x2a8   : > { %v2517_v42 = vadd.f32 %v6102_v40, %v7500_v48  ;;  %v2508_v46 = vpop.f32.mrb[153].mxu0  ;;  %3978 = vmatprep.mubr.bf16.mxu1 %v7563_v44  ;;  %v7669_v51 = vpack.c.bf16 %v2805_v49, %v7618_v33  ;;  %v2768_v33 = vpack.c.bf16 %v7579_v15, %v7585_v21 }
 0x2a9   : > { %v7661_v10 = vadd.f32 %v2508_v46, %v7494_v0  ;;  %v6103_v63 = vpop.f32.mrb[154].mxu0 }
 0x2aa   : > { %v2565_v34 = vmax.f32 %v2517_v42, 0.0  ;;  %v2520_v58 = vadd.f32 %v6103_v63, %v7502_v54  ;;  %v2511_v26 = vpop.f32.mrb[155].mxu0  ;;  %4132 = vmatmul.mubr.bf16.gmra.mrb[176].mxu0 %v2767_v20  ;;  %v2807_v20 = vld [vmem:[#allocation2 + $0x16f] sm:$0xff] }
 0x2ab   : > { %v2563_v48 = vmax.f32 %v7661_v10, 0.0  ;;  %v2512_v44 = vadd.f32 %v2511_v26, %v7496_v7  ;;  %4139 = vmatprep.mubr.bf16.mxu0 %v2832_v62  ;;  %v7687_v38 = vpack.c.bf16 %v2807_v20, %v2806_v14 }
 0x2ac   : > { %2597 = vst [vmem:[#allocation2 + $0x320] sm:$0xff] %v2565_v34  ;;  %v2566_v52 = vmax.f32 %v2520_v58, 0.0  ;;  %v7674_v40 = vld [vmem:[#allocation2 + $0x261] sm:$0xff]  ;;  %v2833_v58 = vpack.c.bf16 %v2808_v53, %v2807_v20 }
 0x2ad   : > { %2595 = vst [vmem:[#allocation2 + $0x2f0] sm:$0xff] %v2563_v48  ;;  %v2564_v0 = vmax.f32 %v2512_v44, 0.0  ;;  %v2809_v20 = vld [vmem:[#allocation2 + $0x19f] sm:$0xff] }
 0x2ae   : > { %2598 = vst [vmem:[#allocation2 + $0x338] sm:$0xff] %v2566_v52  ;;  %v7671_v43 = vld [vmem:[#allocation2 + $0x279] sm:$0xff] }
 0x2af   : > { %2596 = vst [vmem:[#allocation2 + $0x308] sm:$0xff] %v2564_v0  ;;  %v6106_v54 = vpop.f32.mrb[156].mxu0  ;;  %3979 = vmatmul.mubr.bf16.gmra.mrb[148].mxu1 %v7669_v51  ;;  %v7676_v7 = vpack.c.bf16 %v2565_v34, %v2564_v0 }
 0x2b0   : > { %v2533_v42 = vadd.f32 %v6106_v54, %v7512_v35  ;;  %v2524_v46 = vpop.f32.mrb[157].mxu0  ;;  %3986 = vmatprep.mubr.bf16.mxu1 %v7577_v4 }
 0x2b1   : > { %v2525_v63 = vadd.f32 %v2524_v46, %v7506_v37  ;;  %v6107_v62 = vpop.f32.mrb[158].mxu0 }
 0x2b2   : > { %v2569_v26 = vmax.f32 %v2533_v42, 0.0  ;;  %v2536_v34 = vadd.f32 %v6107_v62, %v7515_v32  ;;  %v2527_v44 = vpop.f32.mrb[159].mxu0  ;;  %4140 = vmatmul.mubr.bf16.gmra.mrb[180].mxu0 %v2768_v33  ;;  %v7695_v32 = vld [vmem:[#allocation2 + $0x1b7] sm:$0xff] }
 0x2b3   : > { %v2567_v35 = vmax.f32 %v2525_v63, 0.0  ;;  %v2528_v0 = vadd.f32 %v2527_v44, %v7508_v23  ;;  %4147 = vmatprep.mubr.bf16.mxu0 %v2833_v58  ;;  %v7691_v37 = vld [vmem:[#allocation2 + $0x321] sm:$0xff]  ;;  %v2834_v62 = vpack.c.bf16 %v7695_v32, %v2809_v20  ;;  %v7712_v58 = vpack.c.bf16 %v2809_v20, %v2808_v53  ;;  %v2813_v23 = vld [vmem:[#allocation2 + $0x22f] sm:$0xff] }
 0x2b4   : > { %2601 = vst [vmem:[#allocation2 + $0x380] sm:$0xff] %v2569_v26  ;;  %v2570_v4 = vmax.f32 %v2536_v34, 0.0  ;;  %v7702_v33 = vld [vmem:[#allocation2 + $0x2f1] sm:$0xff]  ;;  %v2814_v20 = vld [vmem:[#allocation2 + $0x247] sm:$0xff] }
 0x2b5   : > { %2599 = vst [vmem:[#allocation2 + $0x350] sm:$0xff] %v2567_v35  ;;  %v2568_v54 = vmax.f32 %v2528_v0, 0.0  ;;  %v7689_v49 = vpack.c.bf16 %v2567_v35, %v2566_v52  ;;  %v7693_v46 = vld [vmem:[#allocation2 + $0x339] sm:$0xff]  ;;  %v2769_v52 = vpack.c.bf16 %v7625_v59, %v7581_v24  ;;  %v7722_v35 = vld [vmem:[#allocation2 + $0x1a1] sm:$0xff]  ;;  %v2836_v63 = vpack.c.bf16 %v2814_v20, %v2813_v23  ;;  %v3002_v59 = vld [vmem:[#allocation2 + $0x1cf] sm:$0xff] }
 0x2b6   : > { %2602 = vst [vmem:[#allocation2 + $0x398] sm:$0xff] %v2570_v4  ;;  %v7697_v42 = vld [vmem:[#allocation2 + $0x309] sm:$0xff]  ;;  %v2812_v34 = vld [vmem:[#allocation2 + $0x217] sm:$0xff]  ;;  %v2770_v53 = vpack.c.bf16 %v7722_v35, %v7620_v17  ;;  %v2811_v4 = vld [vmem:[#allocation2 + $0x1ff] sm:$0xff] }
 0x2b7   : > { %2600 = vst [vmem:[#allocation2 + $0x368] sm:$0xff] %v2568_v54  ;;  %3987 = vmatmul.mubr.bf16.gmra.mrb[152].mxu1 %v7687_v38  ;;  %v7704_v14 = vpack.c.bf16 %v2569_v26, %v2568_v54  ;;  %v2707_v26 = vpack.c.bf16 %v2555_v36, %v7520_v9  ;;  %v2835_v54 = vpack.c.bf16 %v2812_v34, %v2811_v4  ;;  %v2816_v0 = vld [vmem:[#allocation2 + $0x277] sm:$0xff] }
 0x2b8   : > { %3994 = vmatprep.mubr.bf16.mxu1 %v7592_v19  ;;  %v2643_v36 = vpack.c.bf16 %v2811_v4, %v2619_v31  ;;  %v2815_v4 = vld [vmem:[#allocation2 + $0x25f] sm:$0xff]  ;;  %v7738_v31 = vld [vmem:[#allocation2 + $0x2a7] sm:$0xff] }
 0x2ba   : > { %4148 = vmatmul.mubr.bf16.gmra.mrb[184].mxu0 %v2769_v52  ;;  %v2747_v52 = vld [vmem:[#allocation2 + $0x1e9] sm:$0xff] }
 0x2bb   : > { %4155 = vmatprep.mubr.bf16.mxu0 %v2834_v62  ;;  %v2771_v62 = vpack.c.bf16 %v7651_v60, %v2747_v52  ;;  %v2820_v52 = vld [vmem:[#allocation2 + $0x307] sm:$0xff]  ;;  %v3071_v60 = vld [vmem:[#allocation2 + $0x278] sm:$0xff] }
 0x2bc   : > { %v7717_v44 = vld [vmem:[#allocation2 + $0x351] sm:$0xff] }
 0x2be   : > { %v7719_v19 = vld [vmem:[#allocation2 + $0x369] sm:$0xff] }
 0x2bf   : > { %3995 = vmatmul.mubr.bf16.gmra.mrb[156].mxu1 %v7712_v58 }
 0x2c0   : > { %4002 = vmatprep.mubr.bf16.mxu1 %v2707_v26  ;;  %v7730_v26 = vpack.c.bf16 %v2813_v23, %v2812_v34  ;;  %v2773_v23 = vpack.c.bf16 %v7674_v40, %v7644_v55 }
 0x2c2   : > { %4156 = vmatmul.mubr.bf16.gmra.mrb[188].mxu0 %v2770_v53  ;;  %v2772_v53 = vpack.c.bf16 %v7642_v8, %v7647_v11 }
 0x2c3   : > { %4163 = vmatprep.mubr.bf16.mxu0 %v2835_v54  ;;  %v2837_v54 = vpack.c.bf16 %v2816_v0, %v2815_v4 }
 0x2c7   : > { %4003 = vmatmul.mubr.bf16.gmra.mrb[160].mxu1 %v2643_v36  ;;  %v2711_v36 = vpack.c.bf16 %v2563_v48, %v7520_v9  ;;  %v2821_v48 = vld [vmem:[#allocation2 + $0x31f] sm:$0xff] }
 0x2c8   : > { %4010 = vmatprep.mubr.bf16.mxu1 %v7627_v16  ;;  %v7736_v16 = vpack.c.bf16 %v2815_v4, %v2814_v20  ;;  %v7751_v20 = vld [vmem:[#allocation2 + $0x291] sm:$0xff] }
 0x2c9   : > { %v2627_v4 = vld [vmem:[#allocation2 + $0x2d7] sm:$0xff] }
 0x2ca   : > { %4164 = vmatmul.mubr.bf16.gmra.mrb[192].mxu0 %v2771_v62  ;;  %v2819_v62 = vld [vmem:[#allocation2 + $0x2ef] sm:$0xff] }
 0x2cb   : > { %4171 = vmatprep.mubr.bf16.mxu0 %v2836_v63  ;;  %v2817_v63 = vld [vmem:[#allocation2 + $0x28f] sm:$0xff] }
 0x2cc   : > { %v7745_v34 = vpack.c.bf16 %v2817_v63, %v2816_v0  ;;  %v2647_v0 = vpack.c.bf16 %v2819_v62, %v2627_v4  ;;  %v7765_v4 = vld [vmem:[#allocation2 + $0x397] sm:$0xff] }
 0x2cf   : > { %4011 = vmatmul.mubr.bf16.gmra.mrb[164].mxu1 %v7730_v26 }
 0x2d0   : > { %4018 = vmatprep.mubr.bf16.mxu1 %v7640_v47  ;;  %v2838_v47 = vpack.c.bf16 %v7738_v31, %v2817_v63 }
 0x2d2   : > { %4172 = vmatmul.mubr.bf16.gmra.mrb[196].mxu0 %v2772_v53  ;;  %v2839_v53 = vpack.c.bf16 %v2820_v52, %v2819_v62  ;;  %v2823_v62 = vld [vmem:[#allocation2 + $0x34f] sm:$0xff] }
 0x2d3   : > { %4179 = vmatprep.mubr.bf16.mxu0 %v2837_v54  ;;  %v2755_v54 = vld [vmem:[#allocation2 + $0x2d9] sm:$0xff] }
 0x2d4   : > { %v2775_v10 = vpack.c.bf16 %v7702_v33, %v2755_v54 }
 0x2d7   : > { %4019 = vmatmul.mubr.bf16.gmra.mrb[168].mxu1 %v7736_v16 }
 0x2d8   : > { %4026 = vmatprep.mubr.bf16.mxu1 %v7653_v18  ;;  %v2774_v18 = vpack.c.bf16 %v7751_v20, %v7671_v43 }
 0x2da   : > { %4180 = vmatmul.mubr.bf16.gmra.mrb[200].mxu0 %v2773_v23  ;;  %v2822_v23 = vld [vmem:[#allocation2 + $0x337] sm:$0xff] }
 0x2db   : > { %4187 = vmatprep.mubr.bf16.mxu0 %v2838_v47  ;;  %v2840_v63 = vpack.c.bf16 %v2822_v23, %v2821_v48  ;;  %v7757_v47 = vpack.c.bf16 %v2821_v48, %v2820_v52  ;;  %v2777_v52 = vpack.c.bf16 %v7717_v44, %v7693_v46  ;;  %v3052_v48 = vld [vmem:[#allocation2 + $0x50] sm:$0xff] }
 0x2df   : > { %4027 = vmatmul.mubr.bf16.gmra.mrb[172].mxu1 %v7745_v34 }
 0x2e0   : > { %4034 = vmatprep.mubr.bf16.mxu1 %v2711_v36  ;;  %v2824_v36 = vld [vmem:[#allocation2 + $0x367] sm:$0xff] }
 0x2e2   : > { %4188 = vmatmul.mubr.bf16.gmra.mrb[204].mxu0 %v2774_v18  ;;  %v2776_v18 = vpack.c.bf16 %v7691_v37, %v7697_v42 }
 0x2e3   : > { %4195 = vmatprep.mubr.bf16.mxu0 %v2839_v53  ;;  %v2841_v53 = vpack.c.bf16 %v2824_v36, %v2823_v62 }
 0x2e7   : > { %4035 = vmatmul.mubr.bf16.gmra.mrb[176].mxu1 %v2647_v0  ;;  %v2825_v0 = vld [vmem:[#allocation2 + $0x37f] sm:$0xff] }
 0x2e8   : > { %4042 = vmatprep.mubr.bf16.mxu1 %v7676_v7  ;;  %v7763_v7 = vpack.c.bf16 %v2823_v62, %v2822_v23  ;;  %v7772_v54 = vpack.c.bf16 %v2825_v0, %v2824_v36  ;;  %v7775_v23 = vld [vmem:[#allocation2 + $0x381] sm:$0xff] }
 0x2e9   : > { %v6367_v36 = vld [vmem:[#allocation9 + $0x208] sm:$0xff]  }
 0x2ea   : > { %4196 = vmatmul.mubr.bf16.gmra.mrb[208].mxu0 %v2775_v10  ;;  %v3051_v10 = vld [vmem:[#allocation2 + $0x38] sm:$0xff] }
 0x2eb   : > { %4203 = vmatprep.mubr.bf16.mxu0 %v2840_v63  ;;  %v3083_v63 = vpack.c.bf16 %v3052_v48, %v3051_v10 }
 0x2ef   : > { %4043 = vmatmul.mubr.bf16.gmra.mrb[180].mxu1 %v7757_v47 }
 0x2f0   : > { %4050 = vmatprep.mubr.bf16.mxu1 %v7689_v49  ;;  %v2842_v49 = vpack.c.bf16 %v7765_v4, %v2825_v0  ;;  %v6369_v0 = vld [vmem:[#allocation9 + $0x218] sm:$0xff]  }
 0x2f2   : > { %4204 = vmatmul.mubr.bf16.gmra.mrb[212].mxu0 %v2776_v18  ;;  %v2859_v18 = vld [vmem:[#allocation2 + $0x20] sm:$0xff] }
 0x2f3   : > { %4211 = vmatprep.mubr.bf16.mxu0 %v2841_v53  ;;  %v2891_v62 = vpack.c.bf16 %v3051_v10, %v2859_v18  ;;  %v3054_v53 = vld [vmem:[#allocation2 + $0x80] sm:$0xff]  ;;  %v6371_v10 = vld [vmem:[#allocation9 + $0x228] sm:$0xff]  }
 0x2f4   : > { %v3084_v28 = vpack.c.bf16 %v3054_v53, %v3053_v39  ;;  %v3059_v18 = vld [vmem:[#allocation2 + $0x128] sm:$0xff] }
 0x2f7   : > { %4051 = vmatmul.mubr.bf16.gmra.mrb[184].mxu1 %v7763_v7 }
 0x2f8   : > { %4058 = vmatprep.mubr.bf16.mxu1 %v7704_v14  ;;  %v2778_v14 = vpack.c.bf16 %v7775_v23, %v7719_v19 }
 0x2fa   : > { %4212 = vmatmul.mubr.bf16.gmra.mrb[216].mxu0 %v2777_v52  ;;  %v2892_v52 = vpack.c.bf16 %v3053_v39, %v3052_v48  ;;  %v3057_v48 = vld [vmem:[#allocation2 + $0xc8] sm:$0xff]  ;;  %v3062_v39 = vld [vmem:[#allocation2 + $0x170] sm:$0xff] }
 0x2fb   : > { %4219 = vmatprep.mubr.bf16.mxu0 %v2842_v49  ;;  %v3055_v49 = vld [vmem:[#allocation2 + $0x98] sm:$0xff]  ;;  %v3086_v41 = vpack.c.bf16 %v7520_v9, %v3057_v48  ;;  %v2897_v15 = vpack.c.bf16 %v3063_v61, %v3062_v39 }
 0x2fc   : > { %v3085_v1 = vpack.c.bf16 %v3056_v13, %v3055_v49 }
 0x2ff   : > { %4059 = vmatmul.mubr.bf16.gmra.mrb[188].mxu1 %v7772_v54 }
 0x300   : > { %4260 = vmatprep.mubr.bf16.mxu1 %v2955_v45  ;;  %v6368_v45 = vld [vmem:[#allocation9 + $0x210] sm:$0xff]  }
 0x302   : > { %4220 = vmatmul.mubr.bf16.gmra.mrb[220].mxu0 %v2778_v14 }
 0x303   : > { %4421 = vmatprep.mubr.bf16.mxu0 %v3083_v63  ;;  %v6373_v63 = vld [vmem:[#allocation9 + $0x238] sm:$0xff]  }
 0x307   : > { %4261 = vmatmul.mubr.bf16.vlgmr.msra.gmra.mrb[192].mxu1 %v2891_v62  ;;  %v3060_v62 = vld [vmem:[#allocation2 + $0x140] sm:$0xff] }
 0x308   : > { %4268 = vmatprep.mubr.bf16.mxu1 %v2956_v22  ;;  %6109 = vmatpush3.bf16.msra.mxu1 %v7636_v27  ;;  %v6370_v22 = vld [vmem:[#allocation9 + $0x220] sm:$0xff]   ;;  %v2893_v27 = vpack.c.bf16 %v3055_v49, %v3054_v53 }
 0x309   : > { %6110 = vmatprep.subr.bf16.mxu1 %v6367_v36  ;;  %v2875_v49 = vld [vmem:[#allocation2 + $0x200] sm:$0xff] }
 0x30a   : > { %4422 = vmatmul.mubr.bf16.vlgmr.msra.gmra.mrb[224].mxu0 %v7554_v6  ;;  %v7791_v6 = vld [vmem:[#allocation2 + $0xc9] sm:$0xff] }
 0x30b   : > { %4429 = vmatprep.mubr.bf16.mxu0 %v3084_v28  ;;  %v2958_v14 = vpack.c.bf16 %v7791_v6, %v7623_v12  ;;  %v3061_v28 = vld [vmem:[#allocation2 + $0x158] sm:$0xff] }
 0x30c   : > { %6111 = vmatpush3.bf16.msra.mxu1 %v6367_v36  ;;  %v3087_v36 = vpack.c.bf16 %v3060_v62, %v3059_v18  ;;  %v3088_v21 = vpack.c.bf16 %v3062_v39, %v3061_v28  ;;  %v8332_v39 = vpack.c.bf16 %v7697_v42, %v7702_v33 }
 0x30d   : > { %6112 = vmatprep.subr.bf16.mxu1 %v6368_v45 }
 0x30f   : > { %4269 = vmatmul.mubr.bf16.gmra.mrb[196].mxu1 %v2892_v52  ;;  %v7809_v52 = vld [vmem:[#allocation2 + $0x1b9] sm:$0xff] }
 0x310   : > { %4276 = vmatprep.mubr.bf16.mxu1 %v2957_v57  ;;  %6113 = vmatpush3.bf16.msra.mxu1 %v6368_v45  ;;  %v2894_v57 = vpack.c.bf16 %v3057_v48, %v3056_v13  ;;  %v2962_v24 = vpack.c.bf16 %v7809_v52, %v7722_v35 }
 0x311   : > { %6114 = vmatprep.subr.bf16.mxu1 %v6369_v0 }
 0x312   : > { %4430 = vmatmul.mubr.bf16.gmra.mrb[228].mxu0 %v7575_v56  ;;  %v2994_v56 = vld [vmem:[#allocation2 + $0xdf] sm:$0xff] }
 0x313   : > { %4437 = vmatprep.mubr.bf16.mxu0 %v3085_v1  ;;  %v3022_v12 = vpack.c.bf16 %v2994_v56, %v7583_v5  ;;  %v2896_v5 = vpack.c.bf16 %v3061_v28, %v3060_v62  ;;  %v3070_v1 = vld [vmem:[#allocation2 + $0x260] sm:$0xff]  ;;  %v3075_v62 = vld [vmem:[#allocation2 + $0x308] sm:$0xff] }
 0x314   : > { %6115 = vmatpush3.bf16.msra.mxu1 %v6369_v0  ;;  %v3068_v0 = vld [vmem:[#allocation2 + $0x230] sm:$0xff] }
 0x315   : > { %6116 = vmatprep.subr.bf16.mxu1 %v6370_v22 }
 0x317   : > { %4277 = vmatmul.mubr.bf16.gmra.mrb[200].mxu1 %v2893_v27 }
 0x318   : > { %4284 = vmatprep.mubr.bf16.mxu1 %v2958_v14  ;;  %6117 = vmatpush3.bf16.msra.mxu1 %v6370_v22  ;;  %v3069_v22 = vld [vmem:[#allocation2 + $0x248] sm:$0xff] }
 0x319   : > { %6118 = vmatprep.subr.bf16.mxu1 %v6371_v10  ;;  %v3092_v27 = vpack.c.bf16 %v3070_v1, %v3069_v22  ;;  %v2900_v11 = vpack.c.bf16 %v3069_v22, %v3068_v0  ;;  %v7827_v14 = vld [vmem:[#allocation2 + $0x2a9] sm:$0xff]  ;;  %v3077_v22 = vld [vmem:[#allocation2 + $0x338] sm:$0xff] }
 0x31a   : > { %4438 = vmatmul.mubr.bf16.gmra.mrb[232].mxu0 %v7613_v25  ;;  %v2867_v25 = vld [vmem:[#allocation2 + $0x110] sm:$0xff] }
 0x31b   : > { %4445 = vmatprep.mubr.bf16.mxu0 %v3086_v41  ;;  %v2895_v53 = vpack.c.bf16 %v3059_v18, %v2867_v25 }
 0x31c   : > { %6119 = vmatpush3.bf16.msra.mxu1 %v6371_v10 }
 0x31d   : > { %6120 = vmatprep.subr.bf16.mxu1 %v6372_v30 }
 0x31f   : > { %4285 = vmatmul.mubr.bf16.gmra.mrb[204].mxu1 %v2894_v57 }
 0x320   : > { %4292 = vmatprep.mubr.bf16.mxu1 %v2959_v2  ;;  %6121 = vmatpush3.bf16.msra.mxu1 %v6372_v30  ;;  %v3064_v2 = vld [vmem:[#allocation2 + $0x1a0] sm:$0xff] }
 0x321   : > { %6122 = vmatprep.subr.bf16.mxu1 %v6373_v63  ;;  %v3089_v45 = vpack.c.bf16 %v3064_v2, %v3063_v61 }
 0x322   : > { %4446 = vmatmul.mubr.bf16.gmra.mrb[236].mxu0 %v3022_v12 }
 0x323   : > { %4453 = vmatprep.mubr.bf16.mxu0 %v3087_v36 }
 0x324   : > { %6123 = vmatpush3.bf16.msra.mxu1 %v6373_v63  ;;  %v3010_v63 = vld [vmem:[#allocation2 + $0x2bf] sm:$0xff] }
 0x325   : > { %v3030_v28 = vpack.c.bf16 %v3010_v63, %v7738_v31  ;;  %v3080_v63 = vld [vmem:[#allocation2 + $0x380] sm:$0xff] }
 0x327   : > { %4293 = vmatmul.mubr.bf16.gmra.mrb[208].mxu1 %v2895_v53 }
 0x328   : > { %4300 = vmatprep.mubr.bf16.mxu1 %v2960_v3  ;;  %v3065_v3 = vld [vmem:[#allocation2 + $0x1b8] sm:$0xff] }
 0x329   : > { %v2898_v17 = vpack.c.bf16 %v3065_v3, %v3064_v2 }
 0x32a   : > { %4454 = vmatmul.mubr.bf16.gmra.mrb[240].mxu0 %v7669_v51  ;;  %v3090_v51 = vpack.c.bf16 %v7520_v9, %v3065_v3 }
 0x32b   : > { %4461 = vmatprep.mubr.bf16.mxu0 %v3088_v21  ;;  %v3076_v21 = vld [vmem:[#allocation2 + $0x320] sm:$0xff] }
 0x32c   : > { %v3095_v2 = vpack.c.bf16 %v3076_v21, %v3075_v62 }
 0x32f   : > { %4301 = vmatmul.mubr.bf16.gmra.mrb[212].mxu1 %v2896_v5 }
 0x330   : > { %4308 = vmatprep.mubr.bf16.mxu1 %v2961_v50  ;;  %v3067_v50 = vld [vmem:[#allocation2 + $0x218] sm:$0xff] }
 0x331   : > { %v3091_v35 = vpack.c.bf16 %v3068_v0, %v3067_v50  ;;  %v2899_v13 = vpack.c.bf16 %v3067_v50, %v2875_v49  ;;  %v3078_v0 = vld [vmem:[#allocation2 + $0x350] sm:$0xff] }
 0x332   : > { %4462 = vmatmul.mubr.bf16.gmra.mrb[244].mxu0 %v7687_v38  ;;  %v3026_v38 = vpack.c.bf16 %v3002_v59, %v7695_v32  ;;  %v3072_v32 = vld [vmem:[#allocation2 + $0x290] sm:$0xff] }
 0x333   : > { %4469 = vmatprep.mubr.bf16.mxu0 %v3089_v45  ;;  %v3093_v10 = vpack.c.bf16 %v3072_v32, %v3071_v60 }
 0x337   : > { %4309 = vmatmul.mubr.bf16.gmra.mrb[216].mxu1 %v2897_v15 }
 0x338   : > { %4316 = vmatprep.mubr.bf16.mxu1 %v2962_v24 }
 0x33a   : > { %4470 = vmatmul.mubr.bf16.gmra.mrb[248].mxu0 %v7712_v58  ;;  %v8330_v58 = vpack.c.bf16 %v7644_v55, %v7642_v8  ;;  %v2901_v8 = vpack.c.bf16 %v3071_v60, %v3070_v1  ;;  %v2966_v55 = vpack.c.bf16 %v7827_v14, %v7751_v20  ;;  %v3096_v60 = vpack.c.bf16 %v3078_v0, %v3077_v22 }
 0x33b   : > { %4477 = vmatprep.mubr.bf16.mxu0 %v3090_v51 }
 0x33f   : > { %4317 = vmatmul.mubr.bf16.gmra.mrb[220].mxu1 %v2898_v17  ;;  %v2883_v17 = vld [vmem:[#allocation2 + $0x2f0] sm:$0xff] }
 0x340   : > { %4324 = vmatprep.mubr.bf16.mxu1 %v2963_v29  ;;  %v8331_v29 = vpack.c.bf16 %v7671_v43, %v7674_v40  ;;  %v7836_v40 = vld [vmem:[%s8207_s4] ss:$0 sm:$0xff]  ;;  %v2903_v42 = vpack.c.bf16 %v3075_v62, %v2883_v17 }
 0x342   : > { %4478 = vmatmul.mubr.bf16.gmra.mrb[252].mxu0 %v3026_v38 }
 0x343   : > { %4485 = vmatprep.mubr.bf16.mxu0 %v3091_v35 }
 0x347   : > { %4325 = vmatmul.mubr.bf16.gmra.mrb[224].mxu1 %v2899_v13 }
 0x348   : > { %4332 = vmatprep.mubr.bf16.mxu1 %v8330_v58  ;;  %v8333_v58 = vpack.c.bf16 %v7693_v46, %v7691_v37 }
 0x34a   : > { %4486 = vmatmul.mubr.bf16.gmra.mrb[0].mxu0 %v7730_v26  ;;  %v3073_v26 = vld [vmem:[#allocation2 + $0x2a8] sm:$0xff] }
 0x34b   : > { %4493 = vmatprep.mubr.bf16.mxu0 %v3092_v27  ;;  %v3094_v48 = vpack.c.bf16 %v7520_v9, %v3073_v26  ;;  %v2902_v20 = vpack.c.bf16 %v3073_v26, %v3072_v32 }
 0x34f   : > { %4333 = vmatmul.mubr.bf16.gmra.mrb[228].mxu1 %v2900_v11 }
 0x350   : > { %4340 = vmatprep.mubr.bf16.mxu1 %v8331_v29 }
 0x352   : > { %4494 = vmatmul.mubr.bf16.gmra.mrb[4].mxu0 %v7736_v16 }
 0x353   : > { %4501 = vmatprep.mubr.bf16.mxu0 %v3093_v10 }
 0x357   : > { %4341 = vmatmul.mubr.bf16.gmra.mrb[232].mxu1 %v2901_v8 }
 0x358   : > { %4348 = vmatprep.mubr.bf16.mxu1 %v2966_v55 }
 0x35a   : > { %4502 = vmatmul.mubr.bf16.gmra.mrb[8].mxu0 %v7745_v34  ;;  %v5604_v43 = vpop.f32.mrb[128].mxu1 }
 0x35b   : > { %4509 = vmatprep.mubr.bf16.mxu0 %v3094_v48  ;;  %v5605_v16 = vpop.f32.mrb[129].mxu1 }
 0x35c   : > { %v5606_v41 = vadd.f32 %v5605_v16, %v5604_v43  ;;  %v5607_v30 = vpop.f32.mrb[130].mxu1  ;;  %v2904_v43 = vpack.c.bf16 %v3077_v22, %v3076_v21  ;;  %v3116_v22 = vld [vmem:[#allocation2 + $0x51] sm:$0xff] }
 0x35d   : > { %v5716_v57 = vpop.f32.mrb[160].mxu0  ;;  %v5608_v56 = vpop.f32.mrb[131].mxu1 }
 0x35e   : > { %v3941_v18 = vadd.f32 %v5606_v41, %v7836_v40  ;;  %v5609_v12 = vadd.f32 %v5608_v56, %v5607_v30  ;;  %v5717_v9 = vpop.f32.mrb[161].mxu0  ;;  %v3079_v41 = vld [vmem:[#allocation2 + $0x368] sm:$0xff] }
 0x35f   : > { %v5718_v34 = vadd.f32 %v5717_v9, %v5716_v57  ;;  %v5719_v36 = vpop.f32.mrb[162].mxu0  ;;  %4349 = vmatmul.mubr.bf16.gmra.mrb[236].mxu1 %v2902_v20  ;;  %v8334_v20 = vpack.c.bf16 %v7719_v19, %v7717_v44  ;;  %v3097_v9 = vpack.c.bf16 %v3080_v63, %v3079_v41  ;;  %v2905_v44 = vpack.c.bf16 %v3079_v41, %v3078_v0  ;;  %v3115_v0 = vld [vmem:[#allocation2 + $0x39] sm:$0xff]  ;;  %v3118_v41 = vld [vmem:[#allocation2 + $0x81] sm:$0xff] }
 0x360   : > { %v3944_v25 = vadd.f32 %v5609_v12, %v7836_v40  ;;  %v5720_v53 = vpop.f32.mrb[163].mxu0  ;;  %4356 = vmatprep.mubr.bf16.mxu1 %v8332_v39 }
 0x361   : > { %v7844_v5 = vadd.f32 %v5718_v34, %v3941_v18  ;;  %v5721_v61 = vadd.f32 %v5720_v53, %v5719_v36 }
 0x362   : > { %4510 = vmatmul.mubr.bf16.gmra.mrb[12].mxu0 %v3030_v28  ;;  %v5610_v45 = vpop.f32.mrb[132].mxu1 }
 0x363   : > { %v7846_v15 = vadd.f32 %v5721_v61, %v3944_v25  ;;  %4517 = vmatprep.mubr.bf16.mxu0 %v3095_v2  ;;  %v5611_v24 = vpop.f32.mrb[133].mxu1  ;;  %v7868_v25 = vld [vmem:[#allocation2 + $0x399] sm:$0xff] }
 0x364   : > { %v5612_v3 = vadd.f32 %v5611_v24, %v5610_v45  ;;  %v5613_v51 = vpop.f32.mrb[134].mxu1  ;;  %v2970_v45 = vpack.c.bf16 %v7868_v25, %v7775_v23 }
 0x365   : > { %v5722_v59 = vpop.f32.mrb[164].mxu0  ;;  %v5614_v50 = vpop.f32.mrb[135].mxu1 }
 0x366   : > { %v3949_v33 = vadd.f32 %v5612_v3, %v7836_v40  ;;  %v5615_v31 = vadd.f32 %v5614_v50, %v5613_v51  ;;  %v5723_v38 = vpop.f32.mrb[165].mxu0 }
 0x367   : > { %v5724_v35 = vadd.f32 %v5723_v38, %v5722_v59  ;;  %v5725_v49 = vpop.f32.mrb[166].mxu0  ;;  %4357 = vmatmul.mubr.bf16.gmra.mrb[240].mxu1 %v2903_v42  ;;  %v6381_v42 = vld [vmem:[#allocation2 + $0x8] sm:$0xff] }
 0x368   : > { %v3952_v13 = vadd.f32 %v5615_v31, %v7836_v40  ;;  %v5726_v1 = vpop.f32.mrb[167].mxu0  ;;  %4364 = vmatprep.mubr.bf16.mxu1 %v8333_v58 }
 0x369   : > { %v7853_v27 = vadd.f32 %v5724_v35, %v3949_v33  ;;  %v5727_v11 = vadd.f32 %v5726_v1, %v5725_v49 }
 0x36a   : > { %4518 = vmatmul.mubr.bf16.gmra.mrb[16].mxu0 %v7757_v47  ;;  %v5616_v29 = vpop.f32.mrb[136].mxu1 }
 0x36b   : > { %v7856_v32 = vadd.f32 %v5727_v11, %v3952_v13  ;;  %4525 = vmatprep.mubr.bf16.mxu0 %v3096_v60  ;;  %v5617_v10 = vpop.f32.mrb[137].mxu1  ;;  %v3018_v11 = vld [vmem:[#allocation2 + $0x3af] sm:$0xff] }
 0x36c   : > { %v5618_v8 = vadd.f32 %v5617_v10, %v5616_v29  ;;  %v5619_v55 = vpop.f32.mrb[138].mxu1 }
 0x36d   : > { %v5728_v26 = vpop.f32.mrb[168].mxu0  ;;  %v5620_v48 = vpop.f32.mrb[139].mxu1 }
 0x36e   : > { %v3957_v37 = vadd.f32 %v5618_v8, %v7836_v40  ;;  %v5621_v46 = vadd.f32 %v5620_v48, %v5619_v55  ;;  %v5729_v16 = vpop.f32.mrb[169].mxu0  ;;  %v3147_v8 = vpack.c.bf16 %v3116_v22, %v3115_v0  ;;  %v3124_v0 = vld [vmem:[#allocation2 + $0x141] sm:$0xff] }
 0x36f   : > { %v5730_v30 = vadd.f32 %v5729_v16, %v5728_v26  ;;  %v5731_v57 = vpop.f32.mrb[170].mxu0  ;;  %4365 = vmatmul.mubr.bf16.gmra.mrb[244].mxu1 %v2904_v43  ;;  %v3034_v43 = vpack.c.bf16 %v3018_v11, %v7765_v4 }
 0x370   : > { %v3960_v47 = vadd.f32 %v5621_v46, %v7836_v40  ;;  %v5732_v56 = vpop.f32.mrb[171].mxu0  ;;  %4372 = vmatprep.mubr.bf16.mxu1 %v8334_v20 }
 0x371   : > { %v7863_v18 = vadd.f32 %v5730_v30, %v3957_v37  ;;  %v5733_v12 = vadd.f32 %v5732_v56, %v5731_v57 }
 0x372   : > { %4526 = vmatmul.mubr.bf16.gmra.mrb[20].mxu0 %v7763_v7  ;;  %v5622_v62 = vpop.f32.mrb[140].mxu1  ;;  %v3081_v7 = vld [vmem:[#allocation2 + $0x398] sm:$0xff] }
 0x373   : > { %v7866_v34 = vadd.f32 %v5733_v12, %v3960_v47  ;;  %4533 = vmatprep.mubr.bf16.mxu0 %v3097_v9  ;;  %v5623_v36 = vpop.f32.mrb[141].mxu1  ;;  %v3098_v33 = vpack.c.bf16 %v6381_v42, %v3081_v7  ;;  %v2906_v58 = vpack.c.bf16 %v3081_v7, %v3080_v63  ;;  %v3119_v47 = vld [vmem:[#allocation2 + $0x99] sm:$0xff]  ;;  %v3117_v63 = vld [vmem:[#allocation2 + $0x69] sm:$0xff] }
 0x374   : > { %v5624_v53 = vadd.f32 %v5623_v36, %v5622_v62  ;;  %v5625_v39 = vpop.f32.mrb[142].mxu1  ;;  %v3148_v62 = vpack.c.bf16 %v3118_v41, %v3117_v63  ;;  %v3120_v36 = vld [vmem:[#allocation2 + $0xb1] sm:$0xff] }
 0x375   : > { %v5734_v28 = vpop.f32.mrb[172].mxu0  ;;  %v5626_v21 = vpop.f32.mrb[143].mxu1 }
 0x376   : > { %v3965_v19 = vadd.f32 %v5624_v53, %v7836_v40  ;;  %v5627_v61 = vadd.f32 %v5626_v21, %v5625_v39  ;;  %v5735_v2 = vpop.f32.mrb[173].mxu0 }
 0x377   : > { %v5736_v24 = vadd.f32 %v5735_v2, %v5734_v28  ;;  %v5737_v3 = vpop.f32.mrb[174].mxu0  ;;  %4373 = vmatmul.mubr.bf16.gmra.mrb[248].mxu1 %v2905_v44  ;;  %v3149_v28 = vpack.c.bf16 %v3120_v36, %v3119_v47  ;;  %v3128_v47 = vld [vmem:[#allocation2 + $0x1a1] sm:$0xff] }
 0x378   : > { %v3968_v51 = vadd.f32 %v5627_v61, %v7836_v40  ;;  %v5738_v17 = vpop.f32.mrb[175].mxu0  ;;  %4380 = vmatprep.mubr.bf16.mxu1 %v2970_v45 }
 0x379   : > { %v7874_v59 = vadd.f32 %v5736_v24, %v3965_v19  ;;  %v5739_v50 = vadd.f32 %v5738_v17, %v5737_v3  ;;  %v3122_v24 = vld [vmem:[#allocation2 + $0xe1] sm:$0xff]  ;;  %v3123_v17 = vld [vmem:[#allocation2 + $0x129] sm:$0xff] }
 0x37a   : > { %4534 = vmatmul.mubr.bf16.gmra.mrb[24].mxu0 %v7772_v54  ;;  %v5628_v31 = vpop.f32.mrb[144].mxu1 }
 0x37b   : > { %v7877_v38 = vadd.f32 %v5739_v50, %v3968_v51  ;;  %4541 = vmatprep.mubr.bf16.mxu0 %v3098_v33  ;;  %v5629_v23 = vpop.f32.mrb[145].mxu1 }
 0x37c   : > { %v5630_v35 = vadd.f32 %v5629_v23, %v5628_v31  ;;  %v5631_v49 = vpop.f32.mrb[146].mxu1  ;;  %v3150_v23 = vpack.c.bf16 %v3122_v24, %v7791_v6 }
 0x37d   : > { %v5740_v13 = vpop.f32.mrb[176].mxu0  ;;  %v5632_v1 = vpop.f32.mrb[147].mxu1 }
 0x37e   : > { %v3973_v60 = vadd.f32 %v5630_v35, %v7836_v40  ;;  %v5633_v29 = vadd.f32 %v5632_v1, %v5631_v49  ;;  %v5741_v10 = vpop.f32.mrb[177].mxu0  ;;  %v3151_v1 = vpack.c.bf16 %v3124_v0, %v3123_v17 }
 0x37f   : > { %v5742_v55 = vadd.f32 %v5741_v10, %v5740_v13  ;;  %v5743_v54 = vpop.f32.mrb[178].mxu0  ;;  %4381 = vmatmul.mubr.bf16.gmra.mrb[252].mxu1 %v2906_v58 }
 0x380   : > { %v3976_v26 = vadd.f32 %v5633_v29, %v7836_v40  ;;  %v5744_v48 = vpop.f32.mrb[179].mxu0  ;;  %6124 = vmatprep.mubr.bf16.mxu1 %v3147_v8 }
 0x381   : > { %v7882_v37 = vadd.f32 %v5742_v55, %v3973_v60  ;;  %v5745_v46 = vadd.f32 %v5744_v48, %v5743_v54  ;;  %v3126_v55 = vld [vmem:[#allocation2 + $0x171] sm:$0xff] }
 0x382   : > { %4542 = vmatmul.mubr.bf16.gmra.mrb[28].mxu0 %v3034_v43  ;;  %v5634_v16 = vpop.f32.mrb[148].mxu1 }
 0x383   : > { %v7884_v30 = vadd.f32 %v5745_v46, %v3976_v26  ;;  %v5635_v57 = vpop.f32.mrb[149].mxu1  ;;  %v3127_v26 = vld [vmem:[#allocation2 + $0x189] sm:$0xff]  ;;  %v3125_v46 = vld [vmem:[#allocation2 + $0x159] sm:$0xff] }
 0x384   : > { %v5636_v56 = vadd.f32 %v5635_v57, %v5634_v16  ;;  %v5637_v20 = vpop.f32.mrb[150].mxu1  ;;  %v3152_v57 = vpack.c.bf16 %v3126_v55, %v3125_v46  ;;  %v3136_v46 = vld [vmem:[#allocation2 + $0x291] sm:$0xff] }
 0x385   : > { %v5746_v12 = vpop.f32.mrb[180].mxu0  ;;  %v5638_v9 = vpop.f32.mrb[151].mxu1 }
 0x386   : > { %v3981_v53 = vadd.f32 %v5636_v56, %v7836_v40  ;;  %v5639_v4 = vadd.f32 %v5638_v9, %v5637_v20  ;;  %v5747_v39 = vpop.f32.mrb[181].mxu0 }
 0x387   : > { %v5748_v21 = vadd.f32 %v5747_v39, %v5746_v12  ;;  %v5749_v44 = vpop.f32.mrb[182].mxu0  ;;  %6125 = vmatmul.mubr.bf16.vlgmr.msra.gmra.mrb[0].mxu1 %v3148_v62  ;;  %v3153_v12 = vpack.c.bf16 %v3128_v47, %v3127_v26 }
 0x388   : > { %v3984_v19 = vadd.f32 %v5639_v4, %v7836_v40  ;;  %v5750_v61 = vpop.f32.mrb[183].mxu0  ;;  %6128 = vmatprep.mubr.bf16.mxu1 %v3149_v28 }
 0x389   : > { %v7888_v2 = vadd.f32 %v5748_v21, %v3981_v53  ;;  %v5751_v45 = vadd.f32 %v5750_v61, %v5749_v44  ;;  %v3130_v21 = vld [vmem:[#allocation2 + $0x1d1] sm:$0xff]  ;;  %v3131_v61 = vld [vmem:[#allocation2 + $0x219] sm:$0xff] }
 0x38a   : > { %v5640_v7 = vpop.f32.mrb[152].mxu1  ;;  %v3154_v17 = vpack.c.bf16 %v3130_v21, %v7809_v52  ;;  %v3139_v21 = vld [vmem:[#allocation2 + $0x309] sm:$0xff] }
 0x38b   : > { %v7890_v3 = vadd.f32 %v5751_v45, %v3984_v19  ;;  %v5641_v51 = vpop.f32.mrb[153].mxu1 }
 0x38c   : > { %v5642_v50 = vadd.f32 %v5641_v51, %v5640_v7  ;;  %v5643_v42 = vpop.f32.mrb[154].mxu1 }
 0x38d   : > { %v5752_v33 = vpop.f32.mrb[184].mxu0  ;;  %v5644_v31 = vpop.f32.mrb[155].mxu1 }
 0x38e   : > { %v3989_v35 = vadd.f32 %v5642_v50, %v7836_v40  ;;  %v5645_v49 = vadd.f32 %v5644_v31, %v5643_v42  ;;  %v5753_v13 = vpop.f32.mrb[185].mxu0  ;;  %v3132_v50 = vld [vmem:[#allocation2 + $0x231] sm:$0xff] }
 0x38f   : > { %v5754_v58 = vadd.f32 %v5753_v13, %v5752_v33  ;;  %v5755_v22 = vpop.f32.mrb[186].mxu0  ;;  %6129 = vmatmul.mubr.bf16.gmra.mrb[4].mxu1 %v3150_v23  ;;  %v3155_v23 = vpack.c.bf16 %v3132_v50, %v3131_v61 }
 0x390   : > { %v3992_v11 = vadd.f32 %v5645_v49, %v7836_v40  ;;  %v5756_v60 = vpop.f32.mrb[187].mxu0  ;;  %6132 = vmatprep.mubr.bf16.mxu1 %v3151_v1 }
 0x391   : > { %v7895_v29 = vadd.f32 %v5754_v58, %v3989_v35  ;;  %v5757_v10 = vadd.f32 %v5756_v60, %v5755_v22 }
 0x392   : > { %v5646_v8 = vpop.f32.mrb[156].mxu1 }
 0x393   : > { %v7897_v54 = vadd.f32 %v5757_v10, %v3992_v11  ;;  %v5647_v6 = vpop.f32.mrb[157].mxu1  ;;  %v3134_v11 = vld [vmem:[#allocation2 + $0x261] sm:$0xff]  ;;  %v3135_v10 = vld [vmem:[#allocation2 + $0x279] sm:$0xff] }
 0x394   : > { %v5648_v48 = vadd.f32 %v5647_v6, %v5646_v8  ;;  %v5649_v43 = vpop.f32.mrb[158].mxu1  ;;  %v3133_v6 = vld [vmem:[#allocation2 + $0x249] sm:$0xff]  ;;  %v3157_v47 = vpack.c.bf16 %v3136_v46, %v3135_v10 }
 0x395   : > { %v5758_v16 = vpop.f32.mrb[188].mxu0  ;;  %v5650_v41 = vpop.f32.mrb[159].mxu1 }
 0x396   : > { %v3997_v56 = vadd.f32 %v5648_v48, %v7836_v40  ;;  %v5651_v20 = vadd.f32 %v5650_v41, %v5649_v43  ;;  %v5759_v63 = vpop.f32.mrb[189].mxu0  ;;  %v3156_v43 = vpack.c.bf16 %v3134_v11, %v3133_v6 }
 0x397   : > { %v5760_v9 = vadd.f32 %v5759_v63, %v5758_v16  ;;  %v5761_v62 = vpop.f32.mrb[190].mxu0  ;;  %6133 = vmatmul.mubr.bf16.gmra.mrb[8].mxu1 %v3152_v57 }
 0x398   : > { %v4000_v36 = vadd.f32 %v5651_v20, %v7836_v40  ;;  %v5762_v53 = vpop.f32.mrb[191].mxu0  ;;  %6136 = vmatprep.mubr.bf16.mxu1 %v3153_v12 }
 0x399   : > { %v7901_v4 = vadd.f32 %v5760_v9, %v3997_v56  ;;  %v5763_v39 = vadd.f32 %v5762_v53, %v5761_v62  ;;  %v3138_v53 = vld [vmem:[#allocation2 + $0x2c1] sm:$0xff] }
 0x39a   : > { %v5652_v28 = vpop.f32.mrb[160].mxu1 }
 0x39b   : > { %v7903_v44 = vadd.f32 %v5763_v39, %v4000_v36  ;;  %v5653_v19 = vpop.f32.mrb[161].mxu1 }
 0x39c   : > { %v5654_v45 = vadd.f32 %v5653_v19, %v5652_v28  ;;  %v5655_v7 = vpop.f32.mrb[162].mxu1 }
 0x39d   : > { %v5764_v24 = vpop.f32.mrb[192].mxu0  ;;  %v5656_v51 = vpop.f32.mrb[163].mxu1 }
 0x39e   : > { %v4005_v42 = vadd.f32 %v5654_v45, %v7836_v40  ;;  %v5657_v33 = vadd.f32 %v5656_v51, %v5655_v7  ;;  %v5765_v31 = vpop.f32.mrb[193].mxu0  ;;  %v3140_v51 = vld [vmem:[#allocation2 + $0x321] sm:$0xff] }
 0x39f   : > { %v5766_v0 = vadd.f32 %v5765_v31, %v5764_v24  ;;  %v5767_v35 = vpop.f32.mrb[194].mxu0  ;;  %6137 = vmatmul.mubr.bf16.gmra.mrb[12].mxu1 %v3154_v17  ;;  %v3158_v24 = vpack.c.bf16 %v3138_v53, %v7827_v14  ;;  %v3146_v53 = vld [vmem:[#allocation2 + $0x3b1] sm:$0xff] }
 0x3a0   : > { %v4008_v49 = vadd.f32 %v5657_v33, %v7836_v40  ;;  %v5768_v13 = vpop.f32.mrb[195].mxu0  ;;  %6140 = vmatprep.mubr.bf16.mxu1 %v3155_v23  ;;  %v3159_v33 = vpack.c.bf16 %v3140_v51, %v3139_v21 }
 0x3a1   : > { %v7908_v1 = vadd.f32 %v5766_v0, %v4005_v42  ;;  %v5769_v58 = vadd.f32 %v5768_v13, %v5767_v35 }
 0x3a2   : > { %v5658_v22 = vpop.f32.mrb[164].mxu1 }
 0x3a3   : > { %v7910_v60 = vadd.f32 %v5769_v58, %v4008_v49  ;;  %v5659_v52 = vpop.f32.mrb[165].mxu1 }
 0x3a4   : > { %v5660_v8 = vadd.f32 %v5659_v52, %v5658_v22  ;;  %v5661_v55 = vpop.f32.mrb[166].mxu1  ;;  %v3142_v22 = vld [vmem:[#allocation2 + $0x351] sm:$0xff]  ;;  %v3143_v52 = vld [vmem:[#allocation2 + $0x369] sm:$0xff] }
 0x3a5   : > { %v5770_v26 = vpop.f32.mrb[196].mxu0  ;;  %v5662_v48 = vpop.f32.mrb[167].mxu1 }
 0x3a6   : > { %v4013_v16 = vadd.f32 %v5660_v8, %v7836_v40  ;;  %v5663_v41 = vadd.f32 %v5662_v48, %v5661_v55  ;;  %v5771_v57 = vpop.f32.mrb[197].mxu0  ;;  %v3141_v55 = vld [vmem:[#allocation2 + $0x339] sm:$0xff] }
 0x3a7   : > { %v5772_v56 = vadd.f32 %v5771_v57, %v5770_v26  ;;  %v5773_v20 = vpop.f32.mrb[198].mxu0  ;;  %6141 = vmatmul.mubr.bf16.gmra.mrb[16].mxu1 %v3156_v43  ;;  %v3160_v48 = vpack.c.bf16 %v3142_v22, %v3141_v55  ;;  %v3144_v43 = vld [vmem:[#allocation2 + $0x381] sm:$0xff] }
 0x3a8   : > { %v4016_v63 = vadd.f32 %v5663_v41, %v7836_v40  ;;  %v5774_v12 = vpop.f32.mrb[199].mxu0  ;;  %6144 = vmatprep.mubr.bf16.mxu1 %v3157_v47  ;;  %v3161_v57 = vpack.c.bf16 %v3144_v43, %v3143_v52 }
 0x3a9   : > { %v7914_v9 = vadd.f32 %v5772_v56, %v4013_v16  ;;  %v5775_v62 = vadd.f32 %v5774_v12, %v5773_v20 }
 0x3aa   : > { %v5664_v36 = vpop.f32.mrb[168].mxu1 }
 0x3ab   : > { %v7916_v39 = vadd.f32 %v5775_v62, %v4016_v63  ;;  %v5665_v28 = vpop.f32.mrb[169].mxu1 }
 0x3ac   : > { %v5666_v19 = vadd.f32 %v5665_v28, %v5664_v36  ;;  %v5667_v61 = vpop.f32.mrb[170].mxu1 }
 0x3ad   : > { %v5776_v45 = vpop.f32.mrb[200].mxu0  ;;  %v5668_v7 = vpop.f32.mrb[171].mxu1 }
 0x3ae   : > { %v4021_v17 = vadd.f32 %v5666_v19, %v7836_v40  ;;  %v5669_v50 = vadd.f32 %v5668_v7, %v5667_v61  ;;  %v5777_v42 = vpop.f32.mrb[201].mxu0 }
 0x3af   : > { %v5778_v31 = vadd.f32 %v5777_v42, %v5776_v45  ;;  %v5779_v23 = vpop.f32.mrb[202].mxu0  ;;  %6145 = vmatmul.mubr.bf16.gmra.mrb[20].mxu1 %v3158_v24  ;;  %v3162_v24 = vpack.c.bf16 %v3146_v53, %v7868_v25 }
 0x3b0   : > { %v4024_v0 = vadd.f32 %v5669_v50, %v7836_v40  ;;  %v5780_v35 = vpop.f32.mrb[203].mxu0  ;;  %6148 = vmatprep.mubr.bf16.mxu1 %v3159_v33 }
 0x3b1   : > { %v7921_v49 = vadd.f32 %v5778_v31, %v4021_v17  ;;  %v5781_v13 = vadd.f32 %v5780_v35, %v5779_v23 }
 0x3b2   : > { %v5670_v58 = vpop.f32.mrb[172].mxu1 }
 0x3b3   : > { %v7923_v11 = vadd.f32 %v5781_v13, %v4024_v0  ;;  %v5671_v14 = vpop.f32.mrb[173].mxu1 }
 0x3b4   : > { %v5672_v10 = vadd.f32 %v5671_v14, %v5670_v58  ;;  %v5673_v8 = vpop.f32.mrb[174].mxu1 }
 0x3b5   : > { %v5782_v6 = vpop.f32.mrb[204].mxu0  ;;  %v5674_v26 = vpop.f32.mrb[175].mxu1 }
 0x3b6   : > { %v4029_v46 = vadd.f32 %v5672_v10, %v7836_v40  ;;  %v5675_v16 = vadd.f32 %v5674_v26, %v5673_v8  ;;  %v5783_v41 = vpop.f32.mrb[205].mxu0 }
 0x3b7   : > { %v5784_v47 = vadd.f32 %v5783_v41, %v5782_v6  ;;  %v5785_v56 = vpop.f32.mrb[206].mxu0  ;;  %6149 = vmatmul.mubr.bf16.gmra.mrb[24].mxu1 %v3160_v48 }
 0x3b8   : > { %v4032_v20 = vadd.f32 %v5675_v16, %v7836_v40  ;;  %v5786_v63 = vpop.f32.mrb[207].mxu0  ;;  %6152 = vmatprep.mubr.bf16.mxu1 %v3161_v57 }
 0x3b9   : > { %v7927_v12 = vadd.f32 %v5784_v47, %v4029_v46  ;;  %v5787_v62 = vadd.f32 %v5786_v63, %v5785_v56 }
 0x3ba   : > { %v5676_v36 = vpop.f32.mrb[176].mxu1 }
 0x3bb   : > { %v7929_v28 = vadd.f32 %v5787_v62, %v4032_v20  ;;  %v5677_v21 = vpop.f32.mrb[177].mxu1 }
 0x3bc   : > { %v5678_v19 = vadd.f32 %v5677_v21, %v5676_v36  ;;  %v5679_v61 = vpop.f32.mrb[178].mxu1 }
 0x3bd   : > { %v5788_v45 = vpop.f32.mrb[208].mxu0  ;;  %v5680_v7 = vpop.f32.mrb[179].mxu1 }
 0x3be   : > { %v4037_v51 = vadd.f32 %v5678_v19, %v7836_v40  ;;  %v5681_v17 = vadd.f32 %v5680_v7, %v5679_v61  ;;  %v5789_v50 = vpop.f32.mrb[209].mxu0 }
 0x3bf   : > { %v5790_v42 = vadd.f32 %v5789_v50, %v5788_v45  ;;  %v5791_v33 = vpop.f32.mrb[210].mxu0  ;;  %6153 = vmatmul.mubr.bf16.gmra.mrb[28].mxu1 %v3162_v24 }
 0x3c0   : > { %v4040_v31 = vadd.f32 %v5681_v17, %v7836_v40  ;;  %v5792_v23 = vpop.f32.mrb[211].mxu0 }
 0x3c1   : > { %v7934_v0 = vadd.f32 %v5790_v42, %v4037_v51  ;;  %v5793_v35 = vadd.f32 %v5792_v23, %v5791_v33 }
 0x3c2   : > { %v5682_v13 = vpop.f32.mrb[180].mxu1 }
 0x3c3   : > { %v7936_v58 = vadd.f32 %v5793_v35, %v4040_v31  ;;  %v5683_v22 = vpop.f32.mrb[181].mxu1 }
 0x3c4   : > { %v5684_v14 = vadd.f32 %v5683_v22, %v5682_v13  ;;  %v5685_v52 = vpop.f32.mrb[182].mxu1 }
 0x3c5   : > { %v5794_v25 = vpop.f32.mrb[212].mxu0  ;;  %v5686_v10 = vpop.f32.mrb[183].mxu1 }
 0x3c6   : > { %v4045_v8 = vadd.f32 %v5684_v14, %v7836_v40  ;;  %v5687_v55 = vadd.f32 %v5686_v10, %v5685_v52  ;;  %v5795_v6 = vpop.f32.mrb[213].mxu0 }
 0x3c7   : > { %v5796_v26 = vadd.f32 %v5795_v6, %v5794_v25  ;;  %v5797_v48 = vpop.f32.mrb[214].mxu0 }
 0x3c8   : > { %v4048_v43 = vadd.f32 %v5687_v55, %v7836_v40  ;;  %v5798_v46 = vpop.f32.mrb[215].mxu0 }
 0x3c9   : > { %v7940_v16 = vadd.f32 %v5796_v26, %v4045_v8  ;;  %v5799_v41 = vadd.f32 %v5798_v46, %v5797_v48 }
 0x3ca   : > { %v5688_v57 = vpop.f32.mrb[184].mxu1 }
 0x3cb   : > { %v7942_v47 = vadd.f32 %v5799_v41, %v4048_v43  ;;  %v5689_v56 = vpop.f32.mrb[185].mxu1 }
 0x3cc   : > { %v5690_v20 = vadd.f32 %v5689_v56, %v5688_v57  ;;  %v5691_v63 = vpop.f32.mrb[186].mxu1 }
 0x3cd   : > { %v5800_v62 = vpop.f32.mrb[216].mxu0  ;;  %v5692_v36 = vpop.f32.mrb[187].mxu1 }
 0x3ce   : > { %v4053_v53 = vadd.f32 %v5690_v20, %v7836_v40  ;;  %v5693_v21 = vadd.f32 %v5692_v36, %v5691_v63  ;;  %v5801_v19 = vpop.f32.mrb[217].mxu0 }
 0x3cf   : > { %v5802_v61 = vadd.f32 %v5801_v19, %v5800_v62  ;;  %v5803_v45 = vpop.f32.mrb[218].mxu0 }
 0x3d0   : > { %v4056_v7 = vadd.f32 %v5693_v21, %v7836_v40  ;;  %v5804_v24 = vpop.f32.mrb[219].mxu0 }
 0x3d1   : > { %v7946_v51 = vadd.f32 %v5802_v61, %v4053_v53  ;;  %v5805_v17 = vadd.f32 %v5804_v24, %v5803_v45 }
 0x3d2   : > { %v5694_v50 = vpop.f32.mrb[188].mxu1 }
 0x3d3   : > { %v7948_v42 = vadd.f32 %v5805_v17, %v4056_v7  ;;  %v5695_v33 = vpop.f32.mrb[189].mxu1 }
 0x3d4   : > { %v5696_v31 = vadd.f32 %v5695_v33, %v5694_v50  ;;  %v5697_v23 = vpop.f32.mrb[190].mxu1 }
 0x3d5   : > { %v5806_v35 = vpop.f32.mrb[220].mxu0  ;;  %v5698_v13 = vpop.f32.mrb[191].mxu1 }
 0x3d6   : > { %v4061_v22 = vadd.f32 %v5696_v31, %v7836_v40  ;;  %v5699_v14 = vadd.f32 %v5698_v13, %v5697_v23  ;;  %v5807_v52 = vpop.f32.mrb[221].mxu0 }
 0x3d7   : > { %v5808_v25 = vadd.f32 %v5807_v52, %v5806_v35  ;;  %v5809_v10 = vpop.f32.mrb[222].mxu0 }
 0x3d8   : > { %v4064_v8 = vadd.f32 %v5699_v14, %v7836_v40  ;;  %v5810_v55 = vpop.f32.mrb[223].mxu0 }
 0x3d9   : > { %v7952_v6 = vadd.f32 %v5808_v25, %v4061_v22  ;;  %v5811_v26 = vadd.f32 %v5810_v55, %v5809_v10 }
 0x3da   : > { %v5828_v48 = vpop.f32.mrb[192].mxu1 }
 0x3db   : > { %v7954_v43 = vadd.f32 %v5811_v26, %v4064_v8  ;;  %v5829_v46 = vpop.f32.mrb[193].mxu1 }
 0x3dc   : > { %v5830_v41 = vadd.f32 %v5829_v46, %v5828_v48  ;;  %v5831_v57 = vpop.f32.mrb[194].mxu1 }
 0x3dd   : > { %v5940_v56 = vpop.f32.mrb[224].mxu0  ;;  %v5832_v20 = vpop.f32.mrb[195].mxu1 }
 0x3de   : > { %v4263_v63 = vadd.f32 %v5830_v41, %v7844_v5  ;;  %v5833_v62 = vadd.f32 %v5832_v20, %v5831_v57  ;;  %v5941_v36 = vpop.f32.mrb[225].mxu0 }
 0x3df   : > { %v5942_v53 = vadd.f32 %v5941_v36, %v5940_v56  ;;  %v5943_v21 = vpop.f32.mrb[226].mxu0 }
 0x3e0   : > { %v4266_v40 = vadd.f32 %v5833_v62, %v7846_v15  ;;  %v5944_v19 = vpop.f32.mrb[227].mxu0 }
 0x3e1   : > { %v5945_v61 = vadd.f32 %v5944_v19, %v5943_v21  ;;  %v7958_v45 = vadd.f32 %v5942_v53, %v4263_v63 }
 0x3e2   : > { %v5834_v7 = vpop.f32.mrb[196].mxu1 }
 0x3e3   : > { %v5835_v24 = vpop.f32.mrb[197].mxu1  ;;  %v7960_v17 = vadd.f32 %v5945_v61, %v4266_v40 }
 0x3e4   : > { %v5836_v50 = vadd.f32 %v5835_v24, %v5834_v7  ;;  %v5837_v33 = vpop.f32.mrb[198].mxu1 }
 0x3e5   : > { %v5946_v31 = vpop.f32.mrb[228].mxu0  ;;  %v5838_v23 = vpop.f32.mrb[199].mxu1 }
 0x3e6   : > { %v4271_v5 = vadd.f32 %v5836_v50, %v7853_v27  ;;  %v5839_v35 = vadd.f32 %v5838_v23, %v5837_v33  ;;  %v5947_v13 = vpop.f32.mrb[229].mxu0 }
 0x3e7   : > { %v5948_v22 = vadd.f32 %v5947_v13, %v5946_v31  ;;  %v5949_v14 = vpop.f32.mrb[230].mxu0 }
 0x3e8   : > { %v4274_v15 = vadd.f32 %v5839_v35, %v7856_v32  ;;  %v5950_v52 = vpop.f32.mrb[231].mxu0 }
 0x3e9   : > { %v5951_v25 = vadd.f32 %v5950_v52, %v5949_v14  ;;  %v7964_v10 = vadd.f32 %v5948_v22, %v4271_v5 }
 0x3ea   : > { %v5840_v8 = vpop.f32.mrb[200].mxu1 }
 0x3eb   : > { %v5841_v55 = vpop.f32.mrb[201].mxu1  ;;  %v7966_v26 = vadd.f32 %v5951_v25, %v4274_v15 }
 0x3ec   : > { %v5842_v48 = vadd.f32 %v5841_v55, %v5840_v8  ;;  %v5843_v46 = vpop.f32.mrb[202].mxu1 }
 0x3ed   : > { %v5952_v41 = vpop.f32.mrb[232].mxu0  ;;  %v5844_v57 = vpop.f32.mrb[203].mxu1 }
 0x3ee   : > { %v4279_v27 = vadd.f32 %v5842_v48, %v7863_v18  ;;  %v5845_v56 = vadd.f32 %v5844_v57, %v5843_v46  ;;  %v5953_v20 = vpop.f32.mrb[233].mxu0 }
 0x3ef   : > { %v5954_v63 = vadd.f32 %v5953_v20, %v5952_v41  ;;  %v5955_v62 = vpop.f32.mrb[234].mxu0 }
 0x3f0   : > { %v4282_v32 = vadd.f32 %v5845_v56, %v7866_v34  ;;  %v5956_v36 = vpop.f32.mrb[235].mxu0 }
 0x3f1   : > { %v5957_v53 = vadd.f32 %v5956_v36, %v5955_v62  ;;  %v7970_v21 = vadd.f32 %v5954_v63, %v4279_v27 }
 0x3f2   : > { %v5846_v40 = vpop.f32.mrb[204].mxu1 }
 0x3f3   : > { %v5847_v19 = vpop.f32.mrb[205].mxu1  ;;  %v7972_v61 = vadd.f32 %v5957_v53, %v4282_v32 }
 0x3f4   : > { %v5848_v7 = vadd.f32 %v5847_v19, %v5846_v40  ;;  %v5849_v24 = vpop.f32.mrb[206].mxu1 }
 0x3f5   : > { %v5958_v50 = vpop.f32.mrb[236].mxu0  ;;  %v5850_v33 = vpop.f32.mrb[207].mxu1 }
 0x3f6   : > { %v4287_v18 = vadd.f32 %v5848_v7, %v7874_v59  ;;  %v5851_v31 = vadd.f32 %v5850_v33, %v5849_v24  ;;  %v5959_v23 = vpop.f32.mrb[237].mxu0 }
 0x3f7   : > { %v5960_v5 = vadd.f32 %v5959_v23, %v5958_v50  ;;  %v5961_v35 = vpop.f32.mrb[238].mxu0 }
 0x3f8   : > { %v4290_v34 = vadd.f32 %v5851_v31, %v7877_v38  ;;  %v5962_v13 = vpop.f32.mrb[239].mxu0 }
 0x3f9   : > { %v5963_v22 = vadd.f32 %v5962_v13, %v5961_v35  ;;  %v7976_v14 = vadd.f32 %v5960_v5, %v4287_v18 }
 0x3fa   : > { %v5852_v15 = vpop.f32.mrb[208].mxu1 }
 0x3fb   : > { %v5853_v52 = vpop.f32.mrb[209].mxu1  ;;  %v7978_v25 = vadd.f32 %v5963_v22, %v4290_v34 }
 0x3fc   : > { %v5854_v8 = vadd.f32 %v5853_v52, %v5852_v15  ;;  %v5855_v55 = vpop.f32.mrb[210].mxu1 }
 0x3fd   : > { %v5964_v48 = vpop.f32.mrb[240].mxu0  ;;  %v5856_v46 = vpop.f32.mrb[211].mxu1 }
 0x3fe   : > { %v4295_v59 = vadd.f32 %v5854_v8, %v7882_v37  ;;  %v5857_v41 = vadd.f32 %v5856_v46, %v5855_v55  ;;  %v5965_v57 = vpop.f32.mrb[241].mxu0 }
 0x3ff   : > { %v5966_v27 = vadd.f32 %v5965_v57, %v5964_v48  ;;  %v5967_v56 = vpop.f32.mrb[242].mxu0 }
 0x400   : > { %v4298_v38 = vadd.f32 %v5857_v41, %v7884_v30  ;;  %v5968_v20 = vpop.f32.mrb[243].mxu0 }
 0x401   : > { %v5969_v63 = vadd.f32 %v5968_v20, %v5967_v56  ;;  %v7982_v62 = vadd.f32 %v5966_v27, %v4295_v59 }
 0x402   : > { %v5858_v32 = vpop.f32.mrb[212].mxu1 }
 0x403   : > { %v5859_v36 = vpop.f32.mrb[213].mxu1  ;;  %v7984_v53 = vadd.f32 %v5969_v63, %v4298_v38 }
 0x404   : > { %v5860_v40 = vadd.f32 %v5859_v36, %v5858_v32  ;;  %v5861_v19 = vpop.f32.mrb[214].mxu1 }
 0x405   : > { %v5970_v7 = vpop.f32.mrb[244].mxu0  ;;  %v5862_v24 = vpop.f32.mrb[215].mxu1 }
 0x406   : > { %v4303_v37 = vadd.f32 %v5860_v40, %v7888_v2  ;;  %v5863_v50 = vadd.f32 %v5862_v24, %v5861_v19  ;;  %v5971_v33 = vpop.f32.mrb[245].mxu0 }
 0x407   : > { %v5972_v18 = vadd.f32 %v5971_v33, %v5970_v7  ;;  %v5973_v31 = vpop.f32.mrb[246].mxu0 }
 0x408   : > { %v4306_v30 = vadd.f32 %v5863_v50, %v7890_v3  ;;  %v5974_v23 = vpop.f32.mrb[247].mxu0 }
 0x409   : > { %v5975_v5 = vadd.f32 %v5974_v23, %v5973_v31  ;;  %v7988_v35 = vadd.f32 %v5972_v18, %v4303_v37 }
 0x40a   : > { %v5864_v34 = vpop.f32.mrb[216].mxu1 }
 0x40b   : > { %v5865_v13 = vpop.f32.mrb[217].mxu1  ;;  %v7990_v22 = vadd.f32 %v5975_v5, %v4306_v30 }
 0x40c   : > { %v5866_v15 = vadd.f32 %v5865_v13, %v5864_v34  ;;  %v5867_v52 = vpop.f32.mrb[218].mxu1 }
 0x40d   : > { %v5976_v8 = vpop.f32.mrb[248].mxu0  ;;  %v5868_v55 = vpop.f32.mrb[219].mxu1 }
 0x40e   : > { %v4311_v2 = vadd.f32 %v5866_v15, %v7895_v29  ;;  %v5869_v48 = vadd.f32 %v5868_v55, %v5867_v52  ;;  %v5977_v46 = vpop.f32.mrb[249].mxu0 }
 0x40f   : > { %v5978_v59 = vadd.f32 %v5977_v46, %v5976_v8  ;;  %v5979_v41 = vpop.f32.mrb[250].mxu0 }
 0x410   : > { %v4314_v3 = vadd.f32 %v5869_v48, %v7897_v54  ;;  %v5980_v57 = vpop.f32.mrb[251].mxu0 }
 0x411   : > { %v5981_v27 = vadd.f32 %v5980_v57, %v5979_v41  ;;  %v7994_v56 = vadd.f32 %v5978_v59, %v4311_v2 }
 0x412   : > { %v5870_v38 = vpop.f32.mrb[220].mxu1 }
 0x413   : > { %v5871_v20 = vpop.f32.mrb[221].mxu1  ;;  %v7996_v63 = vadd.f32 %v5981_v27, %v4314_v3 }
 0x414   : > { %v5872_v32 = vadd.f32 %v5871_v20, %v5870_v38  ;;  %v5873_v36 = vpop.f32.mrb[222].mxu1 }
 0x415   : > { %v5982_v40 = vpop.f32.mrb[252].mxu0  ;;  %v5874_v19 = vpop.f32.mrb[223].mxu1 }
 0x416   : > { %v4319_v29 = vadd.f32 %v5872_v32, %v7901_v4  ;;  %v5875_v7 = vadd.f32 %v5874_v19, %v5873_v36  ;;  %v5983_v24 = vpop.f32.mrb[253].mxu0 }
 0x417   : > { %v5984_v37 = vadd.f32 %v5983_v24, %v5982_v40  ;;  %v5985_v50 = vpop.f32.mrb[254].mxu0 }
 0x418   : > { %v4322_v54 = vadd.f32 %v5875_v7, %v7903_v44  ;;  %v5986_v33 = vpop.f32.mrb[255].mxu0 }
 0x419   : > { %v5987_v18 = vadd.f32 %v5986_v33, %v5985_v50  ;;  %v8000_v31 = vadd.f32 %v5984_v37, %v4319_v29 }
 0x41a   : > { %v5876_v30 = vpop.f32.mrb[224].mxu1 }
 0x41b   : > { %v5877_v23 = vpop.f32.mrb[225].mxu1  ;;  %v8002_v5 = vadd.f32 %v5987_v18, %v4322_v54 }
 0x41c   : > { %v5878_v34 = vadd.f32 %v5877_v23, %v5876_v30  ;;  %v5879_v13 = vpop.f32.mrb[226].mxu1 }
 0x41d   : > { %v5988_v15 = vpop.f32.mrb[0].mxu0  ;;  %v5880_v52 = vpop.f32.mrb[227].mxu1 }
 0x41e   : > { %v4327_v4 = vadd.f32 %v5878_v34, %v7908_v1  ;;  %v5881_v8 = vadd.f32 %v5880_v52, %v5879_v13  ;;  %v5989_v55 = vpop.f32.mrb[1].mxu0 }
 0x41f   : > { %v5990_v2 = vadd.f32 %v5989_v55, %v5988_v15  ;;  %v5991_v48 = vpop.f32.mrb[2].mxu0 }
 0x420   : > { %v4330_v44 = vadd.f32 %v5881_v8, %v7910_v60  ;;  %v5992_v46 = vpop.f32.mrb[3].mxu0 }
 0x421   : > { %v5993_v59 = vadd.f32 %v5992_v46, %v5991_v48  ;;  %v8006_v41 = vadd.f32 %v5990_v2, %v4327_v4 }
 0x422   : > { %v5882_v3 = vpop.f32.mrb[228].mxu1 }
 0x423   : > { %v5883_v57 = vpop.f32.mrb[229].mxu1  ;;  %v8008_v27 = vadd.f32 %v5993_v59, %v4330_v44 }
 0x424   : > { %v5884_v38 = vadd.f32 %v5883_v57, %v5882_v3  ;;  %v5885_v20 = vpop.f32.mrb[230].mxu1 }
 0x425   : > { %v5994_v32 = vpop.f32.mrb[4].mxu0  ;;  %v5886_v36 = vpop.f32.mrb[231].mxu1 }
 0x426   : > { %v4335_v1 = vadd.f32 %v5884_v38, %v7914_v9  ;;  %v5887_v40 = vadd.f32 %v5886_v36, %v5885_v20  ;;  %v5995_v19 = vpop.f32.mrb[5].mxu0 }
 0x427   : > { %v5996_v29 = vadd.f32 %v5995_v19, %v5994_v32  ;;  %v5997_v7 = vpop.f32.mrb[6].mxu0 }
 0x428   : > { %v4338_v60 = vadd.f32 %v5887_v40, %v7916_v39  ;;  %v5998_v24 = vpop.f32.mrb[7].mxu0 }
 0x429   : > { %v5999_v37 = vadd.f32 %v5998_v24, %v5997_v7  ;;  %v8012_v50 = vadd.f32 %v5996_v29, %v4335_v1 }
 0x42a   : > { %v5888_v54 = vpop.f32.mrb[232].mxu1 }
 0x42b   : > { %v5889_v33 = vpop.f32.mrb[233].mxu1  ;;  %v8014_v18 = vadd.f32 %v5999_v37, %v4338_v60 }
 0x42c   : > { %v5890_v30 = vadd.f32 %v5889_v33, %v5888_v54  ;;  %v5891_v23 = vpop.f32.mrb[234].mxu1 }
 0x42d   : > { %v6000_v34 = vpop.f32.mrb[8].mxu0  ;;  %v5892_v13 = vpop.f32.mrb[235].mxu1 }
 0x42e   : > { %v4343_v9 = vadd.f32 %v5890_v30, %v7921_v49  ;;  %v5893_v15 = vadd.f32 %v5892_v13, %v5891_v23  ;;  %v6001_v52 = vpop.f32.mrb[9].mxu0 }
 0x42f   : > { %v6002_v4 = vadd.f32 %v6001_v52, %v6000_v34  ;;  %v6003_v8 = vpop.f32.mrb[10].mxu0 }
 0x430   : > { %v4346_v39 = vadd.f32 %v5893_v15, %v7923_v11  ;;  %v6004_v55 = vpop.f32.mrb[11].mxu0 }
 0x431   : > { %v6005_v2 = vadd.f32 %v6004_v55, %v6003_v8  ;;  %v8018_v48 = vadd.f32 %v6002_v4, %v4343_v9 }
 0x432   : > { %v5894_v44 = vpop.f32.mrb[236].mxu1 }
 0x433   : > { %v5895_v46 = vpop.f32.mrb[237].mxu1  ;;  %v8020_v59 = vadd.f32 %v6005_v2, %v4346_v39 }
 0x434   : > { %v5896_v3 = vadd.f32 %v5895_v46, %v5894_v44  ;;  %v5897_v57 = vpop.f32.mrb[238].mxu1 }
 0x435   : > { %v6006_v38 = vpop.f32.mrb[12].mxu0  ;;  %v5898_v20 = vpop.f32.mrb[239].mxu1 }
 0x436   : > { %v4351_v49 = vadd.f32 %v5896_v3, %v7927_v12  ;;  %v5899_v32 = vadd.f32 %v5898_v20, %v5897_v57  ;;  %v6007_v36 = vpop.f32.mrb[13].mxu0 }
 0x437   : > { %v6008_v1 = vadd.f32 %v6007_v36, %v6006_v38  ;;  %v6009_v40 = vpop.f32.mrb[14].mxu0 }
 0x438   : > { %v4354_v11 = vadd.f32 %v5899_v32, %v7929_v28  ;;  %v6010_v19 = vpop.f32.mrb[15].mxu0 }
 0x439   : > { %v6011_v29 = vadd.f32 %v6010_v19, %v6009_v40  ;;  %v8024_v7 = vadd.f32 %v6008_v1, %v4351_v49 }
 0x43a   : > { %v5900_v60 = vpop.f32.mrb[240].mxu1 }
 0x43b   : > { %v5901_v24 = vpop.f32.mrb[241].mxu1  ;;  %v8026_v37 = vadd.f32 %v6011_v29, %v4354_v11 }
 0x43c   : > { %v5902_v54 = vadd.f32 %v5901_v24, %v5900_v60  ;;  %v5903_v33 = vpop.f32.mrb[242].mxu1 }
 0x43d   : > { %v6012_v30 = vpop.f32.mrb[16].mxu0  ;;  %v5904_v23 = vpop.f32.mrb[243].mxu1 }
 0x43e   : > { %v4359_v12 = vadd.f32 %v5902_v54, %v7934_v0  ;;  %v5905_v34 = vadd.f32 %v5904_v23, %v5903_v33  ;;  %v6013_v13 = vpop.f32.mrb[17].mxu0 }
 0x43f   : > { %v6014_v9 = vadd.f32 %v6013_v13, %v6012_v30  ;;  %v6015_v15 = vpop.f32.mrb[18].mxu0 }
 0x440   : > { %v4362_v28 = vadd.f32 %v5905_v34, %v7936_v58  ;;  %v6016_v52 = vpop.f32.mrb[19].mxu0 }
 0x441   : > { %v6017_v4 = vadd.f32 %v6016_v52, %v6015_v15  ;;  %v8030_v8 = vadd.f32 %v6014_v9, %v4359_v12 }
 0x442   : > { %v5906_v39 = vpop.f32.mrb[244].mxu1 }
 0x443   : > { %v5907_v55 = vpop.f32.mrb[245].mxu1  ;;  %v8032_v2 = vadd.f32 %v6017_v4, %v4362_v28 }
 0x444   : > { %v5908_v44 = vadd.f32 %v5907_v55, %v5906_v39  ;;  %v5909_v46 = vpop.f32.mrb[246].mxu1 }
 0x445   : > { %v6018_v3 = vpop.f32.mrb[20].mxu0  ;;  %v5910_v57 = vpop.f32.mrb[247].mxu1 }
 0x446   : > { %v4367_v0 = vadd.f32 %v5908_v44, %v7940_v16  ;;  %v5911_v38 = vadd.f32 %v5910_v57, %v5909_v46  ;;  %v6019_v20 = vpop.f32.mrb[21].mxu0 }
 0x447   : > { %v6020_v49 = vadd.f32 %v6019_v20, %v6018_v3  ;;  %v6021_v32 = vpop.f32.mrb[22].mxu0 }
 0x448   : > { %v4370_v58 = vadd.f32 %v5911_v38, %v7942_v47  ;;  %v6022_v36 = vpop.f32.mrb[23].mxu0 }
 0x449   : > { %v6023_v1 = vadd.f32 %v6022_v36, %v6021_v32  ;;  %v8036_v40 = vadd.f32 %v6020_v49, %v4367_v0  ;;  %v4713_v36 = vld [vmem:[%s6759_s6 + $0x10] sm:$0xff] }
 0x44a   : > { %v5912_v11 = vpop.f32.mrb[248].mxu1 }
 0x44b   : > { %v5913_v19 = vpop.f32.mrb[249].mxu1  ;;  %v8038_v29 = vadd.f32 %v6023_v1, %v4370_v58 }
 0x44c   : > { %v5914_v60 = vadd.f32 %v5913_v19, %v5912_v11  ;;  %v5915_v24 = vpop.f32.mrb[250].mxu1  ;;  %v4711_v19 = vld [vmem:[%s6759_s6] sm:$0xff] }
 0x44d   : > { %v6024_v54 = vpop.f32.mrb[24].mxu0  ;;  %v5916_v33 = vpop.f32.mrb[251].mxu1 }
 0x44e   : > { %v4375_v16 = vadd.f32 %v5914_v60, %v7946_v51  ;;  %v5917_v30 = vadd.f32 %v5916_v33, %v5915_v24  ;;  %v6025_v23 = vpop.f32.mrb[25].mxu0 }
 0x44f   : > { %v6026_v12 = vadd.f32 %v6025_v23, %v6024_v54  ;;  %v6027_v34 = vpop.f32.mrb[26].mxu0  ;;  %v4714_v54 = vld [vmem:[%s6759_s6 + $0x18] sm:$0xff] }
 0x450   : > { %v4378_v47 = vadd.f32 %v5917_v30, %v7948_v42  ;;  %v6028_v13 = vpop.f32.mrb[27].mxu0  ;;  %v4712_v30 = vld [vmem:[%s6759_s6 + $0x8] sm:$0xff] }
 0x451   : > { %v6029_v9 = vadd.f32 %v6028_v13, %v6027_v34  ;;  %v8042_v15 = vadd.f32 %v6026_v12, %v4375_v16 }
 0x452   : > { %v5918_v28 = vpop.f32.mrb[252].mxu1 }
 0x453   : > { %v5919_v52 = vpop.f32.mrb[253].mxu1  ;;  %v8044_v4 = vadd.f32 %v6029_v9, %v4378_v47 }
 0x454   : > { %v5920_v39 = vadd.f32 %v5919_v52, %v5918_v28  ;;  %v5921_v55 = vpop.f32.mrb[254].mxu1  ;;  %v4717_v28 = vld [vmem:[%s6759_s6 + $0x30] sm:$0xff] }
 0x455   : > { %v6030_v44 = vpop.f32.mrb[28].mxu0  ;;  %v5922_v51 = vpop.f32.mrb[255].mxu1 }
 0x456   : > { %v4383_v46 = vadd.f32 %v5920_v39, %v7952_v6  ;;  %v5923_v3 = vadd.f32 %v5922_v51, %v5921_v55  ;;  %v6031_v57 = vpop.f32.mrb[29].mxu0  ;;  %v4715_v39 = vld [vmem:[%s6759_s6 + $0x20] sm:$0xff]  ;;  %v4718_v51 = vld [vmem:[%s6759_s6 + $0x38] sm:$0xff] }
 0x457   : > { %v6032_v42 = vadd.f32 %v6031_v57, %v6030_v44  ;;  %v6033_v0 = vpop.f32.mrb[30].mxu0 }
 0x458   : > { %v4386_v38 = vadd.f32 %v5923_v3, %v7954_v43  ;;  %v6034_v20 = vpop.f32.mrb[31].mxu0 }
 0x459   : > { %v6035_v49 = vadd.f32 %v6034_v20, %v6033_v0  ;;  %v8048_v32 = vadd.f32 %v6032_v42, %v4383_v46  ;;  %v4716_v42 = vld [vmem:[%s6759_s6 + $0x28] sm:$0xff] }
 0x45a   : > { %v6126_v58 = vpop.f32.mrb[0].mxu1 }
 0x45b   : > { %v4593_v1 = vadd.f32 %v6126_v58, %v7964_v10  ;;  %v4584_v11 = vpop.f32.mrb[1].mxu1  ;;  %v8053_v6 = vadd.f32 %v6035_v49, %v4386_v38 }
 0x45c   : > { %v4585_v60 = vadd.f32 %v4584_v11, %v7958_v45  ;;  %v6127_v24 = vpop.f32.mrb[2].mxu1  ;;  %v4721_v11 = vld [vmem:[%s6759_s6 + $0x50] sm:$0xff] }
 0x45d   : > { %v4745_v33 = vadd.f32 %v4713_v36, %v4593_v1  ;;  %v4596_v43 = vadd.f32 %v6127_v24, %v7966_v26  ;;  %v4587_v16 = vpop.f32.mrb[3].mxu1 }
 0x45e   : > { %v4743_v23 = vadd.f32 %v4711_v19, %v4585_v60  ;;  %v4588_v12 = vadd.f32 %v4587_v16, %v7960_v17  ;;  %v4719_v60 = vld [vmem:[%s6759_s6 + $0x40] sm:$0xff] }
 0x45f   : > { %v4777_v10 = vmax.f32 %v4745_v33, 0.0  ;;  %v4746_v34 = vadd.f32 %v4714_v54, %v4596_v43  ;;  %v4722_v54 = vld [vmem:[%s6759_s6 + $0x58] sm:$0xff] }
 0x460   : > { %v4775_v47 = vmax.f32 %v4743_v23, 0.0  ;;  %v4744_v13 = vadd.f32 %v4712_v30, %v4588_v12  ;;  %v4720_v30 = vld [vmem:[%s6759_s6 + $0x48] sm:$0xff] }
 0x461   : > { %4809 = vst [vmem:[%s8062_s11 + $0x10] sm:$0xff] %v4777_v10  ;;  %v4778_v45 = vmax.f32 %v4746_v34, 0.0 }
 0x462   : > { %4807 = vst [vmem:[%s8062_s11] sm:$0xff] %v4775_v47  ;;  %v4776_v26 = vmax.f32 %v4744_v13, 0.0  ;;  %v6130_v9 = vpop.f32.mrb[4].mxu1 }
 0x463   : > { %4810 = vst [vmem:[%s8062_s11 + $0x18] sm:$0xff] %v4778_v45  ;;  %v4609_v17 = vadd.f32 %v6130_v9, %v7976_v14  ;;  %v4600_v52 = vpop.f32.mrb[5].mxu1 }
 0x464   : > { %4808 = vst [vmem:[%s8062_s11 + $0x8] sm:$0xff] %v4776_v26  ;;  %v4601_v55 = vadd.f32 %v4600_v52, %v7970_v21  ;;  %v6131_v44 = vpop.f32.mrb[6].mxu1  ;;  %v4725_v26 = vld [vmem:[%s6759_s6 + $0x70] sm:$0xff]  ;;  %v4726_v52 = vld [vmem:[%s6759_s6 + $0x78] sm:$0xff] }
 0x465   : > { %v4749_v46 = vadd.f32 %v4717_v28, %v4609_v17  ;;  %v4612_v3 = vadd.f32 %v6131_v44, %v7978_v25  ;;  %v4603_v57 = vpop.f32.mrb[7].mxu1  ;;  %v4723_v28 = vld [vmem:[%s6759_s6 + $0x60] sm:$0xff] }
 0x466   : > { %v4747_v0 = vadd.f32 %v4715_v39, %v4601_v55  ;;  %v4604_v14 = vadd.f32 %v4603_v57, %v7972_v61 }
 0x467   : > { %v4781_v38 = vmax.f32 %v4749_v46, 0.0  ;;  %v4750_v20 = vadd.f32 %v4718_v51, %v4612_v3  ;;  %v4724_v51 = vld [vmem:[%s6759_s6 + $0x68] sm:$0xff] }
 0x468   : > { %v4779_v49 = vmax.f32 %v4747_v0, 0.0  ;;  %v4748_v58 = vadd.f32 %v4716_v42, %v4604_v14 }
 0x469   : > { %4813 = vst [vmem:[%s8062_s11 + $0x30] sm:$0xff] %v4781_v38  ;;  %v4782_v21 = vmax.f32 %v4750_v20, 0.0  ;;  %v4729_v20 = vld [vmem:[%s6759_s6 + $0x90] sm:$0xff] }
 0x46a   : > { %4811 = vst [vmem:[%s8062_s11 + $0x20] sm:$0xff] %v4779_v49  ;;  %v4780_v36 = vmax.f32 %v4748_v58, 0.0  ;;  %v6134_v1 = vpop.f32.mrb[8].mxu1  ;;  %v4727_v58 = vld [vmem:[%s6759_s6 + $0x80] sm:$0xff] }
 0x46b   : > { %4814 = vst [vmem:[%s8062_s11 + $0x38] sm:$0xff] %v4782_v21  ;;  %v4625_v25 = vadd.f32 %v6134_v1, %v7988_v35  ;;  %v4616_v19 = vpop.f32.mrb[9].mxu1 }
 0x46c   : > { %4812 = vst [vmem:[%s8062_s11 + $0x28] sm:$0xff] %v4780_v36  ;;  %v4617_v61 = vadd.f32 %v4616_v19, %v7982_v62  ;;  %v6135_v24 = vpop.f32.mrb[10].mxu1  ;;  %v4730_v36 = vld [vmem:[%s6759_s6 + $0x98] sm:$0xff]  ;;  %v4728_v19 = vld [vmem:[%s6759_s6 + $0x88] sm:$0xff] }
 0x46d   : > { %v4753_v33 = vadd.f32 %v4721_v11, %v4625_v25  ;;  %v4628_v43 = vadd.f32 %v6135_v24, %v7990_v22  ;;  %v4619_v16 = vpop.f32.mrb[11].mxu1 }
 0x46e   : > { %v4751_v23 = vadd.f32 %v4719_v60, %v4617_v61  ;;  %v4620_v35 = vadd.f32 %v4619_v16, %v7984_v53 }
 0x46f   : > { %v4785_v12 = vmax.f32 %v4753_v33, 0.0  ;;  %v4754_v10 = vadd.f32 %v4722_v54, %v4628_v43 }
 0x470   : > { %v4783_v34 = vmax.f32 %v4751_v23, 0.0  ;;  %v4752_v47 = vadd.f32 %v4720_v30, %v4620_v35  ;;  %v4733_v30 = vld [vmem:[%s6759_s6 + $0xb0] sm:$0xff]  ;;  %v4731_v35 = vld [vmem:[%s6759_s6 + $0xa0] sm:$0xff] }
 0x471   : > { %4817 = vst [vmem:[%s8062_s11 + $0x50] sm:$0xff] %v4785_v12  ;;  %v4786_v62 = vmax.f32 %v4754_v10, 0.0  ;;  %v4734_v10 = vld [vmem:[%s6759_s6 + $0xb8] sm:$0xff] }
 0x472   : > { %4815 = vst [vmem:[%s8062_s11 + $0x40] sm:$0xff] %v4783_v34  ;;  %v4784_v13 = vmax.f32 %v4752_v47, 0.0  ;;  %v6138_v45 = vpop.f32.mrb[12].mxu1 }
 0x473   : > { %4818 = vst [vmem:[%s8062_s11 + $0x58] sm:$0xff] %v4786_v62  ;;  %v4641_v22 = vadd.f32 %v6138_v45, %v8000_v31  ;;  %v4632_v9 = vpop.f32.mrb[13].mxu1 }
 0x474   : > { %4816 = vst [vmem:[%s8062_s11 + $0x48] sm:$0xff] %v4784_v13  ;;  %v4633_v53 = vadd.f32 %v4632_v9, %v7994_v56  ;;  %v6139_v17 = vpop.f32.mrb[14].mxu1  ;;  %v4732_v13 = vld [vmem:[%s6759_s6 + $0xa8] sm:$0xff] }
 0x475   : > { %v4757_v39 = vadd.f32 %v4725_v26, %v4641_v22  ;;  %v4644_v55 = vadd.f32 %v6139_v17, %v8002_v5  ;;  %v4635_v44 = vpop.f32.mrb[15].mxu1 }
 0x476   : > { %v4755_v46 = vadd.f32 %v4723_v28, %v4633_v53  ;;  %v4636_v31 = vadd.f32 %v4635_v44, %v7996_v63 }
 0x477   : > { %v4789_v3 = vmax.f32 %v4757_v39, 0.0  ;;  %v4758_v57 = vadd.f32 %v4726_v52, %v4644_v55  ;;  %v4737_v52 = vld [vmem:[%s6759_s6 + $0xd0] sm:$0xff]  ;;  %v4735_v55 = vld [vmem:[%s6759_s6 + $0xc0] sm:$0xff] }
 0x478   : > { %v4787_v42 = vmax.f32 %v4755_v46, 0.0  ;;  %v4756_v0 = vadd.f32 %v4724_v51, %v4636_v31  ;;  %v4738_v51 = vld [vmem:[%s6759_s6 + $0xd8] sm:$0xff] }
 0x479   : > { %4821 = vst [vmem:[%s8062_s11 + $0x70] sm:$0xff] %v4789_v3  ;;  %v4790_v56 = vmax.f32 %v4758_v57, 0.0  ;;  %v4736_v57 = vld [vmem:[%s6759_s6 + $0xc8] sm:$0xff] }
 0x47a   : > { %4819 = vst [vmem:[%s8062_s11 + $0x60] sm:$0xff] %v4787_v42  ;;  %v4788_v14 = vmax.f32 %v4756_v0, 0.0  ;;  %v6142_v38 = vpop.f32.mrb[16].mxu1 }
 0x47b   : > { %4822 = vst [vmem:[%s8062_s11 + $0x78] sm:$0xff] %v4790_v56  ;;  %v4657_v5 = vadd.f32 %v6142_v38, %v8012_v50  ;;  %v4648_v49 = vpop.f32.mrb[17].mxu1 }
 0x47c   : > { %4820 = vst [vmem:[%s8062_s11 + $0x68] sm:$0xff] %v4788_v14  ;;  %v4649_v63 = vadd.f32 %v4648_v49, %v8006_v41  ;;  %v6143_v21 = vpop.f32.mrb[18].mxu1 }
 0x47d   : > { %v4761_v1 = vadd.f32 %v4729_v20, %v4657_v5  ;;  %v4660_v11 = vadd.f32 %v6143_v21, %v8014_v18  ;;  %v4651_v25 = vpop.f32.mrb[19].mxu1 }
 0x47e   : > { %v4759_v60 = vadd.f32 %v4727_v58, %v4649_v63  ;;  %v4652_v50 = vadd.f32 %v4651_v25, %v8008_v27  ;;  %v4739_v63 = vld [vmem:[%s6759_s6 + $0xe0] sm:$0xff] }
 0x47f   : > { %v4793_v61 = vmax.f32 %v4761_v1, 0.0  ;;  %v4762_v24 = vadd.f32 %v4730_v36, %v4660_v11  ;;  %v4742_v36 = vld [vmem:[%s6759_s6 + $0xf8] sm:$0xff] }
 0x480   : > { %v4791_v54 = vmax.f32 %v4759_v60, 0.0  ;;  %v4760_v33 = vadd.f32 %v4728_v19, %v4652_v50  ;;  %v4740_v19 = vld [vmem:[%s6759_s6 + $0xe8] sm:$0xff] }
 0x481   : > { %4825 = vst [vmem:[%s8062_s11 + $0x90] sm:$0xff] %v4793_v61  ;;  %v4794_v41 = vmax.f32 %v4762_v24, 0.0 }
 0x482   : > { %4823 = vst [vmem:[%s8062_s11 + $0x80] sm:$0xff] %v4791_v54  ;;  %v4792_v43 = vmax.f32 %v4760_v33, 0.0  ;;  %v6146_v16 = vpop.f32.mrb[20].mxu1 }
 0x483   : > { %4826 = vst [vmem:[%s8062_s11 + $0x98] sm:$0xff] %v4794_v41  ;;  %v4673_v18 = vadd.f32 %v6146_v16, %v8024_v7  ;;  %v4664_v23 = vpop.f32.mrb[21].mxu1 }
 0x484   : > { %4824 = vst [vmem:[%s8062_s11 + $0x88] sm:$0xff] %v4792_v43  ;;  %v4665_v27 = vadd.f32 %v4664_v23, %v8018_v48  ;;  %v6147_v12 = vpop.f32.mrb[22].mxu1 }
 0x485   : > { %v4765_v34 = vadd.f32 %v4733_v30, %v4673_v18  ;;  %v4676_v47 = vadd.f32 %v6147_v12, %v8026_v37  ;;  %v4667_v62 = vpop.f32.mrb[23].mxu1 }
 0x486   : > { %v4763_v45 = vadd.f32 %v4731_v35, %v4665_v27  ;;  %v4668_v7 = vadd.f32 %v4667_v62, %v8020_v59 }
 0x487   : > { %v4797_v26 = vmax.f32 %v4765_v34, 0.0  ;;  %v4766_v22 = vadd.f32 %v4734_v10, %v4676_v47 }
 0x488   : > { %v4795_v9 = vmax.f32 %v4763_v45, 0.0  ;;  %v4764_v28 = vadd.f32 %v4732_v13, %v4668_v7 }
 0x489   : > { %4829 = vst [vmem:[%s8062_s11 + $0xb0] sm:$0xff] %v4797_v26  ;;  %v4798_v48 = vmax.f32 %v4766_v22, 0.0 }
 0x48a   : > { %4827 = vst [vmem:[%s8062_s11 + $0xa0] sm:$0xff] %v4795_v9  ;;  %v4796_v53 = vmax.f32 %v4764_v28, 0.0  ;;  %v6150_v17 = vpop.f32.mrb[24].mxu1 }
 0x48b   : > { %4830 = vst [vmem:[%s8062_s11 + $0xb8] sm:$0xff] %v4798_v48  ;;  %v4689_v37 = vadd.f32 %v6150_v17, %v8036_v40  ;;  %v4680_v39 = vpop.f32.mrb[25].mxu1 }
 0x48c   : > { %4828 = vst [vmem:[%s8062_s11 + $0xa8] sm:$0xff] %v4796_v53  ;;  %v4681_v59 = vadd.f32 %v4680_v39, %v8030_v8  ;;  %v6151_v44 = vpop.f32.mrb[26].mxu1 }
 0x48d   : > { %v4769_v46 = vadd.f32 %v4737_v52, %v4689_v37  ;;  %v4692_v31 = vadd.f32 %v6151_v44, %v8038_v29  ;;  %v4683_v3 = vpop.f32.mrb[27].mxu1  ;;  %v4741_v29 = vld [vmem:[%s6759_s6 + $0xf0] sm:$0xff] }
 0x48e   : > { %v4767_v42 = vadd.f32 %v4735_v55, %v4681_v59  ;;  %v4684_v40 = vadd.f32 %v4683_v3, %v8032_v2 }
 0x48f   : > { %v4801_v0 = vmax.f32 %v4769_v46, 0.0  ;;  %v4770_v56 = vadd.f32 %v4738_v51, %v4692_v31 }
 0x490   : > { %v4799_v14 = vmax.f32 %v4767_v42, 0.0  ;;  %v4768_v38 = vadd.f32 %v4736_v57, %v4684_v40 }
 0x491   : > { %4833 = vst [vmem:[%s8062_s11 + $0xd0] sm:$0xff] %v4801_v0  ;;  %v4802_v8 = vmax.f32 %v4770_v56, 0.0 }
 0x492   : > { %4831 = vst [vmem:[%s8062_s11 + $0xc0] sm:$0xff] %v4799_v14  ;;  %v4800_v20 = vmax.f32 %v4768_v38, 0.0  ;;  %v6154_v5 = vpop.f32.mrb[28].mxu1 }
 0x493   : > { %4834 = vst [vmem:[%s8062_s11 + $0xd8] sm:$0xff] %v4802_v8  ;;  %v4705_v49 = vadd.f32 %v6154_v5, %v8048_v32  ;;  %v4696_v58 = vpop.f32.mrb[29].mxu1 }
 0x494   : > { %4832 = vst [vmem:[%s8062_s11 + $0xc8] sm:$0xff] %v4800_v20  ;;  %v4697_v2 = vadd.f32 %v4696_v58, %v8042_v15  ;;  %v6155_v21 = vpop.f32.mrb[30].mxu1 }
 0x495   : > { %v4773_v1 = vadd.f32 %v4741_v29, %v4705_v49  ;;  %v4708_v11 = vadd.f32 %v6155_v21, %v8053_v6  ;;  %v4699_v25 = vpop.f32.mrb[31].mxu1 }
 0x496   : > { %v4771_v60 = vadd.f32 %v4739_v63, %v4697_v2  ;;  %v4700_v32 = vadd.f32 %v4699_v25, %v8044_v4 }
 0x497   : > { %v4805_v50 = vmax.f32 %v4773_v1, 0.0  ;;  %v4774_v61 = vadd.f32 %v4742_v36, %v4708_v11 }
 0x498   : > { %v4803_v15 = vmax.f32 %v4771_v60, 0.0  ;;  %v4772_v24 = vadd.f32 %v4740_v19, %v4700_v32 }
 0x499   : > { %4837 = vst [vmem:[%s8062_s11 + $0xf0] sm:$0xff] %v4805_v50  ;;  %v4806_v54 = vmax.f32 %v4774_v61, 0.0 }
 0x49a   : > { %4835 = vst [vmem:[%s8062_s11 + $0xe0] sm:$0xff] %v4803_v15  ;;  %v4804_v4 = vmax.f32 %v4772_v24, 0.0 }
 0x49b   : > { %4838 = vst [vmem:[%s8062_s11 + $0xf8] sm:$0xff] %v4806_v54 }
 0x49c   : > { %4836 = vst [vmem:[%s8062_s11 + $0xe8] sm:$0xff] %v4804_v4 }
 0x49d   : > { %6481 = shalt.err (!%p6478_p2)
}
 0x49e   : > { %s6482_s6 = scalar_lea.hbm %s8154_s9, 4096  ;;  %s6486_s8 = scalar_lea.hbm %s8208_s5, 8192 }
 0x49f   : > { %p6483_p13 = scmp.ne.s32.totalorder %s8154_s9, %s6482_s6  ;;  %p6487_p4 = scmp.lt.u32.totalorder %s8154_s9, %s8208_s5 }
 0x4a0   : > { %p6488_p5 = scmp.lt.u32.totalorder %s6486_s8, %s6482_s6  ;;  %p6490_p11 = scmp.lt.u32.totalorder %s6482_s6, %s8154_s9 }
 0x4a1   : > { %p6484_p6 = pnand %p6483_p13, %p8335_p0 }
 0x4a2   : > { %p6489_p8 = por %p6488_p5, %p6487_p4 }
 0x4a3   : > { %p6485_p10 = pneg %p6484_p6 }
 0x4a4   : > { %p6491_p1 = por %p6490_p11, %p6489_p8 }
 0x4a6   : > { %p6492_p3 = pnand %p6491_p1, %p6485_p10 }
 0x4a8   : > { %6495 = shalt.err (!%p6492_p3)
}
 0x4a9   : > { %s6549_s28 = smov 128   ;;  %s6550_s15 = smov 8  }
 0x4aa   : > { %6166 = dma.vmem_to_hbm [thread:$0]  (%p8335_p0), %s8156_s30, 4096, %s8154_s9, %s4840_s22, %s6549_s28, %s6549_s28, %s6550_s15  }
 0x4ab PF: > { %s4869_s16 = sand.u32 1, %s6526_s18   ;;  %p8336_p7 = scmp.ne.s32.totalorder %s8247_s25, 0 }
 0x4ac   : > { %p8337_p9 = scmp.ge.s32.totalorder %s6538_s21, 2  ;;  %s4870_s12 = scalar_lea.sflag [#allocation6], %s4869_s16 }
 0x4ae   : > { %p6180_p12 = pnand %p8337_p9, %p8336_p7 }
 0x4b0   : > { %6521 = dma.done.wait (!%p6180_p12), %s4870_s12, 4096  }
 0x4b1   : > { %6523 = vsyncadd (!%p6180_p12), %s4870_s12, 4294963200  ;;  %p19_p2 = scmp.ge.s32.totalorder %s6691_s14, 4   ;;  %s8338_s18 = smov %s6530_s19 }
 0x4b2   : > { %s8339_s19 = smov %s6534_s20  ;;  %s8340_s20 = smov %s6707_s27 }
 0x4b3   : > { %s8341_s21 = smov %s6691_s14  ;;  %21 = sbr.rel (!%p19_p2) target bundleno = 6 (0x6), region = 96 }
 0x4ba   :  { %4875 = vsyncpa [#allocation5], 1 }
 0x4bb   :  { %4877 = vsyncpa [#allocation5 + $0x1], 1 }
 0x4bc   :  { %4878 = vsyncpa [#allocation8], 1 }
 0x4bd   :  { %4879 = vsyncpa [#allocation6], 1 }
 0x4be   :  { %4881 = vsyncpa [#allocation6 + $0x1], 1 }

</bundles_post_ra>
